<compile_context>
chip_gen: v7x
topology: tpu7x:2x2x1
jax: 0.10.0
libtpu: 0.0.40
codegen_flags: <defaults>
</compile_context>

<pallas_src>
import numpy as np
import jax
import jax.numpy as jnp
from jax.experimental import pallas as pl
from jax.experimental.pallas import tpu as pltpu


def interp_matrix(n_out, n_in):
    """PyTorch bilinear, align_corners=True interpolation matrix (n_out, n_in)."""
    m = np.zeros((n_out, n_in), np.float32)
    if n_out == 1:
        m[0, 0] = 1.0
        return m
    for i in range(n_out):
        src = i * (n_in - 1) / (n_out - 1)
        i0 = min(max(int(np.floor(src)), 0), n_in - 1)
        i1 = min(i0 + 1, n_in - 1)
        w = src - i0
        m[i, i0] += 1.0 - w
        m[i, i1] += w
    return m


def updt_kernel(x1_ref, x2_ref, wh_ref, wwt_ref, w3t_ref, shift_ref,
                w1t_ref, b1_ref, o_ref, pad_ref, acc_ref):
    # pad_ref: (Cin, H2+2, W2+2) f32 padded-concat scratch (channels on
    #          sublane-major axes, W on lanes).
    # acc_ref: (F, H2*W2) f32 conv accumulator (F=128 sublanes, H*W lanes).
    Cin, Hp, Wp = pad_ref.shape
    H2, W2 = Hp - 2, Wp - 2
    HW = H2 * W2
    C2 = x2_ref.shape[1]
    C1 = Cin - C2
    H1, W1 = x1_ref.shape[2], x1_ref.shape[3]
    F = acc_ref.shape[0]

    # --- separable bilinear upsample (align_corners=True), two small passes --
    x1 = x1_ref[0]                                              # (C1, H1, W1)
    wh_b = jnp.broadcast_to(wh_ref[...], (C1, H2, H1))          # shared H-interp
    up_h = jax.lax.dot_general(                                 # batched over C1
        wh_b, x1, dimension_numbers=(((2,), (1,)), ((0,), (0,))),
        preferred_element_type=jnp.float32)                     # (C1, H2, W1)
    up = jnp.dot(up_h.reshape(C1 * H2, W1), wwt_ref[...],
                 preferred_element_type=jnp.float32)            # (C1*H2, W2)
    up = up.reshape(C1, H2, W2)

    # --- zero only the 1-px border ring (interior fully overwritten below).
    #     Re-established every step: scratch is per-core under "parallel"
    #     grid semantics, so a once-at-step-0 init would be unsafe.
    zrow = jnp.zeros((Cin, 1, Wp), jnp.float32)
    zcol = jnp.zeros((Cin, Hp, 1), jnp.float32)
    pad_ref[:, 0:1, :] = zrow
    pad_ref[:, Hp - 1:Hp, :] = zrow
    pad_ref[:, :, 0:1] = zcol
    pad_ref[:, :, Wp - 1:Wp] = zcol

    # --- concat [up, x2] written straight into the padded interior -----------
    pad_ref[0:C1, 1:H2 + 1, 1:W2 + 1] = up
    pad_ref[C1:Cin, 1:H2 + 1, 1:W2 + 1] = x2_ref[0]             # (C2, H2, W2)

    # --- 3x3 conv (padding=1, no bias): 9 accumulated (F,Cin)@(Cin,HW) dots --
    for dy in range(3):
        for dx in range(3):
            t = dy * 3 + dx
            patch = pad_ref[:, dy:dy + H2, dx:dx + W2].reshape(Cin, HW)
            contrib = jnp.dot(w3t_ref[t], patch,
                              preferred_element_type=jnp.float32)   # (F, HW)
            if t == 0:
                acc_ref[...] = contrib
            else:
                acc_ref[...] += contrib

    # --- BatchNorm (eval; scale pre-folded into w3t) shift + ReLU ------------
    y = jnp.maximum(acc_ref[...] + shift_ref[...], 0.0)         # (F, HW)

    # --- 1x1 conv computed transposed -> lane-dense (Cout, HW), single store -
    out_t = jnp.dot(w1t_ref[...], y, preferred_element_type=jnp.float32)
    o_ref[0] = (out_t + b1_ref[...]).astype(o_ref.dtype)


def updt_forward(x1_nchw, x2_nchw, params):
    N, C1, H1, W1 = x1_nchw.shape
    _, C2, H2, W2 = x2_nchw.shape
    Cin = C1 + C2
    F = params['w3'].shape[3]
    Cout = params['w1'].shape[1]
    HW = H2 * W2
    Hp, Wp = H2 + 2, W2 + 2

    # Separable interp weights: (H2,H1) and (W1,W2) — tiny at any resolution.
    wh = jnp.asarray(interp_matrix(H2, H1))                     # (H2, H1)
    wwt = jnp.asarray(interp_matrix(W2, W1).T)                  # (W1, W2)

    # Fold eval-mode BN scale into the 3x3 conv weights (conv has no bias);
    # keep only the shift as a per-channel bias before the ReLU.
    scale = params['bn_scale'].reshape(F).astype(jnp.float32)
    shift = params['bn_shift'].reshape(F, 1).astype(jnp.float32)
    w3t = jnp.transpose(params['w3'], (0, 1, 3, 2))             # (3,3,F,Cin)
    w3t = (w3t * scale.reshape(1, 1, F, 1)).reshape(9, F, Cin).astype(jnp.float32)
    w1t = jnp.transpose(params['w1']).astype(jnp.float32)       # (Cout, F)
    b1 = params['b1'].reshape(Cout, 1).astype(jnp.float32)

    out_flat = pl.pallas_call(
        updt_kernel,
        out_shape=jax.ShapeDtypeStruct((N, Cout, HW), jnp.float32),
        grid=(N,),
        in_specs=[
            pl.BlockSpec((1, C1, H1, W1), lambda n: (n, 0, 0, 0)),   # x1 NCHW
            pl.BlockSpec((1, C2, H2, W2), lambda n: (n, 0, 0, 0)),   # x2 NCHW
            # Constant index maps: weights stay VMEM-resident across steps.
            pl.BlockSpec((H2, H1), lambda n: (0, 0)),                # Wh
            pl.BlockSpec((W1, W2), lambda n: (0, 0)),                # Ww^T
            pl.BlockSpec((9, F, Cin), lambda n: (0, 0, 0)),          # 3x3 (folded)
            pl.BlockSpec((F, 1), lambda n: (0, 0)),                  # BN shift
            pl.BlockSpec((Cout, F), lambda n: (0, 0)),               # 1x1 W^T
            pl.BlockSpec((Cout, 1), lambda n: (0, 0)),               # 1x1 bias
        ],
        out_specs=pl.BlockSpec((1, Cout, HW), lambda n: (n, 0, 0)),
        scratch_shapes=[pltpu.VMEM((Cin, Hp, Wp), jnp.float32),
                        pltpu.VMEM((F, HW), jnp.float32)],
        compiler_params=pltpu.CompilerParams(
            dimension_semantics=("parallel",),          # batch -> megacore
            vmem_limit_bytes=32 * 1024 * 1024),         # per-step use ~1.5 MiB
    )(x1_nchw.astype(jnp.float32), x2_nchw.astype(jnp.float32),
      wh, wwt, w3t, shift, w1t, b1)

    # Lane-dense (Cout, H*W) per-batch output -> NCHW via a pure reshape.
    return out_flat.reshape(N, Cout, H2, W2)


def reference(x1, x2, wh, ww, w3_hwio, scale, shift, w1, b1):
    """Pure-JAX f32 reference mirroring the PyTorch forward (eval-mode BN)."""
    up = jnp.einsum('oh,nchw->ncow', wh, x1)
    up = jnp.einsum('pw,ncow->ncop', ww, up)
    cat = jnp.concatenate([up, x2], axis=1)
    w3_oihw = jnp.transpose(w3_hwio, (3, 2, 0, 1))
    z = jax.lax.conv_general_dilated(
        cat, w3_oihw, window_strides=(1, 1), padding=((1, 1), (1, 1)),
        dimension_numbers=('NCHW', 'OIHW', 'NCHW'))
    z = z * scale.reshape(1, -1, 1, 1) + shift.reshape(1, -1, 1, 1)
    z = jnp.maximum(z, 0.0)
    out = jnp.einsum('co,nchw->nohw', w1, z) + b1.reshape(1, -1, 1, 1)
    return out


if __name__ == "__main__":
    key = jax.random.PRNGKey(0)
    keys = jax.random.split(key, 9)

    # x1: low-res feature map; x2: skip connection at 2x resolution.
    N, C1, H1, W1 = 2, 4, 8, 8
    C2 = 4
    scale_factor = 2
    H2, W2 = H1 * scale_factor, W1 * scale_factor
    Cin = C1 + C2
    Cout = 4
    F = 128

    x1 = jax.random.normal(keys[0], (N, C1, H1, W1), jnp.float32)
    x2 = jax.random.normal(keys[1], (N, C2, H2, W2), jnp.float32)

    # Deterministic synthetic parameters (shapes match the nn.Module).
    w3 = 0.1 * jax.random.normal(keys[2], (3, 3, Cin, F), jnp.float32)   # HWIO
    gamma = 1.0 + 0.1 * jax.random.normal(keys[3], (F,), jnp.float32)
    beta = 0.1 * jax.random.normal(keys[4], (F,), jnp.float32)
    rmean = 0.05 * jax.random.normal(keys[5], (F,), jnp.float32)
    rvar = 1.0 + 0.1 * jnp.abs(jax.random.normal(keys[6], (F,), jnp.float32))
    eps = 1e-5
    inv_std = gamma / jnp.sqrt(rvar + eps)
    bn_scale = inv_std.reshape(1, F)
    bn_shift = (beta - rmean * inv_std).reshape(1, F)
    w1 = 0.1 * jax.random.normal(keys[7], (F, Cout), jnp.float32)        # (in, out)
    b1 = 0.1 * jax.random.normal(keys[8], (1, Cout), jnp.float32)

    params = dict(w3=w3, bn_scale=bn_scale, bn_shift=bn_shift, w1=w1, b1=b1)

    out = jax.jit(updt_forward)(x1, x2, params)
    out = jax.block_until_ready(out)
    assert out.shape == (N, Cout, H2, W2), out.shape

    wh = jnp.asarray(interp_matrix(H2, H1))
    ww = jnp.asarray(interp_matrix(W2, W1))
    ref = reference(x1, x2, wh, ww, w3, bn_scale.reshape(F),
                    bn_shift.reshape(F), w1, b1.reshape(Cout))
    err = float(jnp.max(jnp.abs(out - ref)))
    assert err < 1e-3, f"max abs err {err}"

    print("KERNEL_OK")
</pallas_src>

<mosaic_0001>
module attributes {stable_mosaic.version = 11 : i64} {
  func.func @updt_kernel(%arg0: i32, %arg1: memref<1x4x8x8xf32, #tpu.memory_space<vmem>>, %arg2: memref<1x4x16x16xf32, #tpu.memory_space<vmem>>, %arg3: memref<16x8xf32, #tpu.memory_space<vmem>>, %arg4: memref<8x16xf32, #tpu.memory_space<vmem>>, %arg5: memref<9x128x8xf32, #tpu.memory_space<vmem>>, %arg6: memref<128x1xf32, #tpu.memory_space<vmem>>, %arg7: memref<4x128xf32, #tpu.memory_space<vmem>>, %arg8: memref<4x1xf32, #tpu.memory_space<vmem>>, %arg9: memref<1x4x256xf32, #tpu.memory_space<vmem>>, %arg10: memref<8x18x18xf32, #tpu.memory_space<vmem>>, %arg11: memref<128x256xf32, #tpu.memory_space<vmem>>) attributes {dimension_semantics = [#tpu.dimension_semantics<parallel>], iteration_bounds = array<i64: 2>, scalar_prefetch = 0 : i64, scratch_operands = 2 : i64, tpu.core_type = #tpu.core_type<tc>, window_params = [{transform_indices = @transform_0, window_bounds = array<i64: 1, 4, 8, 8>}, {transform_indices = @transform_1, window_bounds = array<i64: 1, 4, 16, 16>}, {pipeline_mode = #tpu.pipeline_mode<synchronous>, transform_indices = @transform_2, window_bounds = array<i64: 16, 8>}, {pipeline_mode = #tpu.pipeline_mode<synchronous>, transform_indices = @transform_3, window_bounds = array<i64: 8, 16>}, {pipeline_mode = #tpu.pipeline_mode<synchronous>, transform_indices = @transform_4, window_bounds = array<i64: 9, 128, 8>}, {pipeline_mode = #tpu.pipeline_mode<synchronous>, transform_indices = @transform_5, window_bounds = array<i64: 128, 1>}, {pipeline_mode = #tpu.pipeline_mode<synchronous>, transform_indices = @transform_6, window_bounds = array<i64: 4, 128>}, {pipeline_mode = #tpu.pipeline_mode<synchronous>, transform_indices = @transform_7, window_bounds = array<i64: 4, 1>}, {transform_indices = @transform_8, window_bounds = array<i64: 1, 4, 256>}]} {
    %c0 = arith.constant 0 : index
    %c0_0 = arith.constant 0 : index
    %c0_1 = arith.constant 0 : index
    %c0_2 = arith.constant 0 : index
    %0 = vector.load %arg1[%c0, %c0_0, %c0_1, %c0_2] : memref<1x4x8x8xf32, #tpu.memory_space<vmem>>, vector<1x4x8x8xf32>
    %1 = vector.shape_cast %0 : vector<1x4x8x8xf32> to vector<4x8x8xf32>
    %c0_3 = arith.constant 0 : index
    %c0_4 = arith.constant 0 : index
    %2 = vector.load %arg3[%c0_3, %c0_4] : memref<16x8xf32, #tpu.memory_space<vmem>>, vector<16x8xf32>
    %3 = vector.shape_cast %2 : vector<16x8xf32> to vector<1x16x8xf32>
    %4 = vector.broadcast %3 : vector<1x16x8xf32> to vector<4x16x8xf32>
    %cst = arith.constant dense<0.000000e+00> : vector<4x16x8xf32>
    %5 = tpu.matmul %4, %1, %cst {dimension_numbers = #tpu.dot_dimension_numbers<[2], [1], [1], [2], [0, 0, 0, 1, 1, 2], [0], [0]>} : vector<4x16x8xf32>, vector<4x8x8xf32>, vector<4x16x8xf32> -> vector<4x16x8xf32>
    %6 = vector.shape_cast %5 : vector<4x16x8xf32> to vector<64x8xf32>
    %c0_5 = arith.constant 0 : index
    %c0_6 = arith.constant 0 : index
    %7 = vector.load %arg4[%c0_5, %c0_6] : memref<8x16xf32, #tpu.memory_space<vmem>>, vector<8x16xf32>
    %cst_7 = arith.constant dense<0.000000e+00> : vector<64x16xf32>
    %8 = tpu.matmul %6, %7, %cst_7 {dimension_numbers = #tpu.dot_dimension_numbers<[1], [0], [0], [1], [0, 0, 1, 1], [], []>} : vector<64x8xf32>, vector<8x16xf32>, vector<64x16xf32> -> vector<64x16xf32>
    %9 = vector.shape_cast %8 : vector<64x16xf32> to vector<4x16x16xf32>
    %cst_8 = arith.constant 0.000000e+00 : f32
    %10 = vector.broadcast %cst_8 : f32 to vector<8x1x18xf32>
    %cst_9 = arith.constant 0.000000e+00 : f32
    %11 = vector.broadcast %cst_9 : f32 to vector<8x18x1xf32>
    %c0_10 = arith.constant 0 : index
    %c0_11 = arith.constant 0 : index
    %c0_12 = arith.constant 0 : index
    %12 = vector.load %arg10[%c0_10, %c0_11, %c0_12] : memref<8x18x18xf32, #tpu.memory_space<vmem>>, vector<8x1x18xf32>
    tpu.vector_store %arg10[%c0_10, %c0_11, %c0_12], %10 {strides = array<i32>} : memref<8x18x18xf32, #tpu.memory_space<vmem>>, vector<8x1x18xf32>,
    %c0_13 = arith.constant 0 : index
    %c17 = arith.constant 17 : index
    %c0_14 = arith.constant 0 : index
    %13 = vector.load %arg10[%c0_13, %c17, %c0_14] : memref<8x18x18xf32, #tpu.memory_space<vmem>>, vector<8x1x18xf32>
    tpu.vector_store %arg10[%c0_13, %c17, %c0_14], %10 {strides = array<i32>} : memref<8x18x18xf32, #tpu.memory_space<vmem>>, vector<8x1x18xf32>,
    %c0_15 = arith.constant 0 : index
    %c0_16 = arith.constant 0 : index
    %c0_17 = arith.constant 0 : index
    %14 = vector.load %arg10[%c0_15, %c0_16, %c0_17] : memref<8x18x18xf32, #tpu.memory_space<vmem>>, vector<8x18x1xf32>
    tpu.vector_store %arg10[%c0_15, %c0_16, %c0_17], %11 {strides = array<i32>} : memref<8x18x18xf32, #tpu.memory_space<vmem>>, vector<8x18x1xf32>,
    %c0_18 = arith.constant 0 : index
    %c0_19 = arith.constant 0 : index
    %c17_20 = arith.constant 17 : index
    %15 = vector.load %arg10[%c0_18, %c0_19, %c17_20] : memref<8x18x18xf32, #tpu.memory_space<vmem>>, vector<8x18x1xf32>
    tpu.vector_store %arg10[%c0_18, %c0_19, %c17_20], %11 {strides = array<i32>} : memref<8x18x18xf32, #tpu.memory_space<vmem>>, vector<8x18x1xf32>,
    %c0_21 = arith.constant 0 : index
    %c1 = arith.constant 1 : index
    %c1_22 = arith.constant 1 : index
    %16 = vector.load %arg10[%c0_21, %c1, %c1_22] : memref<8x18x18xf32, #tpu.memory_space<vmem>>, vector<4x16x16xf32>
    tpu.vector_store %arg10[%c0_21, %c1, %c1_22], %9 {strides = array<i32>} : memref<8x18x18xf32, #tpu.memory_space<vmem>>, vector<4x16x16xf32>,
    %c0_23 = arith.constant 0 : index
    %c0_24 = arith.constant 0 : index
    %c0_25 = arith.constant 0 : index
    %c0_26 = arith.constant 0 : index
    %17 = vector.load %arg2[%c0_23, %c0_24, %c0_25, %c0_26] : memref<1x4x16x16xf32, #tpu.memory_space<vmem>>, vector<1x4x16x16xf32>
    %18 = vector.shape_cast %17 : vector<1x4x16x16xf32> to vector<4x16x16xf32>
    %c4 = arith.constant 4 : index
    %c1_27 = arith.constant 1 : index
    %c1_28 = arith.constant 1 : index
    %19 = vector.load %arg10[%c4, %c1_27, %c1_28] : memref<8x18x18xf32, #tpu.memory_space<vmem>>, vector<4x16x16xf32>
    tpu.vector_store %arg10[%c4, %c1_27, %c1_28], %18 {strides = array<i32>} : memref<8x18x18xf32, #tpu.memory_space<vmem>>, vector<4x16x16xf32>,
    %c0_29 = arith.constant 0 : index
    %c0_30 = arith.constant 0 : index
    %c0_31 = arith.constant 0 : index
    %20 = vector.load %arg10[%c0_29, %c0_30, %c0_31] : memref<8x18x18xf32, #tpu.memory_space<vmem>>, vector<8x16x16xf32>
    %21 = vector.shape_cast %20 : vector<8x16x16xf32> to vector<8x256xf32>
    %c0_32 = arith.constant 0 : index
    %c0_33 = arith.constant 0 : index
    %c0_34 = arith.constant 0 : index
    %22 = vector.load %arg5[%c0_32, %c0_33, %c0_34] : memref<9x128x8xf32, #tpu.memory_space<vmem>>, vector<1x128x8xf32>
    %23 = vector.shape_cast %22 : vector<1x128x8xf32> to vector<128x8xf32>
    %cst_35 = arith.constant dense<0.000000e+00> : vector<128x256xf32>
    %24 = tpu.matmul %23, %21, %cst_35 {dimension_numbers = #tpu.dot_dimension_numbers<[1], [0], [0], [1], [0, 0, 1, 1], [], []>} : vector<128x8xf32>, vector<8x256xf32>, vector<128x256xf32> -> vector<128x256xf32>
    %c0_36 = arith.constant 0 : index
    %c0_37 = arith.constant 0 : index
    %25 = vector.load %arg11[%c0_36, %c0_37] : memref<128x256xf32, #tpu.memory_space<vmem>>, vector<128x256xf32>
    tpu.vector_store %arg11[%c0_36, %c0_37], %24 {strides = array<i32>} : memref<128x256xf32, #tpu.memory_space<vmem>>, vector<128x256xf32>,
    %c0_38 = arith.constant 0 : index
    %c0_39 = arith.constant 0 : index
    %c1_40 = arith.constant 1 : index
    %26 = vector.load %arg10[%c0_38, %c0_39, %c1_40] : memref<8x18x18xf32, #tpu.memory_space<vmem>>, vector<8x16x16xf32>
    %27 = vector.shape_cast %26 : vector<8x16x16xf32> to vector<8x256xf32>
    %c1_41 = arith.constant 1 : index
    %c0_42 = arith.constant 0 : index
    %c0_43 = arith.constant 0 : index
    %28 = vector.load %arg5[%c1_41, %c0_42, %c0_43] : memref<9x128x8xf32, #tpu.memory_space<vmem>>, vector<1x128x8xf32>
    %29 = vector.shape_cast %28 : vector<1x128x8xf32> to vector<128x8xf32>
    %cst_44 = arith.constant dense<0.000000e+00> : vector<128x256xf32>
    %30 = tpu.matmul %29, %27, %cst_44 {dimension_numbers = #tpu.dot_dimension_numbers<[1], [0], [0], [1], [0, 0, 1, 1], [], []>} : vector<128x8xf32>, vector<8x256xf32>, vector<128x256xf32> -> vector<128x256xf32>
    %c0_45 = arith.constant 0 : index
    %c0_46 = arith.constant 0 : index
    %31 = vector.load %arg11[%c0_45, %c0_46] : memref<128x256xf32, #tpu.memory_space<vmem>>, vector<128x256xf32>
    %32 = arith.addf %31, %30 : vector<128x256xf32>
    %c0_47 = arith.constant 0 : index
    %c0_48 = arith.constant 0 : index
    %33 = vector.load %arg11[%c0_47, %c0_48] : memref<128x256xf32, #tpu.memory_space<vmem>>, vector<128x256xf32>
    tpu.vector_store %arg11[%c0_47, %c0_48], %32 {strides = array<i32>} : memref<128x256xf32, #tpu.memory_space<vmem>>, vector<128x256xf32>,
    %c0_49 = arith.constant 0 : index
    %c0_50 = arith.constant 0 : index
    %c2 = arith.constant 2 : index
    %34 = vector.load %arg10[%c0_49, %c0_50, %c2] : memref<8x18x18xf32, #tpu.memory_space<vmem>>, vector<8x16x16xf32>
    %35 = vector.shape_cast %34 : vector<8x16x16xf32> to vector<8x256xf32>
    %c2_51 = arith.constant 2 : index
    %c0_52 = arith.constant 0 : index
    %c0_53 = arith.constant 0 : index
    %36 = vector.load %arg5[%c2_51, %c0_52, %c0_53] : memref<9x128x8xf32, #tpu.memory_space<vmem>>, vector<1x128x8xf32>
    %37 = vector.shape_cast %36 : vector<1x128x8xf32> to vector<128x8xf32>
    %cst_54 = arith.constant dense<0.000000e+00> : vector<128x256xf32>
    %38 = tpu.matmul %37, %35, %cst_54 {dimension_numbers = #tpu.dot_dimension_numbers<[1], [0], [0], [1], [0, 0, 1, 1], [], []>} : vector<128x8xf32>, vector<8x256xf32>, vector<128x256xf32> -> vector<128x256xf32>
    %c0_55 = arith.constant 0 : index
    %c0_56 = arith.constant 0 : index
    %39 = vector.load %arg11[%c0_55, %c0_56] : memref<128x256xf32, #tpu.memory_space<vmem>>, vector<128x256xf32>
    %40 = arith.addf %39, %38 : vector<128x256xf32>
    %c0_57 = arith.constant 0 : index
    %c0_58 = arith.constant 0 : index
    %41 = vector.load %arg11[%c0_57, %c0_58] : memref<128x256xf32, #tpu.memory_space<vmem>>, vector<128x256xf32>
    tpu.vector_store %arg11[%c0_57, %c0_58], %40 {strides = array<i32>} : memref<128x256xf32, #tpu.memory_space<vmem>>, vector<128x256xf32>,
    %c0_59 = arith.constant 0 : index
    %c1_60 = arith.constant 1 : index
    %c0_61 = arith.constant 0 : index
    %42 = vector.load %arg10[%c0_59, %c1_60, %c0_61] : memref<8x18x18xf32, #tpu.memory_space<vmem>>, vector<8x16x16xf32>
    %43 = vector.shape_cast %42 : vector<8x16x16xf32> to vector<8x256xf32>
    %c3 = arith.constant 3 : index
    %c0_62 = arith.constant 0 : index
    %c0_63 = arith.constant 0 : index
    %44 = vector.load %arg5[%c3, %c0_62, %c0_63] : memref<9x128x8xf32, #tpu.memory_space<vmem>>, vector<1x128x8xf32>
    %45 = vector.shape_cast %44 : vector<1x128x8xf32> to vector<128x8xf32>
    %cst_64 = arith.constant dense<0.000000e+00> : vector<128x256xf32>
    %46 = tpu.matmul %45, %43, %cst_64 {dimension_numbers = #tpu.dot_dimension_numbers<[1], [0], [0], [1], [0, 0, 1, 1], [], []>} : vector<128x8xf32>, vector<8x256xf32>, vector<128x256xf32> -> vector<128x256xf32>
    %c0_65 = arith.constant 0 : index
    %c0_66 = arith.constant 0 : index
    %47 = vector.load %arg11[%c0_65, %c0_66] : memref<128x256xf32, #tpu.memory_space<vmem>>, vector<128x256xf32>
    %48 = arith.addf %47, %46 : vector<128x256xf32>
    %c0_67 = arith.constant 0 : index
    %c0_68 = arith.constant 0 : index
    %49 = vector.load %arg11[%c0_67, %c0_68] : memref<128x256xf32, #tpu.memory_space<vmem>>, vector<128x256xf32>
    tpu.vector_store %arg11[%c0_67, %c0_68], %48 {strides = array<i32>} : memref<128x256xf32, #tpu.memory_space<vmem>>, vector<128x256xf32>,
    %c0_69 = arith.constant 0 : index
    %c1_70 = arith.constant 1 : index
    %c1_71 = arith.constant 1 : index
    %50 = vector.load %arg10[%c0_69, %c1_70, %c1_71] : memref<8x18x18xf32, #tpu.memory_space<vmem>>, vector<8x16x16xf32>
    %51 = vector.shape_cast %50 : vector<8x16x16xf32> to vector<8x256xf32>
    %c4_72 = arith.constant 4 : index
    %c0_73 = arith.constant 0 : index
    %c0_74 = arith.constant 0 : index
    %52 = vector.load %arg5[%c4_72, %c0_73, %c0_74] : memref<9x128x8xf32, #tpu.memory_space<vmem>>, vector<1x128x8xf32>
    %53 = vector.shape_cast %52 : vector<1x128x8xf32> to vector<128x8xf32>
    %cst_75 = arith.constant dense<0.000000e+00> : vector<128x256xf32>
    %54 = tpu.matmul %53, %51, %cst_75 {dimension_numbers = #tpu.dot_dimension_numbers<[1], [0], [0], [1], [0, 0, 1, 1], [], []>} : vector<128x8xf32>, vector<8x256xf32>, vector<128x256xf32> -> vector<128x256xf32>
    %c0_76 = arith.constant 0 : index
    %c0_77 = arith.constant 0 : index
    %55 = vector.load %arg11[%c0_76, %c0_77] : memref<128x256xf32, #tpu.memory_space<vmem>>, vector<128x256xf32>
    %56 = arith.addf %55, %54 : vector<128x256xf32>
    %c0_78 = arith.constant 0 : index
    %c0_79 = arith.constant 0 : index
    %57 = vector.load %arg11[%c0_78, %c0_79] : memref<128x256xf32, #tpu.memory_space<vmem>>, vector<128x256xf32>
    tpu.vector_store %arg11[%c0_78, %c0_79], %56 {strides = array<i32>} : memref<128x256xf32, #tpu.memory_space<vmem>>, vector<128x256xf32>,
    %c0_80 = arith.constant 0 : index
    %c1_81 = arith.constant 1 : index
    %c2_82 = arith.constant 2 : index
    %58 = vector.load %arg10[%c0_80, %c1_81, %c2_82] : memref<8x18x18xf32, #tpu.memory_space<vmem>>, vector<8x16x16xf32>
    %59 = vector.shape_cast %58 : vector<8x16x16xf32> to vector<8x256xf32>
    %c5 = arith.constant 5 : index
    %c0_83 = arith.constant 0 : index
    %c0_84 = arith.constant 0 : index
    %60 = vector.load %arg5[%c5, %c0_83, %c0_84] : memref<9x128x8xf32, #tpu.memory_space<vmem>>, vector<1x128x8xf32>
    %61 = vector.shape_cast %60 : vector<1x128x8xf32> to vector<128x8xf32>
    %cst_85 = arith.constant dense<0.000000e+00> : vector<128x256xf32>
    %62 = tpu.matmul %61, %59, %cst_85 {dimension_numbers = #tpu.dot_dimension_numbers<[1], [0], [0], [1], [0, 0, 1, 1], [], []>} : vector<128x8xf32>, vector<8x256xf32>, vector<128x256xf32> -> vector<128x256xf32>
    %c0_86 = arith.constant 0 : index
    %c0_87 = arith.constant 0 : index
    %63 = vector.load %arg11[%c0_86, %c0_87] : memref<128x256xf32, #tpu.memory_space<vmem>>, vector<128x256xf32>
    %64 = arith.addf %63, %62 : vector<128x256xf32>
    %c0_88 = arith.constant 0 : index
    %c0_89 = arith.constant 0 : index
    %65 = vector.load %arg11[%c0_88, %c0_89] : memref<128x256xf32, #tpu.memory_space<vmem>>, vector<128x256xf32>
    tpu.vector_store %arg11[%c0_88, %c0_89], %64 {strides = array<i32>} : memref<128x256xf32, #tpu.memory_space<vmem>>, vector<128x256xf32>,
    %c0_90 = arith.constant 0 : index
    %c2_91 = arith.constant 2 : index
    %c0_92 = arith.constant 0 : index
    %66 = vector.load %arg10[%c0_90, %c2_91, %c0_92] : memref<8x18x18xf32, #tpu.memory_space<vmem>>, vector<8x16x16xf32>
    %67 = vector.shape_cast %66 : vector<8x16x16xf32> to vector<8x256xf32>
    %c6 = arith.constant 6 : index
    %c0_93 = arith.constant 0 : index
    %c0_94 = arith.constant 0 : index
    %68 = vector.load %arg5[%c6, %c0_93, %c0_94] : memref<9x128x8xf32, #tpu.memory_space<vmem>>, vector<1x128x8xf32>
    %69 = vector.shape_cast %68 : vector<1x128x8xf32> to vector<128x8xf32>
    %cst_95 = arith.constant dense<0.000000e+00> : vector<128x256xf32>
    %70 = tpu.matmul %69, %67, %cst_95 {dimension_numbers = #tpu.dot_dimension_numbers<[1], [0], [0], [1], [0, 0, 1, 1], [], []>} : vector<128x8xf32>, vector<8x256xf32>, vector<128x256xf32> -> vector<128x256xf32>
    %c0_96 = arith.constant 0 : index
    %c0_97 = arith.constant 0 : index
    %71 = vector.load %arg11[%c0_96, %c0_97] : memref<128x256xf32, #tpu.memory_space<vmem>>, vector<128x256xf32>
    %72 = arith.addf %71, %70 : vector<128x256xf32>
    %c0_98 = arith.constant 0 : index
    %c0_99 = arith.constant 0 : index
    %73 = vector.load %arg11[%c0_98, %c0_99] : memref<128x256xf32, #tpu.memory_space<vmem>>, vector<128x256xf32>
    tpu.vector_store %arg11[%c0_98, %c0_99], %72 {strides = array<i32>} : memref<128x256xf32, #tpu.memory_space<vmem>>, vector<128x256xf32>,
    %c0_100 = arith.constant 0 : index
    %c2_101 = arith.constant 2 : index
    %c1_102 = arith.constant 1 : index
    %74 = vector.load %arg10[%c0_100, %c2_101, %c1_102] : memref<8x18x18xf32, #tpu.memory_space<vmem>>, vector<8x16x16xf32>
    %75 = vector.shape_cast %74 : vector<8x16x16xf32> to vector<8x256xf32>
    %c7 = arith.constant 7 : index
    %c0_103 = arith.constant 0 : index
    %c0_104 = arith.constant 0 : index
    %76 = vector.load %arg5[%c7, %c0_103, %c0_104] : memref<9x128x8xf32, #tpu.memory_space<vmem>>, vector<1x128x8xf32>
    %77 = vector.shape_cast %76 : vector<1x128x8xf32> to vector<128x8xf32>
    %cst_105 = arith.constant dense<0.000000e+00> : vector<128x256xf32>
    %78 = tpu.matmul %77, %75, %cst_105 {dimension_numbers = #tpu.dot_dimension_numbers<[1], [0], [0], [1], [0, 0, 1, 1], [], []>} : vector<128x8xf32>, vector<8x256xf32>, vector<128x256xf32> -> vector<128x256xf32>
    %c0_106 = arith.constant 0 : index
    %c0_107 = arith.constant 0 : index
    %79 = vector.load %arg11[%c0_106, %c0_107] : memref<128x256xf32, #tpu.memory_space<vmem>>, vector<128x256xf32>
    %80 = arith.addf %79, %78 : vector<128x256xf32>
    %c0_108 = arith.constant 0 : index
    %c0_109 = arith.constant 0 : index
    %81 = vector.load %arg11[%c0_108, %c0_109] : memref<128x256xf32, #tpu.memory_space<vmem>>, vector<128x256xf32>
    tpu.vector_store %arg11[%c0_108, %c0_109], %80 {strides = array<i32>} : memref<128x256xf32, #tpu.memory_space<vmem>>, vector<128x256xf32>,
    %c0_110 = arith.constant 0 : index
    %c2_111 = arith.constant 2 : index
    %c2_112 = arith.constant 2 : index
    %82 = vector.load %arg10[%c0_110, %c2_111, %c2_112] : memref<8x18x18xf32, #tpu.memory_space<vmem>>, vector<8x16x16xf32>
    %83 = vector.shape_cast %82 : vector<8x16x16xf32> to vector<8x256xf32>
    %c8 = arith.constant 8 : index
    %c0_113 = arith.constant 0 : index
    %c0_114 = arith.constant 0 : index
    %84 = vector.load %arg5[%c8, %c0_113, %c0_114] : memref<9x128x8xf32, #tpu.memory_space<vmem>>, vector<1x128x8xf32>
    %85 = vector.shape_cast %84 : vector<1x128x8xf32> to vector<128x8xf32>
    %cst_115 = arith.constant dense<0.000000e+00> : vector<128x256xf32>
    %86 = tpu.matmul %85, %83, %cst_115 {dimension_numbers = #tpu.dot_dimension_numbers<[1], [0], [0], [1], [0, 0, 1, 1], [], []>} : vector<128x8xf32>, vector<8x256xf32>, vector<128x256xf32> -> vector<128x256xf32>
    %c0_116 = arith.constant 0 : index
    %c0_117 = arith.constant 0 : index
    %87 = vector.load %arg11[%c0_116, %c0_117] : memref<128x256xf32, #tpu.memory_space<vmem>>, vector<128x256xf32>
    %88 = arith.addf %87, %86 : vector<128x256xf32>
    %c0_118 = arith.constant 0 : index
    %c0_119 = arith.constant 0 : index
    %89 = vector.load %arg11[%c0_118, %c0_119] : memref<128x256xf32, #tpu.memory_space<vmem>>, vector<128x256xf32>
    tpu.vector_store %arg11[%c0_118, %c0_119], %88 {strides = array<i32>} : memref<128x256xf32, #tpu.memory_space<vmem>>, vector<128x256xf32>,
    %c0_120 = arith.constant 0 : index
    %c0_121 = arith.constant 0 : index
    %90 = vector.load %arg11[%c0_120, %c0_121] : memref<128x256xf32, #tpu.memory_space<vmem>>, vector<128x256xf32>
    %c0_122 = arith.constant 0 : index
    %c0_123 = arith.constant 0 : index
    %91 = vector.load %arg6[%c0_122, %c0_123] : memref<128x1xf32, #tpu.memory_space<vmem>>, vector<128x1xf32>
    %92 = vector.broadcast %91 : vector<128x1xf32> to vector<128x256xf32>
    %93 = arith.addf %90, %92 : vector<128x256xf32>
    %cst_124 = arith.constant 0.000000e+00 : f32
    %94 = vector.broadcast %cst_124 : f32 to vector<128x256xf32>
    %95 = arith.maximumf %93, %94 : vector<128x256xf32>
    %c0_125 = arith.constant 0 : index
    %c0_126 = arith.constant 0 : index
    %96 = vector.load %arg7[%c0_125, %c0_126] : memref<4x128xf32, #tpu.memory_space<vmem>>, vector<4x128xf32>
    %cst_127 = arith.constant dense<0.000000e+00> : vector<4x256xf32>
    %97 = tpu.matmul %96, %95, %cst_127 {dimension_numbers = #tpu.dot_dimension_numbers<[1], [0], [0], [1], [0, 0, 1, 1], [], []>} : vector<4x128xf32>, vector<128x256xf32>, vector<4x256xf32> -> vector<4x256xf32>
    %c0_128 = arith.constant 0 : index
    %c0_129 = arith.constant 0 : index
    %98 = vector.load %arg8[%c0_128, %c0_129] : memref<4x1xf32, #tpu.memory_space<vmem>>, vector<4x1xf32>
    %99 = vector.broadcast %98 : vector<4x1xf32> to vector<4x256xf32>
    %100 = arith.addf %97, %99 : vector<4x256xf32>
    %c0_130 = arith.constant 0 : index
    %c0_131 = arith.constant 0 : index
    %c0_132 = arith.constant 0 : index
    %101 = vector.load %arg9[%c0_130, %c0_131, %c0_132] : memref<1x4x256xf32, #tpu.memory_space<vmem>>, vector<1x4x256xf32>
    %102 = vector.shape_cast %101 : vector<1x4x256xf32> to vector<4x256xf32>
    %103 = vector.shape_cast %100 : vector<4x256xf32> to vector<1x4x256xf32>
    tpu.vector_store %arg9[%c0_130, %c0_131, %c0_132], %103 {strides = array<i32>} : memref<1x4x256xf32, #tpu.memory_space<vmem>>, vector<1x4x256xf32>,
    return
  }
  func.func @transform_0(%arg0: i32) -> (i32, i32, i32, i32) {
    %c0_i32 = arith.constant 0 : i32
    %c0_i32_0 = arith.constant 0 : i32
    %c0_i32_1 = arith.constant 0 : i32
    %c0_i32_2 = arith.constant 0 : i32
    return %arg0, %c0_i32, %c0_i32_0, %c0_i32_1 : i32, i32, i32, i32
  }
  func.func @transform_1(%arg0: i32) -> (i32, i32, i32, i32) {
    %c0_i32 = arith.constant 0 : i32
    %c0_i32_0 = arith.constant 0 : i32
    %c0_i32_1 = arith.constant 0 : i32
    %c0_i32_2 = arith.constant 0 : i32
    return %arg0, %c0_i32, %c0_i32_0, %c0_i32_1 : i32, i32, i32, i32
  }
  func.func @transform_2(%arg0: i32) -> (i32, i32) {
    %c0_i32 = arith.constant 0 : i32
    %c0_i32_0 = arith.constant 0 : i32
    %c0_i32_1 = arith.constant 0 : i32
    return %c0_i32, %c0_i32_0 : i32, i32
  }
  func.func @transform_3(%arg0: i32) -> (i32, i32) {
    %c0_i32 = arith.constant 0 : i32
    %c0_i32_0 = arith.constant 0 : i32
    %c0_i32_1 = arith.constant 0 : i32
    return %c0_i32, %c0_i32_0 : i32, i32
  }
  func.func @transform_4(%arg0: i32) -> (i32, i32, i32) {
    %c0_i32 = arith.constant 0 : i32
    %c0_i32_0 = arith.constant 0 : i32
    %c0_i32_1 = arith.constant 0 : i32
    %c0_i32_2 = arith.constant 0 : i32
    return %c0_i32, %c0_i32_0, %c0_i32_1 : i32, i32, i32
  }
  func.func @transform_5(%arg0: i32) -> (i32, i32) {
    %c0_i32 = arith.constant 0 : i32
    %c0_i32_0 = arith.constant 0 : i32
    %c0_i32_1 = arith.constant 0 : i32
    return %c0_i32, %c0_i32_0 : i32, i32
  }
  func.func @transform_6(%arg0: i32) -> (i32, i32) {
    %c0_i32 = arith.constant 0 : i32
    %c0_i32_0 = arith.constant 0 : i32
    %c0_i32_1 = arith.constant 0 : i32
    return %c0_i32, %c0_i32_0 : i32, i32
  }
  func.func @transform_7(%arg0: i32) -> (i32, i32) {
    %c0_i32 = arith.constant 0 : i32
    %c0_i32_0 = arith.constant 0 : i32
    %c0_i32_1 = arith.constant 0 : i32
    return %c0_i32, %c0_i32_0 : i32, i32
  }
  func.func @transform_8(%arg0: i32) -> (i32, i32, i32) {
    %c0_i32 = arith.constant 0 : i32
    %c0_i32_0 = arith.constant 0 : i32
    %c0_i32_1 = arith.constant 0 : i32
    return %arg0, %c0_i32, %c0_i32_0 : i32, i32, i32
  }
}

</mosaic_0001>

<bundles_post_ra>
// kernel: updt_forward.1
= control target key start
LH: loop header
LB: loop body
LE: loop exit
PB: predicated region body
PF: predicated region fallthrough
CT: control target
= control target key end

     0   :  { %s8513_s27 = smov 0   ;;  %s11434_s0 = inlined_call_operand.vmem [shape: f32[2,4,8,8], index: 0, kind: input, shape index: {}]   ;;  %s11435_s1 = inlined_call_operand.vmem [shape: f32[2,4,16,16], index: 1, kind: input, shape index: {}]   ;;  %s11436_s2 = inlined_call_operand.vmem [shape: f32[16,8], index: 2, kind: input, shape index: {}]   ;;  %s11437_s3 = inlined_call_operand.vmem [shape: f32[8,16], index: 3, kind: input, shape index: {}]   ;;  %s11438_s4 = inlined_call_operand.vmem [shape: f32[9,128,8], index: 4, kind: input, shape index: {}]   ;;  %s11439_s5 = inlined_call_operand.vmem [shape: f32[128,1], index: 5, kind: input, shape index: {}]   ;;  %s11440_s6 = inlined_call_operand.vmem [shape: f32[4,128], index: 6, kind: input, shape index: {}]   ;;  %s11441_s7 = inlined_call_operand.vmem [shape: f32[4,1], index: 7, kind: input, shape index: {}]   ;;  %s11442_s8 = inlined_call_operand.vmem [shape: f32[2,4,256], index: 8, kind: output, shape index: {}]  }
   0x1 LB: > { %s7716_s28 = sadd.s32 4294967295, %s8452_s27   ;;  %p7720_p0 = scmp.ge.s32.totalorder %s8452_s27, 1  ;;  %s8452_s27 = sphi %s8513_s27, %s18_s27  }
   0x2   : > { %p272_p1 = scmp.lt.s32.totalorder %s8452_s27, 3 }
   0x4   : > { %p273_p2 = pnand %p7720_p0, %p272_p1 }
   0x6   : > { %276 = sbr.rel (%p273_p2) target bundleno = 1696 (0x6a0), region = 52 }
   0xd   : > { %p311_p3 = scmp.lt.s32.totalorder %s7716_s28, 1  ;;  %v330_v0 = vld [vmem:[%s11436_s2] sm:$0xff]  ;;  %vm332_vm0 = vcmask 64512   ;;  %v331_v2 = vld [vmem:[%s11436_s2 + $0x8] sm:$0xff]  ;;  %s8454_s19 = smov 1   ;;  %vm769_vm1 = vcmask 139264  }
   0xe   : > { %8043 = vmatprep.mubr.msk.f32.mxu0 %vm332_vm0, %v330_v0  ;;  %v639_v14 = vld [vmem:[%s11437_s3] sm:$0xff]  ;;  %vm786_vm2 = vcmask 7168   ;;  %vm789_vm3 = vcmask 1024   ;;  %v11443_v15 = vmov 0.0   ;;  %vm812_vm4 = vcmask 146568   ;;  %s8456_s22 = smov 127  }
   0xf   : > { %s11747_s28 = smov (!%p311_p3, %s7716_s28), 1  ;;  %783 = vst.msk [vmem:[#allocation2 + $0x89] sm:$0x1] %vm769_vm1, %v11443_v15  ;;  %vm815_vm5 = vcmask 140424   ;;  %770 = vst.msk [vmem:[#allocation2] sm:$0x1] %vm769_vm1, %v11443_v15  ;;  %4269 = vmatprep.mubr.f32.mxu1 %v11443_v15 }
  0x10   : > { %s8017_s9 = sshll.u32 %s11747_s28, 5  ;;  %s8018_s10 = sshll.u32 %s11747_s28, 6  ;;  %804 = vst.msk [vmem:[#allocation2 + $0x80] sm:$0xff] %vm786_vm2, %v11443_v15  ;;  %788 = vst.msk [vmem:[#allocation2 + $0x8] sm:$0xff] %vm786_vm2, %v11443_v15  ;;  %vm870_vm6 = vcmask 138248   ;;  %vm1272_vm7 = vcmask 130048  }
  0x11   : > { %s315_s13 = scalar_lea.vmem %s11434_s0, %s8017_s9  ;;  %s8535_s16 = scalar_lea.vmem %s11435_s1, %s8018_s10  ;;  %771 = vst.msk [vmem:[#allocation2 + $0x18] sm:$0x1] %vm769_vm1, %v11443_v15  ;;  %772 = vst.msk [vmem:[#allocation2 + $0x30] sm:$0x1] %vm769_vm1, %v11443_v15  ;;  %vm1274_vm8 = vcmask 261120   ;;  %vm1276_vm9 = vcmask 392192  }
  0x12   : > { %v326_v1 = vld [vmem:[%s315_s13] sm:$0xff]  ;;  %v327_v3 = vld [vmem:[%s315_s13 + $0x8] sm:$0xff]  ;;  %v882_v4 = vld [vmem:[%s8535_s16 + $0x18] sm:$0xff]  ;;  %773 = vst.msk [vmem:[#allocation2 + $0x48] sm:$0x1] %vm769_vm1, %v11443_v15  ;;  %s8457_s23 = smov 126  }
  0x13   : > { %8041 = vmatprep.subr.mxu0 %v326_v1  ;;  %v328_v5 = vld [vmem:[%s315_s13 + $0x10] sm:$0xff]  ;;  %901 = vrot.lane.b32.xlu1 %v882_v4, %s8454_s19  ;;  %v880_v6 = vld [vmem:[%s8535_s16 + $0x8] sm:$0xff]  ;;  %v886_v7 = vld [vmem:[%s8535_s16 + $0x38] sm:$0xff]  ;;  %774 = vst.msk [vmem:[#allocation2 + $0x60] sm:$0x1] %vm769_vm1, %v11443_v15  ;;  %s8460_s24 = smov 16  }
  0x14   : > { %8042 = vmatpush3.msra.mxu0 %v326_v1  ;;  %897 = vrot.lane.b32.xlu0 %v880_v6, %s8454_s19  ;;  %v329_v8 = vld [vmem:[%s315_s13 + $0x18] sm:$0xff]  ;;  %v884_v9 = vld [vmem:[%s8535_s16 + $0x28] sm:$0xff]  ;;  %v881_v10 = vld [vmem:[%s8535_s16 + $0x10] sm:$0xff]  ;;  %775 = vst.msk [vmem:[#allocation2 + $0x78] sm:$0x1] %vm769_vm1, %v11443_v15  ;;  %s8461_s25 = smov 32  }
  0x15   : > { %8044 = vmatmul.mubr.msk.f32.vlgmr.msra.gmra.mrb[0].mxu0 %vm332_vm0, %v331_v2  ;;  %8046 = vmatprep.subr.mxu0 %v327_v3  ;;  %v879_v11 = vld [vmem:[%s8535_s16] sm:$0xff]  ;;  %v885_v12 = vld [vmem:[%s8535_s16 + $0x30] sm:$0xff]  ;;  %776 = vst.msk [vmem:[#allocation2 + $0x90] sm:$0x1] %vm769_vm1, %v11443_v15  ;;  %777 = vst.msk [vmem:[#allocation2 + $0xa8] sm:$0x1] %vm769_vm1, %v11443_v15 }
  0x16   : > { %8047 = vmatpush3.msra.mxu0 %v327_v3  ;;  %8048 = vmatprep.mubr.msk.f32.mxu0 %vm332_vm0, %v330_v0  ;;  %v883_v13 = vld [vmem:[%s8535_s16 + $0x20] sm:$0xff]  ;;  %778 = vst.msk [vmem:[#allocation2 + $0x11] sm:$0x1] %vm769_vm1, %v11443_v15  ;;  %779 = vst.msk [vmem:[#allocation2 + $0x29] sm:$0x1] %vm769_vm1, %v11443_v15  ;;  %s8462_s26 = smov 48  }
  0x17   : > { %8051 = vmatprep.subr.mxu0 %v328_v5  ;;  %909 = vrot.lane.b32.xlu1 %v886_v7, %s8454_s19  ;;  %780 = vst.msk [vmem:[#allocation2 + $0x41] sm:$0x1] %vm769_vm1, %v11443_v15  ;;  %781 = vst.msk [vmem:[#allocation2 + $0x59] sm:$0x1] %vm769_vm1, %v11443_v15  ;;  %s8463_s29 = smov 64   ;;  %s8464_s30 = smov 80  }
  0x18   : > { %905 = vrot.lane.b32.xlu0 %v884_v9, %s8454_s19  ;;  %782 = vst.msk [vmem:[#allocation2 + $0x71] sm:$0x1] %vm769_vm1, %v11443_v15  ;;  %784 = vst.msk [vmem:[#allocation2 + $0xa1] sm:$0x1] %vm769_vm1, %v11443_v15  ;;  %s8465_s9 = smov 96   ;;  %s8466_s10 = smov 112  }
  0x19   : > { %8049 = vmatmul.mubr.msk.f32.vlgmr.msra.gmra.mrb[2].mxu0 %vm332_vm0, %v331_v2  ;;  %785 = vst.msk [vmem:[#allocation2 + $0xb9] sm:$0x1] %vm769_vm1, %v11443_v15  ;;  %vm1278_vm10 = vcmask 523264   ;;  %vm1280_vm11 = vcmask 654336   ;;  %vm1282_vm12 = vcmask 785408   ;;  %vm1284_vm13 = vcmask 916480  }
  0x1a   : > { %8052 = vmatpush3.msra.mxu0 %v328_v5  ;;  %8053 = vmatprep.mubr.msk.f32.mxu0 %vm332_vm0, %v330_v0  ;;  %792 = vst.msk [vmem:[#allocation2 + $0x20] sm:$0xff] %vm786_vm2, %v11443_v15  ;;  %795 = vst.msk [vmem:[#allocation2 + $0x38] sm:$0xff] %vm786_vm2, %v11443_v15 }
  0x1b   : > { %8056 = vmatprep.subr.mxu0 %v329_v8  ;;  %899 = vrot.lane.b32.xlu1 %v881_v10, %s8454_s19  ;;  %798 = vst.msk [vmem:[#allocation2 + $0x50] sm:$0xff] %vm786_vm2, %v11443_v15  ;;  %801 = vst.msk [vmem:[#allocation2 + $0x68] sm:$0xff] %vm786_vm2, %v11443_v15 }
  0x1c   : > { %895 = vrot.lane.b32.xlu0 %v879_v11, %s8454_s19  ;;  %807 = vst.msk [vmem:[#allocation2 + $0x98] sm:$0xff] %vm786_vm2, %v11443_v15  ;;  %810 = vst.msk [vmem:[#allocation2 + $0xb0] sm:$0xff] %vm786_vm2, %v11443_v15 }
  0x1d   : > { %8054 = vmatmul.mubr.msk.f32.vlgmr.msra.gmra.mrb[4].mxu0 %vm332_vm0, %v331_v2  ;;  %805 = vst.msk [vmem:[#allocation2 + $0x88] sm:$0x3] %vm789_vm3, %v11443_v15  ;;  %802 = vst.msk [vmem:[#allocation2 + $0x70] sm:$0x3] %vm789_vm3, %v11443_v15 }
  0x1e   : > { %8057 = vmatpush3.msra.mxu0 %v329_v8  ;;  %8058 = vmatprep.mubr.msk.f32.mxu0 %vm332_vm0, %v330_v0  ;;  %830 = vst.msk [vmem:[#allocation2 + $0x80] sm:$0xff] %vm812_vm4, %v11443_v15  ;;  %827 = vst.msk [vmem:[#allocation2 + $0x68] sm:$0xff] %vm812_vm4, %v11443_v15 }
  0x1f   : > { %907 = vrot.lane.b32.xlu1 %v885_v12, %s8454_s19  ;;  %8061 = vmatprep.subr.mxu0 %v639_v14  ;;  %787 = vst.msk [vmem:[#allocation2] sm:$0xff] %vm786_vm2, %v11443_v15  ;;  %791 = vst.msk [vmem:[#allocation2 + $0x18] sm:$0xff] %vm786_vm2, %v11443_v15 }
  0x20   : > { %903 = vrot.lane.b32.xlu0 %v883_v13, %s8454_s19  ;;  %790 = vst.msk [vmem:[#allocation2 + $0x10] sm:$0x3] %vm789_vm3, %v11443_v15  ;;  %793 = vst.msk [vmem:[#allocation2 + $0x28] sm:$0x3] %vm789_vm3, %v11443_v15 }
  0x21   : > { %8059 = vmatmul.mubr.msk.f32.vlgmr.msra.gmra.mrb[6].mxu0 %vm332_vm0, %v331_v2  ;;  %794 = vst.msk [vmem:[#allocation2 + $0x30] sm:$0xff] %vm786_vm2, %v11443_v15  ;;  %797 = vst.msk [vmem:[#allocation2 + $0x48] sm:$0xff] %vm786_vm2, %v11443_v15 }
  0x22   : > { %8062 = vmatpush3.msra.mxu0 %v639_v14  ;;  %796 = vst.msk [vmem:[#allocation2 + $0x40] sm:$0x3] %vm789_vm3, %v11443_v15  ;;  %799 = vst.msk [vmem:[#allocation2 + $0x58] sm:$0x3] %vm789_vm3, %v11443_v15 }
  0x23   : > { %800 = vst.msk [vmem:[#allocation2 + $0x60] sm:$0xff] %vm786_vm2, %v11443_v15  ;;  %803 = vst.msk [vmem:[#allocation2 + $0x78] sm:$0xff] %vm786_vm2, %v11443_v15 }
  0x24   : > { %806 = vst.msk [vmem:[#allocation2 + $0x90] sm:$0xff] %vm786_vm2, %v11443_v15  ;;  %809 = vst.msk [vmem:[#allocation2 + $0xa8] sm:$0xff] %vm786_vm2, %v11443_v15 }
  0x25   : > { %808 = vst.msk [vmem:[#allocation2 + $0xa0] sm:$0x3] %vm789_vm3, %v11443_v15  ;;  %811 = vst.msk [vmem:[#allocation2 + $0xb8] sm:$0x3] %vm789_vm3, %v11443_v15 }
  0x26   : > { %814 = vst.msk [vmem:[#allocation2 + $0x8] sm:$0xff] %vm812_vm4, %v11443_v15  ;;  %818 = vst.msk [vmem:[#allocation2 + $0x20] sm:$0xff] %vm812_vm4, %v11443_v15 }
  0x27   : > { %821 = vst.msk [vmem:[#allocation2 + $0x38] sm:$0xff] %vm812_vm4, %v11443_v15  ;;  %824 = vst.msk [vmem:[#allocation2 + $0x50] sm:$0xff] %vm812_vm4, %v11443_v15 }
  0x28   : > { %833 = vst.msk [vmem:[#allocation2 + $0x98] sm:$0xff] %vm812_vm4, %v11443_v15  ;;  %836 = vst.msk [vmem:[#allocation2 + $0xb0] sm:$0xff] %vm812_vm4, %v11443_v15 }
  0x29   : > { %831 = vst.msk [vmem:[#allocation2 + $0x88] sm:$0x3] %vm815_vm5, %v11443_v15  ;;  %828 = vst.msk [vmem:[#allocation2 + $0x70] sm:$0x3] %vm815_vm5, %v11443_v15 }
  0x2a   : > { %837 = vst.msk [vmem:[#allocation2 + $0xb8] sm:$0x3] %vm815_vm5, %v11443_v15  ;;  %816 = vst.msk [vmem:[#allocation2 + $0x10] sm:$0x3] %vm815_vm5, %v11443_v15 }
  0x2b   : > { %813 = vst.msk [vmem:[#allocation2] sm:$0xff] %vm812_vm4, %v11443_v15  ;;  %817 = vst.msk [vmem:[#allocation2 + $0x18] sm:$0xff] %vm812_vm4, %v11443_v15 }
  0x2c   : > { %819 = vst.msk [vmem:[#allocation2 + $0x28] sm:$0x3] %vm815_vm5, %v11443_v15  ;;  %822 = vst.msk [vmem:[#allocation2 + $0x40] sm:$0x3] %vm815_vm5, %v11443_v15 }
  0x2d   : > { %820 = vst.msk [vmem:[#allocation2 + $0x30] sm:$0xff] %vm812_vm4, %v11443_v15  ;;  %823 = vst.msk [vmem:[#allocation2 + $0x48] sm:$0xff] %vm812_vm4, %v11443_v15 }
  0x2e   : > { %825 = vst.msk [vmem:[#allocation2 + $0x58] sm:$0x3] %vm815_vm5, %v11443_v15  ;;  %834 = vst.msk [vmem:[#allocation2 + $0xa0] sm:$0x3] %vm815_vm5, %v11443_v15 }
  0x2f   : > { %826 = vst.msk [vmem:[#allocation2 + $0x60] sm:$0xff] %vm812_vm4, %v11443_v15  ;;  %829 = vst.msk [vmem:[#allocation2 + $0x78] sm:$0xff] %vm812_vm4, %v11443_v15 }
  0x30   : > { %832 = vst.msk [vmem:[#allocation2 + $0x90] sm:$0xff] %vm812_vm4, %v11443_v15  ;;  %835 = vst.msk [vmem:[#allocation2 + $0xa8] sm:$0xff] %vm812_vm4, %v11443_v15 }
  0x85   : > { %v902_v16 = vpop.permute.xlu1 %901 }
  0x86   : > { %923 = vst.msk [vmem:[#allocation2 + $0x81] sm:$0xff] %vm870_vm6, %v902_v16  ;;  %v898_v17 = vpop.permute.xlu0 %897 }
  0x87   : > { %921 = vst.msk [vmem:[#allocation2 + $0x69] sm:$0xff] %vm870_vm6, %v898_v17 }
  0x89   : > { %v910_v18 = vpop.permute.xlu1 %909 }
  0x8a   : > { %927 = vst.msk [vmem:[#allocation2 + $0xb1] sm:$0xff] %vm870_vm6, %v910_v18  ;;  %v906_v19 = vpop.permute.xlu0 %905 }
  0x8b   : > { %925 = vst.msk [vmem:[#allocation2 + $0x99] sm:$0xff] %vm870_vm6, %v906_v19 }
  0x8d   : > { %v900_v20 = vpop.permute.xlu1 %899  ;;  %v3729_v21 = vld [vmem:[#allocation2 + $0x81] sm:$0xff] }
  0x8e   : > { %922 = vst.msk [vmem:[#allocation2 + $0x79] sm:$0xff] %vm870_vm6, %v900_v20  ;;  %3772 = vrot.lane.b32.xlu1 %v3729_v21, %s8456_s22  ;;  %v896_v22 = vpop.permute.xlu0 %895  ;;  %v3727_v23 = vld [vmem:[#allocation2 + $0x69] sm:$0xff] }
  0x8f   : > { %920 = vst.msk [vmem:[#allocation2 + $0x61] sm:$0xff] %vm870_vm6, %v896_v22  ;;  %3768 = vrot.lane.b32.xlu0 %v3727_v23, %s8456_s22 }
  0x91   : > { %v908_v24 = vpop.permute.xlu1 %907  ;;  %v3733_v25 = vld [vmem:[#allocation2 + $0xb1] sm:$0xff] }
  0x92   : > { %926 = vst.msk [vmem:[#allocation2 + $0xa9] sm:$0xff] %vm870_vm6, %v908_v24  ;;  %3780 = vrot.lane.b32.xlu1 %v3733_v25, %s8456_s22  ;;  %v904_v26 = vpop.permute.xlu0 %903  ;;  %v3731_v27 = vld [vmem:[#allocation2 + $0x99] sm:$0xff] }
  0x93   : > { %924 = vst.msk [vmem:[#allocation2 + $0x91] sm:$0xff] %vm870_vm6, %v904_v26  ;;  %3776 = vrot.lane.b32.xlu0 %v3731_v27, %s8456_s22 }
  0x95   : > { %v3728_v28 = vld [vmem:[#allocation2 + $0x79] sm:$0xff] }
  0x96   : > { %3770 = vrot.lane.b32.xlu1 %v3728_v28, %s8456_s22  ;;  %v3726_v29 = vld [vmem:[#allocation2 + $0x61] sm:$0xff]  ;;  %v8733_v36 = vld [vmem:[#allocation2 + $0x78] sm:$0xff] }
  0x97   : > { %3766 = vrot.lane.b32.xlu0 %v3726_v29, %s8456_s22  ;;  %v8718_v32 = vld [vmem:[#allocation2 + $0x80] sm:$0xff]  ;;  %v8723_v33 = vld [vmem:[#allocation2 + $0x68] sm:$0xff] }
  0x98   : > { %v8739_v37 = vld [vmem:[#allocation2 + $0x60] sm:$0xff] }
  0x99   : > { %v3732_v30 = vld [vmem:[#allocation2 + $0xa9] sm:$0xff] }
  0x9a   : > { %3778 = vrot.lane.b32.xlu1 %v3732_v30, %s8456_s22  ;;  %v3730_v31 = vld [vmem:[#allocation2 + $0x91] sm:$0xff]  ;;  %v8741_v38 = vld [vmem:[#allocation2 + $0xa8] sm:$0xff] }
  0x9b   : > { %3774 = vrot.lane.b32.xlu0 %v3730_v31, %s8456_s22  ;;  %v8725_v34 = vld [vmem:[#allocation2 + $0xb0] sm:$0xff]  ;;  %v8731_v35 = vld [vmem:[#allocation2 + $0x98] sm:$0xff] }
  0x9c   : > { %v8747_v39 = vld [vmem:[#allocation2 + $0x90] sm:$0xff] }
  0x9e   : > { %4516 = vrot.lane.b32.xlu1 %v3729_v21, %s8457_s23 }
  0x9f   : > { %4512 = vrot.lane.b32.xlu0 %v3727_v23, %s8457_s23 }
  0xa2   : > { %4524 = vrot.lane.b32.xlu1 %v3733_v25, %s8457_s23 }
  0xa3   : > { %4520 = vrot.lane.b32.xlu0 %v3731_v27, %s8457_s23 }
  0xa6   : > { %4514 = vrot.lane.b32.xlu1 %v3728_v28, %s8457_s23  ;;  %v8458_v28 = vmov 1983009808  }
  0xa7   : > { %4510 = vrot.lane.b32.xlu0 %v3726_v29, %s8457_s23  ;;  %v947_v29 = vunpack.c.l.s4 %v8458_v28 }
  0xaa   : > { %4522 = vrot.lane.b32.xlu1 %v3732_v30, %s8457_s23  ;;  %v949_v30 = vlaneseq }
  0xab   : > { %4518 = vrot.lane.b32.xlu0 %v3730_v31, %s8457_s23 }
  0xae   : > { %1604 = vrot.lane.b32.xlu1 %v8718_v32, %s8456_s22 }
  0xaf   : > { %1600 = vrot.lane.b32.xlu0 %v8723_v33, %s8456_s22 }
  0xb2   : > { %1612 = vrot.lane.b32.xlu1 %v8725_v34, %s8456_s22 }
  0xb3   : > { %1608 = vrot.lane.b32.xlu0 %v8731_v35, %s8456_s22 }
  0xb6   : > { %1602 = vrot.lane.b32.xlu1 %v8733_v36, %s8456_s22 }
  0xb7   : > { %1598 = vrot.lane.b32.xlu0 %v8739_v37, %s8456_s22 }
  0xba   : > { %1610 = vrot.lane.b32.xlu1 %v8741_v38, %s8456_s22 }
  0xbb   : > { %1606 = vrot.lane.b32.xlu0 %v8747_v39, %s8456_s22 }
  0xbe   : > { %2348 = vrot.lane.b32.xlu1 %v8718_v32, %s8457_s23 }
  0xbf   : > { %2344 = vrot.lane.b32.xlu0 %v8723_v33, %s8457_s23 }
  0xc2   : > { %2356 = vrot.lane.b32.xlu1 %v8725_v34, %s8457_s23 }
  0xc3   : > { %2352 = vrot.lane.b32.xlu0 %v8731_v35, %s8457_s23 }
  0xe8   : > { %v8045_v40 = vpop.f32.mrb[0].mxu0 }
  0xe9   : > { %v405_v41 = vpop.f32.mrb[1].mxu0 }
  0xea   : > { %8063 = vmatprep.mubr.msk.f32.mxu0 %vm332_vm0, %v405_v41 }
  0xeb   : > { %8064 = vmatmul.mubr.msk.f32.vlgmr.msra.gmra.mrb[8].mxu0 %vm332_vm0, %v8045_v40 }
  0xec   : > { %v8050_v42 = vpop.f32.mrb[2].mxu0 }
  0xed   : > { %v480_v43 = vpop.f32.mrb[3].mxu0 }
  0xee   : > { %8066 = vmatprep.mubr.msk.f32.mxu0 %vm332_vm0, %v480_v43  ;;  %v8843_v43 = vshrl.u32 %v949_v30, 7 }
  0xef   : > { %8067 = vmatmul.mubr.msk.f32.gmra.mrb[10].mxu0 %vm332_vm0, %v8050_v42  ;;  %v948_v42 = vunpack.c.0.s8 %v947_v29 }
  0xf0   : > { %v8055_v44 = vpop.f32.mrb[4].mxu0 }
  0xf1   : > { %v555_v45 = vpop.f32.mrb[5].mxu0 }
  0xf2   : > { %8069 = vmatprep.mubr.msk.f32.mxu0 %vm332_vm0, %v555_v45 }
  0xf3   : > { %8070 = vmatmul.mubr.msk.f32.gmra.mrb[12].mxu0 %vm332_vm0, %v8055_v44 }
  0xf4   : > { %v8060_v46 = vpop.f32.mrb[6].mxu0 }
  0xf5   : > { %v630_v47 = vpop.f32.mrb[7].mxu0 }
  0xf6   : > { %8072 = vmatprep.mubr.msk.f32.mxu0 %vm332_vm0, %v630_v47 }
  0xf7   : > { %8073 = vmatmul.mubr.msk.f32.gmra.mrb[14].mxu0 %vm332_vm0, %v8060_v46 }
  0xf8   : > { %1421 = vmatprep.mubr.f32.mxu0 %v11443_v15 }
 0x100   : > { %v8778_v57 = vpop.permute.xlu1 %3772 }
 0x101   : > { %v8776_v56 = vpop.permute.xlu0 %3768 }
 0x104   : > { %v8782_v59 = vpop.permute.xlu1 %3780 }
 0x105   : > { %v8780_v58 = vpop.permute.xlu0 %3776 }
 0x108   : > { %v8786_v61 = vpop.permute.xlu1 %3770 }
 0x109   : > { %v8784_v60 = vpop.permute.xlu0 %3766 }
 0x10c   : > { %v8790_v63 = vpop.permute.xlu1 %3778 }
 0x10d   : > { %v8788_v62 = vpop.permute.xlu0 %3774 }
 0x110   : > { %v8794_v1 = vpop.permute.xlu1 %4516 }
 0x111   : > { %v8792_v0 = vpop.permute.xlu0 %4512 }
 0x114   : > { %v8798_v3 = vpop.permute.xlu1 %4524 }
 0x115   : > { %v8796_v2 = vpop.permute.xlu0 %4520 }
 0x118   : > { %v8802_v5 = vpop.permute.xlu1 %4514 }
 0x119   : > { %v8800_v4 = vpop.permute.xlu0 %4510  ;;  %11544 = vst [vmem:[#allocation5_spill] sm:$0xff] %v8802_v5 }
 0x11a   : > { %11543 = vst [vmem:[#allocation4_spill] sm:$0xff] %v8800_v4 }
 0x11c   : > { %v8806_v7 = vpop.permute.xlu1 %4522 }
 0x11d   : > { %v8804_v6 = vpop.permute.xlu0 %4518  ;;  %11546 = vst [vmem:[#allocation7_spill] sm:$0xff] %v8806_v7  ;;  %v8423_v7 = vld [vmem:[#allocation2 + $0x79] ss:$48 sps:$4 sm:$0xff]  }
 0x11e   : > { %11545 = vst [vmem:[#allocation6_spill] sm:$0xff] %v8804_v6 }
 0x120   : > { %v8810_v9 = vpop.permute.xlu1 %1604 }
 0x121   : > { %v8808_v8 = vpop.permute.xlu0 %1600  ;;  %11548 = vst [vmem:[#allocation9_spill] sm:$0xff] %v8810_v9 }
 0x122   : > { %11547 = vst [vmem:[#allocation8_spill] sm:$0xff] %v8808_v8  ;;  %v8937_v8 = vld [vmem:[#allocation2 + $0xb2] sm:$0xff] }
 0x123   : > { %11574 = vst [vmem:[#allocation35_spill] sm:$0xff] %v8937_v8 }
 0x124   : > { %v8814_v11 = vpop.permute.xlu1 %1612 }
 0x125   : > { %v8812_v10 = vpop.permute.xlu0 %1608  ;;  %11550 = vst [vmem:[#allocation11_spill] sm:$0xff] %v8814_v11 }
 0x126   : > { %11549 = vst [vmem:[#allocation10_spill] sm:$0xff] %v8812_v10 }
 0x128   : > { %v8818_v13 = vpop.permute.xlu1 %1602 }
 0x129   : > { %v8816_v12 = vpop.permute.xlu0 %1598  ;;  %11552 = vst [vmem:[#allocation13_spill] sm:$0xff] %v8818_v13  ;;  %v8924_v13 = vld [vmem:[#allocation2 + $0x7a] sm:$0xff] }
 0x12a   : > { %11551 = vst [vmem:[#allocation12_spill] sm:$0xff] %v8816_v12  ;;  %11570 = vst [vmem:[#allocation31_spill] sm:$0xff] %v8924_v13 }
 0x12c   : > { %v8822_v16 = vpop.permute.xlu1 %1610 }
 0x12d   : > { %v8820_v14 = vpop.permute.xlu0 %1606  ;;  %11554 = vst [vmem:[#allocation15_spill] sm:$0xff] %v8822_v16 }
 0x12e   : > { %11553 = vst [vmem:[#allocation14_spill] sm:$0xff] %v8820_v14 }
 0x130   : > { %v8826_v18 = vpop.permute.xlu1 %2348 }
 0x131   : > { %v8824_v17 = vpop.permute.xlu0 %2344  ;;  %11556 = vst [vmem:[#allocation17_spill] sm:$0xff] %v8826_v18 }
 0x132   : > { %11555 = vst [vmem:[#allocation16_spill] sm:$0xff] %v8824_v17 }
 0x134   : > { %v8830_v21 = vpop.permute.xlu1 %2356 }
 0x135   : > { %v8828_v19 = vpop.permute.xlu0 %2352  ;;  %11558 = vst [vmem:[#allocation19_spill] sm:$0xff] %v8830_v21 }
 0x136   : > { %11557 = vst [vmem:[#allocation18_spill] sm:$0xff] %v8828_v19 }
 0x1be   : > { %v8065_v48 = vpop.f32.mrb[8].mxu0 }
 0x1bf   : > { %848 = vrot.lane.b32.xlu0 %v8065_v48, %s8454_s19  ;;  %v730_v49 = vpop.f32.mrb[9].mxu0 }
 0x1c2   : > { %v8068_v50 = vpop.f32.mrb[10].mxu0 }
 0x1c3   : > { %846 = vrot.lane.b32.xlu0 %v730_v49, %s8454_s19  ;;  %v740_v51 = vpop.f32.mrb[11].mxu0 }
 0x1c4   : > { %850 = vrot.lane.b32.xlu1 %v740_v51, %s8454_s19 }
 0x1c6   : > { %v8071_v52 = vpop.f32.mrb[12].mxu0 }
 0x1c7   : > { %852 = vrot.lane.b32.xlu0 %v8068_v50, %s8454_s19  ;;  %v750_v53 = vpop.f32.mrb[13].mxu0  ;;  %v8858_v50 = vsub.s32 %v948_v42, %v8843_v43  ;;  %v8892_v42 = vld [vmem:[#allocation2 + $0x62] sm:$0xff] }
 0x1c8   : > { %856 = vrot.lane.b32.xlu1 %v8071_v52, %s8454_s19  ;;  %11565 = vst [vmem:[#allocation26_spill] sm:$0xff] %v8892_v42 }
 0x1ca   : > { %v8074_v54 = vpop.f32.mrb[14].mxu0 }
 0x1cb   : > { %854 = vrot.lane.b32.xlu0 %v750_v53, %s8454_s19  ;;  %v760_v55 = vpop.f32.mrb[15].mxu0  ;;  %v8459_v53 = vmov 1934713408  }
 0x1cc   : > { %860 = vrot.lane.b32.xlu1 %v8074_v54, %s8454_s19  ;;  %v1011_v54 = vunpack.c.l.s4 %v8459_v53 }
 0x1ce   : > { %v1012_v19 = vunpack.c.0.s8 %v1011_v54  ;;  %v8926_v54 = vld [vmem:[#allocation2 + $0xaa] sm:$0xff] }
 0x1cf   : > { %11571 = vst [vmem:[#allocation32_spill] sm:$0xff] %v8926_v54 }
 0x1d0   : > { %858 = vrot.lane.b32.xlu1 %v760_v55, %s8454_s19  ;;  %v1112_v55 = vcombine.low %v8723_v33, %v8731_v35  ;;  %v8975_v6 = vsub.s32 %v1012_v19, %v8843_v43 }
 0x1d2   : > { %v8909_v18 = vrot.slane %v1112_v55, %v8858_v50 }
 0x231   : > { %v849_v20 = vpop.permute.xlu0 %848 }
 0x232   : > { %872 = vst.msk [vmem:[#allocation2 + $0x9] sm:$0xff] %vm870_vm6, %v849_v20 }
 0x235   : > { %v847_v22 = vpop.permute.xlu0 %846 }
 0x236   : > { %871 = vst.msk [vmem:[#allocation2 + $0x1] sm:$0xff] %vm870_vm6, %v847_v22  ;;  %v851_v23 = vpop.permute.xlu1 %850  ;;  %v1128_v22 = vcombine.low %v8718_v32, %v8725_v34 }
 0x237   : > { %873 = vst.msk [vmem:[#allocation2 + $0x19] sm:$0xff] %vm870_vm6, %v851_v23  ;;  %v976_v23 = vcombine.low %v8739_v37, %v8747_v39 }
 0x239   : > { %v853_v24 = vpop.permute.xlu0 %852  ;;  %v3719_v25 = vld [vmem:[#allocation2 + $0x9] sm:$0xff]  ;;  %v8922_v14 = vrot.slane %v976_v23, %v8858_v50 }
 0x23a   : > { %874 = vst.msk [vmem:[#allocation2 + $0x21] sm:$0xff] %vm870_vm6, %v853_v24  ;;  %v857_v26 = vpop.permute.xlu1 %856  ;;  %3752 = vrot.lane.b32.xlu0 %v3719_v25, %s8456_s22  ;;  %v8841_v40 = vld [vmem:[#allocation2 + $0xa] sm:$0xff] }
 0x23b   : > { %876 = vst.msk [vmem:[#allocation2 + $0x39] sm:$0xff] %vm870_vm6, %v857_v26 }
 0x23d   : > { %v855_v27 = vpop.permute.xlu0 %854  ;;  %v3718_v48 = vld [vmem:[#allocation2 + $0x1] sm:$0xff] }
 0x23e   : > { %875 = vst.msk [vmem:[#allocation2 + $0x31] sm:$0xff] %vm870_vm6, %v855_v27  ;;  %4496 = vrot.lane.b32.xlu0 %v3719_v25, %s8457_s23  ;;  %v861_v31 = vpop.permute.xlu1 %860  ;;  %v8876_v25 = vld [vmem:[#allocation2 + $0x8] sm:$0xff]  ;;  %v8878_v26 = vld [vmem:[#allocation2] sm:$0xff]  ;;  %v992_v27 = vcombine.low %v8733_v36, %v8741_v38  ;;  %v8882_v28 = vld [vmem:[#allocation2 + $0x18] sm:$0xff] }
 0x23f   : > { %878 = vst.msk [vmem:[#allocation2 + $0x51] sm:$0xff] %vm870_vm6, %v861_v31  ;;  %11561 = vst [vmem:[#allocation22_spill] sm:$0xff] %v8878_v26  ;;  %v8888_v31 = vld [vmem:[#allocation2 + $0x6a] sm:$0xff]  ;;  %v3720_v9 = vld [vmem:[#allocation2 + $0x19] sm:$0xff] }
 0x240   : > { %11562 = vst [vmem:[#allocation23_spill] sm:$0xff] %v8882_v28  ;;  %11563 = vst [vmem:[#allocation24_spill] sm:$0xff] %v8888_v31  ;;  %v8929_v55 = vrot.slane %v992_v27, %v8858_v50 }
 0x241   : > { %v3721_v41 = vld [vmem:[#allocation2 + $0x21] sm:$0xff] }
 0x242   : > { %5920 = vrot.lane.b32.xlu0 %v8841_v40, %s8456_s22  ;;  %3756 = vrot.lane.b32.xlu1 %v3721_v41, %s8456_s22  ;;  %v859_v44 = vpop.permute.xlu1 %858  ;;  %v8848_v45 = vld [vmem:[#allocation2 + $0x3a] sm:$0xff]  ;;  %v8855_v49 = vld [vmem:[#allocation2 + $0x22] sm:$0xff] }
 0x243   : > { %877 = vst.msk [vmem:[#allocation2 + $0x49] sm:$0xff] %vm870_vm6, %v859_v44  ;;  %v5358_v46 = vcombine.low %v8841_v40, %v8848_v45  ;;  %v8894_v44 = vld [vmem:[#allocation2 + $0x92] sm:$0xff]  ;;  %v8902_v15 = vld [vmem:[#allocation2 + $0x20] sm:$0xff] }
 0x244   : > { %11566 = vst [vmem:[#allocation27_spill] sm:$0xff] %v8894_v44  ;;  %v8960_v10 = vld [vmem:[#allocation2 + $0x1a] sm:$0xff] }
 0x245   : > { %v8862_v51 = vld [vmem:[#allocation2 + $0x38] sm:$0xff]  ;;  %v8864_v52 = vld [vmem:[#allocation2 + $0x30] sm:$0xff]  ;;  %v8912_v21 = vrot.slane %v5358_v46, %v8858_v50  ;;  %v8931_v46 = vld [vmem:[#allocation2 + $0x82] sm:$0xff]  ;;  %11576 = vst [vmem:[#allocation37_spill] sm:$0xff] %v8960_v10 }
 0x246   : > { %3750 = vrot.lane.b32.xlu0 %v3718_v48, %s8456_s22  ;;  %4500 = vrot.lane.b32.xlu1 %v3721_v41, %s8457_s23  ;;  %11559 = vst [vmem:[#allocation20_spill] sm:$0xff] %v8864_v52  ;;  %v8868_v20 = vld [vmem:[#allocation2 + $0x52] sm:$0xff]  ;;  %v1080_v29 = vcombine.low %v8876_v25, %v8862_v51  ;;  %v944_v30 = vcombine.low %v8878_v26, %v8864_v52  ;;  %v8890_v41 = vld [vmem:[#allocation2 + $0x9a] sm:$0xff]  ;;  %11572 = vst [vmem:[#allocation33_spill] sm:$0xff] %v8931_v46 }
 0x247   : > { %11560 = vst [vmem:[#allocation21_spill] sm:$0xff] %v8868_v20  ;;  %v5374_v24 = vcombine.low %v8855_v49, %v8868_v20  ;;  %11564 = vst [vmem:[#allocation25_spill] sm:$0xff] %v8890_v41 }
 0x248   : > { %11569 = vst [vmem:[#allocation30_spill] sm:$0xff] %v8912_v21  ;;  %v8944_v11 = vrot.slane %v1080_v29, %v8858_v50  ;;  %v8950_v4 = vrot.slane %v944_v30, %v8858_v50  ;;  %v5270_v29 = vcombine.low %v8924_v13, %v8926_v54  ;;  %v1040_v54 = vcombine.low %v8922_v14, %v8929_v55 }
 0x249   : > { %v8897_v53 = vrot.slane %v5374_v24, %v8858_v50 }
 0x24a   : > { %4494 = vrot.lane.b32.xlu0 %v3718_v48, %s8457_s23  ;;  %5924 = vrot.lane.b32.xlu1 %v8855_v49, %s8456_s22  ;;  %v8904_v47 = vld [vmem:[#allocation2 + $0x50] sm:$0xff]  ;;  %v8906_v17 = vld [vmem:[#allocation2 + $0x48] sm:$0xff]  ;;  %v8917_v48 = vrot.slane %v1128_v22, %v8858_v50  ;;  %v5254_v22 = vcombine.low %v8892_v42, %v8894_v44 }
 0x24b   : > { %11567 = vst [vmem:[#allocation28_spill] sm:$0xff] %v8897_v53  ;;  %11568 = vst [vmem:[#allocation29_spill] sm:$0xff] %v8906_v17  ;;  %v1096_v24 = vcombine.low %v8902_v15, %v8904_v47  ;;  %v960_v12 = vcombine.low %v8882_v28, %v8906_v17  ;;  %v8933_v16 = vld [vmem:[#allocation2 + $0x4a] sm:$0xff]  ;;  %v5422_v23 = vcombine.low %v8912_v21, %v8897_v53  ;;  %v8958_v42 = vld [vmem:[#allocation2 + $0x32] sm:$0xff] }
 0x24c   : > { %11573 = vst [vmem:[#allocation34_spill] sm:$0xff] %v8933_v16  ;;  %11575 = vst [vmem:[#allocation36_spill] sm:$0xff] %v8958_v42  ;;  %v5238_v53 = vcombine.low %v8960_v10, %v8933_v16  ;;  %v5406_v21 = vcombine.low %v8931_v46, %v8937_v8  ;;  %v1176_v13 = vcombine.low %v8909_v18, %v8917_v48  ;;  %v3723_v46 = vld [vmem:[#allocation2 + $0x39] sm:$0xff] }
 0x24d   : > { %v8947_v27 = vrot.slane %v1096_v24, %v8858_v50  ;;  %v8953_v44 = vrot.slane %v960_v12, %v8858_v50  ;;  %v5390_v24 = vcombine.low %v8888_v31, %v8890_v41  ;;  %v8981_v41 = vld [vmem:[#allocation2 + $0x2] sm:$0xff]  ;;  %v8986_v5 = vrot.slane %v5254_v22, %v8858_v50 }
 0x24e   : > { %1584 = vrot.lane.b32.xlu0 %v8876_v25, %s8456_s22  ;;  %3754 = vrot.lane.b32.xlu1 %v3720_v9, %s8456_s22  ;;  %11577 = vst [vmem:[#allocation38_spill] sm:$0xff] %v8981_v41  ;;  %v5222_v31 = vcombine.low %v8981_v41, %v8958_v42  ;;  %v5375_v10 = vcombine.high %v8855_v49, %v8868_v20 }
 0x24f   : > { %v1144_v30 = vcombine.low %v8944_v11, %v8947_v27  ;;  %v1008_v12 = vcombine.low %v8950_v4, %v8953_v44  ;;  %11578 = vst [vmem:[#allocation39_spill] sm:$0xff] %v8986_v5  ;;  %v9000_v16 = vrot.slane %v5270_v29, %v8858_v50  ;;  %v9003_v22 = vrot.slane %v5238_v53, %v8858_v50  ;;  %v8411_v53 = vld [vmem:[#allocation2 + $0x21] ss:$48 sps:$4 sm:$0xff]  }
 0x250   : > { %v9006_v8 = vrot.slane %v5390_v24, %v8858_v50  ;;  %v9009_v49 = vrot.slane %v5406_v21, %v8858_v50  ;;  %v9021_v29 = vrot.slane %v5375_v10, %v8858_v50  ;;  %v8415_v24 = vld [vmem:[#allocation2 + $0x81] ss:$48 sps:$4 sm:$0xff]   ;;  %v8409_v21 = vld [vmem:[#allocation2 + $0x9] ss:$48 sps:$4 sm:$0xff]  }
 0x251   : > { %v8994_v19 = vrot.slane %v1144_v30, %v8975_v6  ;;  %v8997_v43 = vrot.slane %v1008_v12, %v8975_v6  ;;  %11579 = vst [vmem:[#allocation40_spill] sm:$0xff] %v9000_v16  ;;  %11580 = vst [vmem:[#allocation41_spill] sm:$0xff] %v9003_v22  ;;  %v9015_v30 = vrot.slane %v1040_v54, %v8975_v6  ;;  %v8413_v54 = vld [vmem:[#allocation2 + $0x69] ss:$48 sps:$4 sm:$0xff]   ;;  %v8421_v10 = vld [vmem:[#allocation2 + $0x61] ss:$48 sps:$4 sm:$0xff]  }
 0x252   : > { %1582 = vrot.lane.b32.xlu0 %v8878_v26, %s8456_s22  ;;  %4498 = vrot.lane.b32.xlu1 %v3720_v9, %s8457_s23  ;;  %11581 = vst [vmem:[#allocation42_spill] sm:$0xff] %v9006_v8  ;;  %11582 = vst [vmem:[#allocation43_spill] sm:$0xff] %v9009_v49  ;;  %v9012_v9 = vrot.slane %v1176_v13, %v8975_v6  ;;  %v9018_v12 = vrot.slane %v5222_v31, %v8858_v50 }
 0x253   : > { %11584 = vst [vmem:[#allocation45_spill] sm:$0xff] %v9021_v29  ;;  %v5318_v31 = vcombine.low %v8986_v5, %v9000_v16  ;;  %v5454_v42 = vcombine.low %v9006_v8, %v9009_v49  ;;  %v11585_v13 = vcombine.high %v8841_v40, %v8848_v45  ;;  %v9047_v16 = vrot.slane %v5422_v23, %v8975_v6  ;;  %v8419_v8 = vld [vmem:[#allocation2 + $0x19] ss:$48 sps:$4 sm:$0xff]  }
 0x254   : > { %11583 = vst [vmem:[#allocation44_spill] sm:$0xff] %v9018_v12  ;;  %v5286_v20 = vcombine.low %v9018_v12, %v9003_v22  ;;  %v9052_v22 = vrot.slane %v8411_v53, %v8858_v50  ;;  %v9064_v23 = vrot.slane %v8415_v24, %v8858_v50  ;;  %v9070_v53 = vrot.slane %v8409_v21, %v8858_v50  ;;  %v8417_v12 = vld [vmem:[#allocation2 + $0x1] ss:$48 sps:$4 sm:$0xff]  }
 0x255   : > { %v9041_v41 = vrot.slane %v11585_v13, %v8858_v50  ;;  %11588 = vst [vmem:[#allocation48_spill] sm:$0xff] %v9047_v16  ;;  %v9058_v40 = vrot.slane %v5318_v31, %v8975_v6  ;;  %v9067_v13 = vrot.slane %v5454_v42, %v8975_v6  ;;  %v9073_v49 = vrot.slane %v8421_v10, %v8858_v50 }
 0x256   : > { %2328 = vrot.lane.b32.xlu0 %v8876_v25, %s8457_s23  ;;  %1588 = vrot.lane.b32.xlu1 %v8902_v15, %s8456_s22  ;;  %v9044_v5 = vrot.slane %v5286_v20, %v8975_v6  ;;  %11589 = vst [vmem:[#allocation49_spill] sm:$0xff] %v9052_v22  ;;  %v9061_v20 = vrot.slane %v8413_v54, %v8858_v50  ;;  %11592 = vst [vmem:[#allocation52_spill] sm:$0xff] %v9064_v23 }
 0x257   : > { %11586 = vst [vmem:[#allocation46_spill] sm:$0xff] %v9041_v41  ;;  %11590 = vst [vmem:[#allocation50_spill] sm:$0xff] %v9058_v40  ;;  %v9076_v31 = vrot.slane %v8423_v7, %v8858_v50  ;;  %v3254_v21 = vcombine.low %v9070_v53, %v9052_v22  ;;  %v9092_v10 = vrot.slane %v8417_v12, %v8858_v50 }
 0x258   : > { %11587 = vst [vmem:[#allocation47_spill] sm:$0xff] %v9044_v5  ;;  %11591 = vst [vmem:[#allocation51_spill] sm:$0xff] %v9061_v20  ;;  %v3286_v7 = vcombine.low %v9061_v20, %v9064_v23  ;;  %v9095_v54 = vrot.slane %v8419_v8, %v8858_v50  ;;  %v3722_v23 = vld [vmem:[#allocation2 + $0x31] sm:$0xff] }
 0x259   : > { %11593 = vst [vmem:[#allocation53_spill] sm:$0xff] %v9067_v13  ;;  %11594 = vst [vmem:[#allocation54_spill] sm:$0xff] %v9070_v53  ;;  %v3150_v24 = vcombine.low %v9073_v49, %v9076_v31  ;;  %v9100_v42 = vrot.slane %v3254_v21, %v8975_v6  ;;  %v3725_v53 = vld [vmem:[#allocation2 + $0x51] sm:$0xff] }
 0x25a   : > { %3760 = vrot.lane.b32.xlu0 %v3723_v46, %s8456_s22  ;;  %1586 = vrot.lane.b32.xlu1 %v8882_v28, %s8456_s22  ;;  %11595 = vst [vmem:[#allocation55_spill] sm:$0xff] %v9073_v49  ;;  %11596 = vst [vmem:[#allocation56_spill] sm:$0xff] %v9076_v31  ;;  %v9108_v12 = vrot.slane %v3286_v7, %v8975_v6  ;;  %v1177_v7 = vcombine.high %v8909_v18, %v8917_v48 }
 0x25b   : > { %11597 = vst [vmem:[#allocation57_spill] sm:$0xff] %v9092_v10  ;;  %11598 = vst [vmem:[#allocation58_spill] sm:$0xff] %v9095_v54  ;;  %v9114_v20 = vrot.slane %v3150_v24, %v8975_v6  ;;  %v1113_v24 = vcombine.high %v8723_v33, %v8731_v35  ;;  %v1081_v33 = vcombine.high %v8876_v25, %v8862_v51 }
 0x25c   : > { %11599 = vst [vmem:[#allocation59_spill] sm:$0xff] %v9100_v42  ;;  %11600 = vst [vmem:[#allocation60_spill] sm:$0xff] %v9108_v12  ;;  %v1191_v48 = vrot.slane %v1177_v7, %v8975_v6  ;;  %v993_v25 = vcombine.high %v8733_v36, %v8741_v38  ;;  %v1073_v36 = vcombine.high %v8997_v43, %v9015_v30 }
 0x25d   : > { %11602 = vst [vmem:[#allocation62_spill] sm:$0xff] %v9114_v20  ;;  %v1127_v35 = vrot.slane %v1113_v24, %v8858_v50 }
 0x25e   : > { %4504 = vrot.lane.b32.xlu0 %v3723_v46, %s8457_s23  ;;  %2332 = vrot.lane.b32.xlu1 %v8902_v15, %s8457_s23  ;;  %v3118_v46 = vcombine.low %v9092_v10, %v9095_v54 }
 0x260   : > { %v9111_v8 = vrot.slane %v3118_v46, %v8975_v6  ;;  %v1129_v46 = vcombine.high %v8718_v32, %v8725_v34  ;;  %v1009_v32 = vcombine.high %v8950_v4, %v8953_v44  ;;  %v1041_v4 = vcombine.high %v8922_v14, %v8929_v55 }
 0x261   : > { %v1095_v44 = vrot.slane %v1081_v33, %v8858_v50 }
 0x262   : > { %5928 = vrot.lane.b32.xlu0 %v8848_v45, %s8456_s22  ;;  %3764 = vrot.lane.b32.xlu1 %v3725_v53, %s8456_s22  ;;  %11601 = vst [vmem:[#allocation61_spill] sm:$0xff] %v9111_v8  ;;  %v3724_v45 = vld [vmem:[#allocation2 + $0x49] sm:$0xff]  ;;  %v1023_v38 = vrot.slane %v1009_v32, %v8975_v6  ;;  %v1055_v14 = vrot.slane %v1041_v4, %v8975_v6 }
 0x266   : > { %3758 = vrot.lane.b32.xlu0 %v3722_v23, %s8456_s22  ;;  %4508 = vrot.lane.b32.xlu1 %v3725_v53, %s8457_s23  ;;  %v1145_v53 = vcombine.high %v8944_v11, %v8947_v27  ;;  %v1209_v11 = vcombine.high %v8994_v19, %v9012_v9  ;;  %v1143_v27 = vrot.slane %v1129_v46, %v8858_v50 }
 0x267   : > { %v1074_v46 = vcombine.low %v1023_v38, %v1055_v14 }
 0x268   : > { %v1159_v18 = vrot.slane %v1145_v53, %v8975_v6 }
 0x26a   : > { %4502 = vrot.lane.b32.xlu0 %v3722_v23, %s8457_s23  ;;  %3762 = vrot.lane.b32.xlu1 %v3724_v45, %s8456_s22  ;;  %v1097_v23 = vcombine.high %v8902_v15, %v8904_v47  ;;  %v961_v15 = vcombine.high %v8882_v28, %v8906_v17  ;;  %v1211_v7 = vcombine.high %v1159_v18, %v1191_v48 }
 0x26c   : > { %v1111_v34 = vrot.slane %v1097_v23, %v8858_v50  ;;  %v975_v24 = vrot.slane %v961_v15, %v8858_v50  ;;  %v1007_v23 = vrot.slane %v993_v25, %v8858_v50 }
 0x26e   : > { %1592 = vrot.lane.b32.xlu0 %v8862_v51, %s8456_s22  ;;  %4506 = vrot.lane.b32.xlu1 %v3724_v45, %s8457_s23  ;;  %v945_v45 = vcombine.high %v8878_v26, %v8864_v52  ;;  %v11629_v26 = vld [vmem:[#allocation12_spill] sm:$0xff] }
 0x270   : > { %v959_v55 = vrot.slane %v945_v45, %v8858_v50  ;;  %v1161_v45 = vcombine.high %v1095_v44, %v1111_v34 }
 0x272   : > { %1590 = vrot.lane.b32.xlu0 %v8864_v52, %s8456_s22  ;;  %1596 = vrot.lane.b32.xlu1 %v8904_v47, %s8456_s22  ;;  %v1024_v15 = vcombine.low %v959_v55, %v975_v24 }
 0x274   : > { %v1032_v4 = vrot.slane %v1024_v15, %v8975_v6 }
 0x276   : > { %2336 = vrot.lane.b32.xlu0 %v8862_v51, %s8457_s23  ;;  %1594 = vrot.lane.b32.xlu1 %v8906_v17, %s8456_s22  ;;  %v977_v51 = vcombine.high %v8739_v37, %v8747_v39  ;;  %v1210_v37 = vcombine.low %v1159_v18, %v1191_v48  ;;  %v1160_v39 = vcombine.low %v1095_v44, %v1111_v34 }
 0x277   : > { %v1193_v48 = vcombine.high %v1127_v35, %v1143_v27 }
 0x278   : > { %v991_v53 = vrot.slane %v977_v51, %v8858_v50  ;;  %v1168_v33 = vrot.slane %v1160_v39, %v8975_v6  ;;  %v1175_v39 = vrot.slane %v1161_v45, %v8975_v6 }
 0x279   : > { %v1207_v34 = vrot.slane %v1193_v48, %v8975_v6 }
 0x27a   : > { %2340 = vrot.lane.b32.xlu1 %v8904_v47, %s8457_s23  ;;  %1245 = vrot.lane.b32.xlu0 %v1209_v11, %s8460_s24  ;;  %v1192_v47 = vcombine.low %v1127_v35, %v1143_v27  ;;  %v1056_v32 = vcombine.low %v991_v53, %v1007_v23  ;;  %v1057_v44 = vcombine.high %v991_v53, %v1007_v23 }
 0x27b   : > { %v1215_v27 = vcombine.high %v1175_v39, %v1207_v34 }
 0x27c   : > { %v1200_v11 = vrot.slane %v1192_v47, %v8975_v6  ;;  %v1064_v18 = vrot.slane %v1056_v32, %v8975_v6  ;;  %v1071_v35 = vrot.slane %v1057_v44, %v8975_v6  ;;  %v3982_v44 = vcombine.low %v8778_v57, %v8782_v59 }
 0x27e   : > { %1249 = vrot.lane.b32.xlu1 %v1210_v37, %s8461_s25  ;;  %1217 = vrot.lane.b32.xlu0 %v1073_v36, %s8460_s24  ;;  %v1212_v51 = vcombine.low %v1168_v33, %v1200_v11  ;;  %v1075_v37 = vcombine.high %v1023_v38, %v1055_v14  ;;  %v1213_v25 = vcombine.high %v1168_v33, %v1200_v11 }
 0x27f   : > { %v1076_v36 = vcombine.low %v1032_v4, %v1064_v18  ;;  %v1214_v38 = vcombine.low %v1175_v39, %v1207_v34  ;;  %v1077_v47 = vcombine.high %v1032_v4, %v1064_v18  ;;  %v3990_v49 = vrot.slane %v3982_v44, %v8858_v50 }
 0x282   : > { %1253 = vrot.lane.b32.xlu1 %v1211_v7, %s8462_s26  ;;  %1221 = vrot.lane.b32.xlu0 %v1074_v46, %s8461_s25  ;;  %v1025_v7 = vcombine.high %v959_v55, %v975_v24 }
 0x284   : > { %v1039_v14 = vrot.slane %v1025_v7, %v8975_v6 }
 0x286   : > { %1257 = vrot.lane.b32.xlu1 %v1212_v51, %s8463_s29  ;;  %1225 = vrot.lane.b32.xlu0 %v1075_v37, %s8462_s26  ;;  %v1078_v24 = vcombine.low %v1039_v14, %v1071_v35  ;;  %v1079_v55 = vcombine.high %v1039_v14, %v1071_v35 }
 0x28a   : > { %1261 = vrot.lane.b32.xlu1 %v1213_v25, %s8464_s30  ;;  %1229 = vrot.lane.b32.xlu0 %v1076_v36, %s8463_s29 }
 0x28e   : > { %1265 = vrot.lane.b32.xlu1 %v1214_v38, %s8465_s9  ;;  %1233 = vrot.lane.b32.xlu0 %v1077_v47, %s8464_s30  ;;  %v3966_v38 = vcombine.low %v8776_v56, %v8780_v58 }
 0x290   : > { %v3974_v21 = vrot.slane %v3966_v38, %v8858_v50  ;;  %v3983_v38 = vcombine.high %v8778_v57, %v8782_v59 }
 0x292   : > { %1269 = vrot.lane.b32.xlu1 %v1215_v27, %s8466_s10  ;;  %1237 = vrot.lane.b32.xlu0 %v1078_v24, %s8465_s9  ;;  %v4726_v27 = vcombine.low %v8794_v1, %v8798_v3  ;;  %v4710_v24 = vcombine.low %v8792_v0, %v8796_v2  ;;  %v4031_v13 = vcombine.high %v3974_v21, %v3990_v49 }
 0x294   : > { %v4734_v42 = vrot.slane %v4726_v27, %v8858_v50  ;;  %v4718_v12 = vrot.slane %v4710_v24, %v8858_v50  ;;  %v3967_v24 = vcombine.high %v8776_v56, %v8780_v58 }
 0x296   : > { %1241 = vrot.lane.b32.xlu0 %v1079_v55, %s8466_s10  ;;  %v4774_v16 = vcombine.low %v4718_v12, %v4734_v42 }
 0x2ac   : > { %v9199_v53 = vpop.permute.xlu0 %3752 }
 0x2b0   : > { %v9201_v23 = vpop.permute.xlu0 %4496 }
 0x2b4   : > { %v9203_v46 = vpop.permute.xlu0 %5920  ;;  %v3757_v33 = vpop.permute.xlu1 %3756 }
 0x2b5   : > { %11603 = vst [vmem:[#allocation63_spill] sm:$0xff] %v9203_v46  ;;  %v4030_v46 = vcombine.low %v3974_v21, %v3990_v49 }
 0x2b8   : > { %v9205_v15 = vpop.permute.xlu0 %3750  ;;  %v9207_v11 = vpop.permute.xlu1 %4500 }
 0x2bc   : > { %v9209_v32 = vpop.permute.xlu0 %4494  ;;  %v9211_v51 = vpop.permute.xlu1 %5924 }
 0x2bd   : > { %11604 = vst [vmem:[#allocation64_spill] sm:$0xff] %v9209_v32  ;;  %11605 = vst [vmem:[#allocation65_spill] sm:$0xff] %v9211_v51 }
 0x2c0   : > { %v9213_v37 = vpop.permute.xlu0 %1584  ;;  %v9215_v4 = vpop.permute.xlu1 %3754 }
 0x2c1   : > { %11606 = vst [vmem:[#allocation66_spill] sm:$0xff] %v9213_v37 }
 0x2c4   : > { %v9217_v45 = vpop.permute.xlu0 %1582  ;;  %v9219_v18 = vpop.permute.xlu1 %4498 }
 0x2c8   : > { %v9221_v48 = vpop.permute.xlu0 %2328  ;;  %v9223_v25 = vpop.permute.xlu1 %1588 }
 0x2c9   : > { %11607 = vst [vmem:[#allocation67_spill] sm:$0xff] %v9221_v48  ;;  %11608 = vst [vmem:[#allocation68_spill] sm:$0xff] %v9223_v25 }
 0x2cc   : > { %v3761_v36 = vpop.permute.xlu0 %3760  ;;  %v9225_v39 = vpop.permute.xlu1 %1586 }
 0x2cd   : > { %v3934_v47 = vcombine.low %v9199_v53, %v3761_v36  ;;  %v3935_v57 = vcombine.high %v9199_v53, %v3761_v36  ;;  %v4727_v36 = vcombine.high %v8794_v1, %v8798_v3  ;;  %v3846_v1 = vcombine.low %v8786_v61, %v8790_v63 }
 0x2cf   : > { %v3942_v8 = vrot.slane %v3934_v47, %v8858_v50  ;;  %v9345_v17 = vrot.slane %v3846_v1, %v8858_v50 }
 0x2d0   : > { %v9227_v7 = vpop.permute.xlu0 %4504  ;;  %v9229_v34 = vpop.permute.xlu1 %2332 }
 0x2d1   : > { %11609 = vst [vmem:[#allocation69_spill] sm:$0xff] %v9229_v34  ;;  %v4678_v31 = vcombine.low %v9201_v23, %v9227_v7 }
 0x2d4   : > { %v9236_v14 = vpop.permute.xlu0 %5928  ;;  %v3765_v35 = vpop.permute.xlu1 %3764 }
 0x2d5   : > { %11610 = vst [vmem:[#allocation70_spill] sm:$0xff] %v9236_v14  ;;  %v3950_v55 = vcombine.low %v3757_v33, %v3765_v35  ;;  %v3951_v47 = vcombine.high %v3757_v33, %v3765_v35  ;;  %v9298_v35 = vrot.slane %v3935_v57, %v8858_v50  ;;  %v11618_v57 = vld [vmem:[#allocation4_spill] sm:$0xff] }
 0x2d7   : > { %v3958_v20 = vrot.slane %v3950_v55, %v8858_v50  ;;  %v4686_v55 = vrot.slane %v4678_v31, %v8858_v50  ;;  %v9268_v31 = vrot.slane %v4030_v46, %v8975_v6  ;;  %v9288_v46 = vrot.slane %v3967_v24, %v8858_v50  ;;  %v11617_v24 = vld [vmem:[#allocation6_spill] sm:$0xff] }
 0x2d8   : > { %v9248_v10 = vpop.permute.xlu0 %3758  ;;  %v4509_v54 = vpop.permute.xlu1 %4508 }
 0x2d9   : > { %v3998_v22 = vcombine.low %v3942_v8, %v3958_v20  ;;  %v4694_v44 = vcombine.low %v9207_v11, %v4509_v54  ;;  %v3999_v14 = vcombine.high %v3942_v8, %v3958_v20  ;;  %v9271_v20 = vrot.slane %v3983_v38, %v8858_v50  ;;  %v11615_v38 = vld [vmem:[#allocation7_spill] sm:$0xff] }
 0x2da   : > { %v9274_v8 = vrot.slane %v3951_v47, %v8858_v50  ;;  %v11616_v47 = vld [vmem:[#allocation5_spill] sm:$0xff] }
 0x2db   : > { %v4702_v51 = vrot.slane %v4694_v44, %v8858_v50  ;;  %v9262_v27 = vrot.slane %v3998_v22, %v8975_v6  ;;  %v4695_v22 = vcombine.high %v9207_v11, %v4509_v54  ;;  %v4013_v21 = vrot.slane %v3999_v14, %v8975_v6 }
 0x2dc   : > { %v9257_v29 = vpop.permute.xlu0 %4502  ;;  %v9259_v41 = vpop.permute.xlu1 %3762  ;;  %v4711_v54 = vcombine.high %v8792_v0, %v8796_v2  ;;  %v9295_v11 = vrot.slane %v4774_v16, %v8975_v6  ;;  %v4679_v14 = vcombine.high %v9201_v23, %v9227_v7  ;;  %v4045_v44 = vrot.slane %v4031_v13, %v8975_v6 }
 0x2dd   : > { %v4742_v59 = vcombine.low %v4686_v55, %v4702_v51  ;;  %v4743_v33 = vcombine.high %v4686_v55, %v4702_v51  ;;  %v4063_v56 = vcombine.high %v9262_v27, %v9268_v31  ;;  %v4775_v51 = vcombine.high %v4718_v12, %v4734_v42 }
 0x2de   : > { %11613 = vst [vmem:[#allocation73_spill] sm:$0xff] %v9295_v11  ;;  %v3847_v0 = vcombine.high %v8786_v61, %v8790_v63  ;;  %v3830_v2 = vcombine.low %v8784_v60, %v8788_v62  ;;  %v4014_v16 = vcombine.low %v9298_v35, %v9274_v8  ;;  %v9315_v42 = vrot.slane %v4695_v22, %v8858_v50 }
 0x2df   : > { %v9285_v53 = vrot.slane %v4742_v59, %v8975_v6  ;;  %4099 = vrot.lane.b32.xlu0 %v4063_v56, %s8460_s24  ;;  %v4064_v12 = vcombine.low %v4013_v21, %v4045_v44  ;;  %v4757_v7 = vrot.slane %v4743_v33, %v8975_v6  ;;  %v4046_v61 = vcombine.low %v9288_v46, %v9271_v20 }
 0x2e0   : > { %v9279_v58 = vpop.permute.xlu0 %1592  ;;  %v9281_v49 = vpop.permute.xlu1 %4506  ;;  %v3831_v63 = vcombine.high %v8784_v60, %v8788_v62  ;;  %v4590_v55 = vcombine.low %v11616_v47, %v11615_v38  ;;  %v4574_v59 = vcombine.low %v11618_v57, %v11617_v24  ;;  %v9332_v22 = vrot.slane %v4727_v36, %v8858_v50  ;;  %v11624_v38 = vld [vmem:[#allocation8_spill] sm:$0xff] }
 0x2e1   : > { %11611 = vst [vmem:[#allocation71_spill] sm:$0xff] %v9279_v58  ;;  %11612 = vst [vmem:[#allocation72_spill] sm:$0xff] %v9285_v53  ;;  %v4807_v3 = vcombine.high %v9285_v53, %v9295_v11  ;;  %v9335_v56 = vrot.slane %v4711_v54, %v8858_v50  ;;  %v9338_v33 = vrot.slane %v4679_v14, %v8858_v50 }
 0x2e2   : > { %v4789_v60 = vrot.slane %v4775_v51, %v8975_v6  ;;  %v4047_v62 = vcombine.high %v9288_v46, %v9271_v20  ;;  %v9351_v36 = vrot.slane %v3830_v2, %v8858_v50  ;;  %v4065_v14 = vcombine.high %v4013_v21, %v4045_v44  ;;  %v11621_v2 = vld [vmem:[#allocation9_spill] sm:$0xff] }
 0x2e3   : > { %4843 = vrot.lane.b32.xlu1 %v4807_v3, %s8460_s24  ;;  %4103 = vrot.lane.b32.xlu0 %v4064_v12, %s8461_s25  ;;  %v9348_v3 = vrot.slane %v3847_v0, %v8858_v50  ;;  %v4758_v54 = vcombine.low %v9338_v33, %v9315_v42  ;;  %v4022_v20 = vrot.slane %v4014_v16, %v8975_v6  ;;  %v11620_v0 = vld [vmem:[#allocation11_spill] sm:$0xff] }
 0x2e4   : > { %v9317_v13 = vpop.permute.xlu0 %1590  ;;  %v9319_v23 = vpop.permute.xlu1 %1596  ;;  %v4808_v57 = vcombine.low %v4757_v7, %v4789_v60  ;;  %v9361_v46 = vrot.slane %v4590_v55, %v8858_v50  ;;  %v9364_v1 = vrot.slane %v4574_v59, %v8858_v50  ;;  %v1814_v24 = vcombine.low %v11621_v2, %v11620_v0  ;;  %v11623_v0 = vld [vmem:[#allocation10_spill] sm:$0xff] }
 0x2e5   : > { %11614 = vst [vmem:[#allocation74_spill] sm:$0xff] %v9319_v23  ;;  %v3814_v47 = vcombine.low %v9215_v4, %v9259_v41  ;;  %v9371_v21 = vrot.slane %v3831_v63, %v8858_v50  ;;  %v4790_v44 = vcombine.low %v9335_v56, %v9332_v22  ;;  %v4054_v16 = vrot.slane %v4046_v61, %v8975_v6 }
 0x2e6   : > { %v3894_v55 = vcombine.low %v9351_v36, %v9345_v17  ;;  %v4015_v2 = vcombine.high %v9298_v35, %v9274_v8  ;;  %v3798_v63 = vcombine.low %v9205_v15, %v9248_v10  ;;  %v1798_v28 = vcombine.low %v11624_v38, %v11623_v0  ;;  %v11626_v38 = vld [vmem:[#allocation15_spill] sm:$0xff]  ;;  %v11628_v0 = vld [vmem:[#allocation14_spill] sm:$0xff] }
 0x2e7   : > { %11622 = vst [vmem:[#allocation76_spill] sm:$0xff] %v9371_v21  ;;  %4107 = vrot.lane.b32.xlu0 %v4065_v14, %s8462_s26  ;;  %4847 = vrot.lane.b32.xlu1 %v4808_v57, %s8461_s25  ;;  %v4066_v14 = vcombine.low %v4022_v20, %v4054_v16  ;;  %v4809_v5 = vcombine.high %v4757_v7, %v4789_v60  ;;  %v11627_v7 = vld [vmem:[#allocation13_spill] sm:$0xff] }
 0x2e8   : > { %v9355_v12 = vpop.permute.xlu0 %2336  ;;  %v9357_v51 = vpop.permute.xlu1 %1594  ;;  %v4766_v40 = vrot.slane %v4758_v54, %v8975_v6  ;;  %v4791_v59 = vcombine.high %v9335_v56, %v9332_v22  ;;  %v9398_v35 = vrot.slane %v1814_v24, %v8858_v50  ;;  %v9401_v52 = vrot.slane %v3814_v47, %v8858_v50 }
 0x2e9   : > { %11619 = vst [vmem:[#allocation75_spill] sm:$0xff] %v9355_v12  ;;  %v1678_v60 = vcombine.low %v11627_v7, %v11626_v38  ;;  %v1662_v21 = vcombine.low %v11629_v26, %v11628_v0  ;;  %v4798_v22 = vrot.slane %v4790_v44, %v8975_v6  ;;  %v9411_v56 = vrot.slane %v3798_v63, %v8858_v50  ;;  %v11632_v7 = vld [vmem:[#allocation18_spill] sm:$0xff]  ;;  %v11633_v38 = vld [vmem:[#allocation16_spill] sm:$0xff] }
 0x2ea   : > { %v4558_v24 = vcombine.low %v9219_v18, %v9281_v49  ;;  %v1782_v47 = vcombine.low %v9223_v25, %v9319_v23  ;;  %v4029_v54 = vrot.slane %v4015_v2, %v8975_v6  ;;  %v9419_v8 = vrot.slane %v1798_v28, %v8858_v50 }
 0x2eb   : > { %4111 = vrot.lane.b32.xlu0 %v4066_v14, %s8463_s29  ;;  %4851 = vrot.lane.b32.xlu1 %v4809_v5, %s8462_s26  ;;  %v4759_v14 = vcombine.high %v9338_v33, %v9315_v42  ;;  %v4067_v5 = vcombine.high %v4022_v20, %v4054_v16  ;;  %v4810_v26 = vcombine.low %v4766_v40, %v4798_v22  ;;  %v11630_v33 = vld [vmem:[#allocation19_spill] sm:$0xff]  ;;  %v11631_v20 = vld [vmem:[#allocation17_spill] sm:$0xff] }
 0x2ec   : > { %v9388_v57 = vpop.permute.xlu0 %1245  ;;  %v9390_v61 = vpop.permute.xlu1 %2340  ;;  %v4542_v0 = vcombine.low %v9209_v32, %v9257_v29  ;;  %v3862_v25 = vcombine.low %v9411_v56, %v9401_v52  ;;  %v1766_v2 = vcombine.low %v9213_v37, %v9279_v58  ;;  %v4061_v28 = vrot.slane %v4047_v62, %v8975_v6 }
 0x2ed   : > { %11625 = vst [vmem:[#allocation77_spill] sm:$0xff] %v9390_v61  ;;  %v9435_v23 = vrot.slane %v1678_v60, %v8858_v50  ;;  %v9438_v42 = vrot.slane %v1662_v21, %v8858_v50  ;;  %v2558_v16 = vcombine.low %v11631_v20, %v11630_v33  ;;  %v2542_v32 = vcombine.low %v11633_v38, %v11632_v7 }
 0x2ee   : > { %v9447_v37 = vrot.slane %v4558_v24, %v8858_v50  ;;  %v9450_v62 = vrot.slane %v1782_v47, %v8858_v50  ;;  %v4068_v60 = vcombine.low %v4029_v54, %v4061_v28  ;;  %v1646_v21 = vcombine.low %v9225_v39, %v9357_v51 }
 0x2ef   : > { %4115 = vrot.lane.b32.xlu0 %v4067_v5, %s8464_s30  ;;  %4855 = vrot.lane.b32.xlu1 %v4810_v26, %s8463_s29  ;;  %v2526_v20 = vcombine.low %v9229_v34, %v9390_v61  ;;  %v4811_v33 = vcombine.high %v4766_v40, %v4798_v22  ;;  %v4773_v38 = vrot.slane %v4759_v14, %v8975_v6 }
 0x2f0   : > { %v9423_v44 = vpop.permute.xlu0 %1217  ;;  %v9425_v63 = vpop.permute.xlu1 %1249  ;;  %v9462_v24 = vrot.slane %v4542_v0, %v8858_v50  ;;  %v9465_v47 = vrot.slane %v1766_v2, %v8858_v50  ;;  %v9468_v7 = vrot.slane %v3862_v25, %v8975_v6  ;;  %v1630_v40 = vcombine.low %v9217_v45, %v9317_v13 }
 0x2f1   : > { %v2510_v22 = vcombine.low %v9221_v48, %v9355_v12  ;;  %v4805_v0 = vrot.slane %v4791_v59, %v8975_v6  ;;  %v4069_v2 = vcombine.high %v4029_v54, %v4061_v28  ;;  %v9484_v58 = vrot.slane %v3894_v55, %v8975_v6 }
 0x2f2   : > { %v4606_v14 = vcombine.low %v9462_v24, %v9447_v37  ;;  %v1830_v25 = vcombine.low %v9465_v47, %v9450_v62  ;;  %v9487_v34 = vrot.slane %v1646_v21, %v8858_v50  ;;  %v9490_v48 = vrot.slane %v2526_v20, %v8858_v50 }
 0x2f3   : > { %4119 = vrot.lane.b32.xlu0 %v4068_v60, %s8465_s9  ;;  %4859 = vrot.lane.b32.xlu1 %v4811_v33, %s8464_s30  ;;  %v4812_v60 = vcombine.low %v4773_v38, %v4805_v0  ;;  %v1862_v61 = vcombine.low %v9419_v8, %v9398_v35  ;;  %v9499_v54 = vrot.slane %v2558_v16, %v8858_v50 }
 0x2f4   : > { %v9456_v5 = vpop.permute.xlu0 %1221  ;;  %v9458_v26 = vpop.permute.xlu1 %1253  ;;  %v9502_v55 = vrot.slane %v2542_v32, %v8858_v50  ;;  %v1726_v20 = vcombine.low %v9438_v42, %v9435_v23  ;;  %v9509_v21 = vrot.slane %v1630_v40, %v8858_v50  ;;  %v9512_v12 = vrot.slane %v2510_v22, %v8858_v50 }
 0x2f5   : > { %v3815_v32 = vcombine.high %v9215_v4, %v9259_v41  ;;  %v3863_v16 = vcombine.high %v9411_v56, %v9401_v52  ;;  %v9521_v28 = vrot.slane %v4606_v14, %v8975_v6  ;;  %v4813_v11 = vcombine.high %v4773_v38, %v4805_v0 }
 0x2f6   : > { %v1694_v40 = vcombine.low %v9509_v21, %v9487_v34  ;;  %v2574_v22 = vcombine.low %v9512_v12, %v9490_v48  ;;  %v2606_v41 = vcombine.low %v9502_v55, %v9499_v54  ;;  %v3799_v52 = vcombine.high %v9205_v15, %v9248_v10 }
 0x2f7   : > { %4123 = vrot.lane.b32.xlu0 %v4069_v2, %s8466_s10  ;;  %4863 = vrot.lane.b32.xlu1 %v4812_v60, %s8465_s9  ;;  %v9528_v60 = vrot.slane %v1830_v25, %v8975_v6  ;;  %v11634_v4 = vcombine.low %v9364_v1, %v9361_v46  ;;  %v9541_v14 = vrot.slane %v1862_v61, %v8975_v6  ;;  %v11636_v25 = vld [vmem:[#allocation24_spill] sm:$0xff] }
 0x2f8   : > { %v9492_v33 = vpop.permute.xlu0 %1225  ;;  %v1258_v59 = vpop.permute.xlu1 %1257  ;;  %v11635_v38 = vcombine.low %v8994_v19, %v9012_v9  ;;  %v3829_v10 = vrot.slane %v3815_v32, %v8858_v50  ;;  %v3877_v61 = vrot.slane %v3863_v16, %v8975_v6  ;;  %v3927_v9 = vcombine.high %v9468_v7, %v9484_v58  ;;  %v11640_v19 = vld [vmem:[#allocation25_spill] sm:$0xff] }
 0x2f9   : > { %v9538_v56 = vrot.slane %v11634_v4, %v8975_v6 }
 0x2fa   : > { %v1286_v0 = vsel %vm1272_vm7, %v11635_v38, %v9388_v57  ;;  %v9560_v38 = vrot.slane %v1694_v40, %v8975_v6 }
 0x2fb   : > { %5936 = vrot.lane.b32.xlu0 %v11636_v25, %s8456_s22  ;;  %4867 = vrot.lane.b32.xlu1 %v4813_v11, %s8466_s10  ;;  %v1287_v15 = vsel %vm1274_vm8, %v1286_v0, %v9425_v63  ;;  %v9563_v11 = vrot.slane %v2574_v22, %v8975_v6  ;;  %v3813_v63 = vrot.slane %v3799_v52, %v8858_v50 }
 0x2fc   : > { %v1230_v2 = vpop.permute.xlu0 %1229  ;;  %v1262_v53 = vpop.permute.xlu1 %1261  ;;  %11637 = vst [vmem:[#allocation24_spill] sm:$0xff] %v9560_v38  ;;  %v1288_v16 = vsel %vm1276_vm9, %v1287_v15, %v9458_v26  ;;  %v11639_v0 = vcombine.high %v9351_v36, %v9345_v17  ;;  %v9579_v22 = vrot.slane %v1726_v20, %v8975_v6  ;;  %v9582_v52 = vrot.slane %v2606_v41, %v8975_v6 }
 0x2fd   : > { %11638 = vst [vmem:[#allocation78_spill] sm:$0xff] %v9563_v11  ;;  %v1289_v40 = vsel %vm1278_vm10, %v1288_v16, %v1258_v59  ;;  %v3878_v26 = vcombine.low %v3813_v63, %v3829_v10  ;;  %v11643_v17 = vcombine.low %v8997_v43, %v9015_v30 }
 0x2fe   : > { %v3909_v25 = vrot.slane %v11639_v0, %v8975_v6  ;;  %11641 = vst [vmem:[#allocation25_spill] sm:$0xff] %v9579_v22  ;;  %11642 = vst [vmem:[#allocation79_spill] sm:$0xff] %v9582_v52  ;;  %v1290_v59 = vsel %vm1280_vm11, %v1289_v40, %v1262_v53  ;;  %v11644_v53 = vld [vmem:[#allocation76_spill] sm:$0xff] }
 0x2ff   : > { %5944 = vrot.lane.b32.xlu0 %v11640_v19, %s8456_s22  ;;  %4071 = vrot.lane.b32.xlu1 %v3927_v9, %s8460_s24  ;;  %v1273_v36 = vsel %vm1272_vm7, %v11643_v17, %v9423_v44  ;;  %v3910_v44 = vcombine.low %v11644_v53, %v9348_v3 }
 0x300   : > { %v1234_v57 = vpop.permute.xlu0 %1233  ;;  %v1266_v4 = vpop.permute.xlu1 %1265  ;;  %v3928_v15 = vcombine.low %v3877_v61, %v3909_v25  ;;  %v1275_v19 = vsel %vm1274_vm8, %v1273_v36, %v9456_v5  ;;  %v3929_v36 = vcombine.high %v3877_v61, %v3909_v25 }
 0x301   : > { %v1291_v9 = vsel %vm1282_vm12, %v1290_v59, %v1266_v4  ;;  %v1277_v43 = vsel %vm1276_vm9, %v1275_v19, %v9492_v33  ;;  %v11645_v4 = vld [vmem:[#allocation22_spill] sm:$0xff]  ;;  %v3886_v33 = vrot.slane %v3878_v26, %v8975_v6 }
 0x302   : > { %v1279_v5 = vsel %vm1278_vm10, %v1277_v43, %v1230_v2  ;;  %v3918_v2 = vrot.slane %v3910_v44, %v8975_v6  ;;  %v2306_v26 = vld [vmem:[#allocation2 + $0x90] sm:$0xff]  ;;  %v11650_v44 = vld [vmem:[#allocation21_spill] sm:$0xff] }
 0x303   : > { %2326 = vrot.lane.b32.xlu0 %v11645_v4, %s8457_s23  ;;  %4075 = vrot.lane.b32.xlu1 %v3928_v15, %s8461_s25  ;;  %v1281_v40 = vsel %vm1280_vm11, %v1279_v5, %v1234_v57  ;;  %v3879_v15 = vcombine.high %v3813_v63, %v3829_v10  ;;  %v2302_v57 = vld [vmem:[#allocation2 + $0x60] sm:$0xff]  ;;  %v11647_v63 = vld [vmem:[#allocation38_spill] sm:$0xff]  ;;  %v11651_v5 = vld [vmem:[#allocation41_spill] sm:$0xff] }
 0x304   : > { %v1238_v20 = vpop.permute.xlu0 %1237  ;;  %v1270_v16 = vpop.permute.xlu1 %1269  ;;  %v3931_v61 = vcombine.high %v3886_v33, %v3918_v2  ;;  %v11652_v4 = vld [vmem:[#allocation44_spill] sm:$0xff] }
 0x305   : > { %v1292_v30 = vsel %vm1284_vm13, %v1291_v9, %v1270_v16  ;;  %v1283_v17 = vsel %vm1282_vm12, %v1281_v40, %v1238_v20  ;;  %v11646_v9 = vld [vmem:[#allocation20_spill] sm:$0xff]  ;;  %v3930_v16 = vcombine.low %v3886_v33, %v3918_v2  ;;  %v3911_v20 = vcombine.high %v11644_v53, %v9348_v3  ;;  %v11649_v53 = vld [vmem:[#allocation26_spill] sm:$0xff]  ;;  %v11656_v33 = vld [vmem:[#allocation39_spill] sm:$0xff] }
 0x306   : > { %1357 = vmatprep.subr.mxu0 %v1292_v30  ;;  %v3893_v25 = vrot.slane %v3879_v15, %v8975_v6  ;;  %v11648_v30 = vld [vmem:[#allocation36_spill] sm:$0xff]  ;;  %v5287_v40 = vcombine.high %v11652_v4, %v11651_v5  ;;  %v11658_v2 = vld [vmem:[#allocation47_spill] sm:$0xff]  ;;  %v11663_v4 = vld [vmem:[#allocation6_spill] sm:$0xff] }
 0x307   : > { %2334 = vrot.lane.b32.xlu0 %v11646_v9, %s8457_s23  ;;  %4079 = vrot.lane.b32.xlu1 %v3929_v36, %s8462_s26  ;;  %v3925_v43 = vrot.slane %v3911_v20, %v8975_v6  ;;  %v11654_v36 = vld [vmem:[#allocation33_spill] sm:$0xff]  ;;  %v11657_v9 = vld [vmem:[#allocation50_spill] sm:$0xff] }
 0x308   : > { %v1242_v59 = vpop.permute.xlu0 %1241  ;;  %v5351_v15 = vcombine.high %v11658_v2, %v11657_v9 }
 0x309   : > { %v1285_v19 = vsel %vm1284_vm13, %v1283_v17, %v1242_v59  ;;  %v3932_v10 = vcombine.low %v3893_v25, %v3925_v43  ;;  %v3933_v3 = vcombine.high %v3893_v25, %v3925_v43  ;;  %v11653_v17 = vld [vmem:[#allocation27_spill] sm:$0xff]  ;;  %v11655_v59 = vld [vmem:[#allocation40_spill] sm:$0xff]  ;;  %v4607_v43 = vcombine.high %v9462_v24, %v9447_v37 }
 0x30a   : > { %1358 = vmatpush1.msra.mxu0 %v1285_v19  ;;  %v5319_v19 = vcombine.high %v11656_v33, %v11655_v59  ;;  %v11660_v25 = vld [vmem:[#allocation23_spill] sm:$0xff]  ;;  %v4639_v59 = vcombine.high %v9364_v1, %v9361_v46  ;;  %v11665_v33 = vld [vmem:[#allocation64_spill] sm:$0xff] }
 0x30b   : > { %2342 = vrot.lane.b32.xlu0 %v2302_v57, %s8457_s23  ;;  %4083 = vrot.lane.b32.xlu1 %v3930_v16, %s8463_s29  ;;  %v5301_v16 = vrot.slane %v5287_v40, %v8975_v6  ;;  %v11659_v57 = vld [vmem:[#allocation35_spill] sm:$0xff]  ;;  %v11664_v40 = vld [vmem:[#allocation4_spill] sm:$0xff]  ;;  %v4621_v24 = vrot.slane %v4607_v43, %v8975_v6 }
 0x30c   : > { %v5333_v20 = vrot.slane %v5319_v19, %v8975_v6  ;;  %v4543_v19 = vcombine.high %v11665_v33, %v9257_v29  ;;  %v4653_v29 = vrot.slane %v4639_v59, %v8975_v6  ;;  %v11670_v59 = vld [vmem:[#allocation31_spill] sm:$0xff] }
 0x30e   : > { %v4557_v1 = vrot.slane %v4543_v19, %v8858_v50 }
 0x30f   : > { %2350 = vrot.lane.b32.xlu0 %v2306_v26, %s8457_s23  ;;  %4087 = vrot.lane.b32.xlu1 %v3931_v61, %s8464_s30  ;;  %v5352_v61 = vcombine.low %v5301_v16, %v5333_v20  ;;  %v4559_v26 = vcombine.high %v9219_v18, %v9281_v49  ;;  %v11666_v18 = vld [vmem:[#allocation29_spill] sm:$0xff]  ;;  %v4671_v49 = vcombine.high %v9521_v28, %v9538_v56 }
 0x311   : > { %v4573_v37 = vrot.slane %v4559_v26, %v8858_v50  ;;  %v4673_v26 = vcombine.high %v4621_v24, %v4653_v29 }
 0x313   : > { %5918 = vrot.lane.b32.xlu0 %v11647_v63, %s8456_s22  ;;  %4091 = vrot.lane.b32.xlu1 %v3932_v10, %s8465_s9  ;;  %v5353_v10 = vcombine.high %v5301_v16, %v5333_v20  ;;  %v2304_v16 = vld [vmem:[#allocation2 + $0x78] sm:$0xff]  ;;  %v4672_v20 = vcombine.low %v4621_v24, %v4653_v29  ;;  %v4623_v19 = vcombine.high %v4557_v1, %v4573_v37 }
 0x317   : > { %5926 = vrot.lane.b32.xlu0 %v11648_v30, %s8456_s22  ;;  %4095 = vrot.lane.b32.xlu1 %v3933_v3, %s8466_s10  ;;  %v11661_v3 = vld [vmem:[#allocation7_spill] sm:$0xff] }
 0x31b   : > { %5934 = vrot.lane.b32.xlu0 %v11649_v53, %s8456_s22  ;;  %5932 = vrot.lane.b32.xlu1 %v11650_v44, %s8456_s22  ;;  %v11662_v44 = vld [vmem:[#allocation5_spill] sm:$0xff] }
 0x31c   : > { %v4591_v5 = vcombine.high %v11662_v44, %v11661_v3  ;;  %v11668_v3 = vld [vmem:[#allocation37_spill] sm:$0xff] }
 0x31f   : > { %5942 = vrot.lane.b32.xlu0 %v11653_v17, %s8456_s22  ;;  %5940 = vrot.lane.b32.xlu1 %v11654_v36, %s8456_s22  ;;  %v4575_v36 = vcombine.high %v11664_v40, %v11663_v4  ;;  %v5223_v40 = vcombine.high %v11647_v63, %v11648_v30  ;;  %v4637_v30 = vrot.slane %v4623_v19, %v8975_v6 }
 0x321   : > { %v4589_v46 = vrot.slane %v4575_v36, %v8858_v50  ;;  %v11669_v36 = vld [vmem:[#allocation32_spill] sm:$0xff] }
 0x322   : > { %v5271_v33 = vcombine.high %v11670_v59, %v11669_v36  ;;  %v11673_v36 = vld [vmem:[#allocation53_spill] sm:$0xff]  ;;  %v11674_v59 = vld [vmem:[#allocation48_spill] sm:$0xff] }
 0x323   : > { %5495 = vrot.lane.b32.xlu0 %v5351_v15, %s8460_s24  ;;  %5948 = vrot.lane.b32.xlu1 %v11659_v57, %s8456_s22  ;;  %v4605_v15 = vrot.slane %v4591_v5, %v8858_v50  ;;  %v4622_v57 = vcombine.low %v4557_v1, %v4573_v37  ;;  %v5255_v5 = vcombine.high %v11649_v53, %v11653_v17  ;;  %v9698_v37 = vld [vmem:[#allocation2 + $0x7a] sm:$0xff] }
 0x324   : > { %v5237_v17 = vrot.slane %v5223_v40, %v8858_v50 }
 0x325   : > { %v4630_v43 = vrot.slane %v4622_v57, %v8975_v6  ;;  %v5269_v24 = vrot.slane %v5255_v5, %v8858_v50  ;;  %v4655_v53 = vcombine.high %v4589_v46, %v4605_v15  ;;  %v9713_v5 = vld [vmem:[#allocation2 + $0x82] sm:$0xff] }
 0x327   : > { %5499 = vrot.lane.b32.xlu0 %v5352_v61, %s8461_s25  ;;  %2330 = vrot.lane.b32.xlu1 %v11660_v25, %s8457_s23  ;;  %v2308_v61 = vld [vmem:[#allocation2 + $0xa8] sm:$0xff]  ;;  %v4654_v25 = vcombine.low %v4589_v46, %v4605_v15  ;;  %v4669_v15 = vrot.slane %v4655_v53, %v8975_v6  ;;  %v11676_v53 = vld [vmem:[#allocation28_spill] sm:$0xff] }
 0x329   : > { %v4662_v4 = vrot.slane %v4654_v25, %v8975_v6  ;;  %v4676_v1 = vcombine.low %v4637_v30, %v4669_v15 }
 0x32b   : > { %5503 = vrot.lane.b32.xlu0 %v5353_v10, %s8462_s26  ;;  %2338 = vrot.lane.b32.xlu1 %v11666_v18, %s8457_s23  ;;  %v11667_v10 = vld [vmem:[#allocation34_spill] sm:$0xff]  ;;  %v4674_v18 = vcombine.low %v4630_v43, %v4662_v4  ;;  %v4675_v63 = vcombine.high %v4630_v43, %v4662_v4 }
 0x32c   : > { %v5239_v44 = vcombine.high %v11668_v3, %v11667_v10  ;;  %v9715_v4 = vld [vmem:[#allocation2 + $0xb2] sm:$0xff] }
 0x32d   : > { %v5407_v40 = vcombine.high %v9713_v5, %v9715_v4 }
 0x32f   : > { %2346 = vrot.lane.b32.xlu1 %v2304_v16, %s8457_s23  ;;  %4815 = vrot.lane.b32.xlu0 %v4671_v49, %s8460_s24  ;;  %v5253_v49 = vrot.slane %v5239_v44, %v8858_v50  ;;  %v5285_v16 = vrot.slane %v5271_v33, %v8858_v50  ;;  %v5487_v33 = vcombine.high %v11674_v59, %v11673_v36 }
 0x330   : > { %v5421_v0 = vrot.slane %v5407_v40, %v8858_v50  ;;  %v6631_v40 = vld [vmem:[#allocation2 + $0xa] sm:$0xff] }
 0x331   : > { %v5302_v29 = vcombine.low %v5237_v17, %v5253_v49  ;;  %v5334_v46 = vcombine.low %v5269_v24, %v5285_v16 }
 0x333   : > { %2354 = vrot.lane.b32.xlu1 %v2308_v61, %s8457_s23  ;;  %4819 = vrot.lane.b32.xlu0 %v4672_v20, %s8461_s25  ;;  %v5310_v57 = vrot.slane %v5302_v29, %v8975_v6  ;;  %v11671_v20 = vld [vmem:[#allocation43_spill] sm:$0xff]  ;;  %v11672_v61 = vld [vmem:[#allocation42_spill] sm:$0xff]  ;;  %v5342_v43 = vrot.slane %v5334_v46, %v8975_v6  ;;  %v5303_v46 = vcombine.high %v5237_v17, %v5253_v49 }
 0x334   : > { %v5455_v25 = vcombine.high %v11672_v61, %v11671_v20 }
 0x335   : > { %v5354_v19 = vcombine.low %v5310_v57, %v5342_v43  ;;  %v5355_v32 = vcombine.high %v5310_v57, %v5342_v43  ;;  %v5317_v9 = vrot.slane %v5303_v46, %v8975_v6 }
 0x336   : > { %v5469_v20 = vrot.slane %v5455_v25, %v8975_v6  ;;  %v11679_v25 = vld [vmem:[#allocation45_spill] sm:$0xff] }
 0x337   : > { %5922 = vrot.lane.b32.xlu1 %v11668_v3, %s8456_s22  ;;  %4823 = vrot.lane.b32.xlu0 %v4673_v26, %s8462_s26  ;;  %v9707_v26 = vld [vmem:[#allocation2 + $0xaa] sm:$0xff]  ;;  %v8436_v3 = vld [vmem:[#allocation2 + $0x9a] sm:$0xff] }
 0x33b   : > { %5930 = vrot.lane.b32.xlu1 %v11667_v10, %s8456_s22  ;;  %4827 = vrot.lane.b32.xlu0 %v4674_v18, %s8463_s29  ;;  %v8435_v10 = vld [vmem:[#allocation2 + $0x6a] sm:$0xff] }
 0x33c   : > { %v5391_v44 = vcombine.high %v8435_v10, %v8436_v3  ;;  %v11675_v18 = vld [vmem:[#allocation30_spill] sm:$0xff] }
 0x33e   : > { %v5405_v61 = vrot.slane %v5391_v44, %v8858_v50 }
 0x33f   : > { %5938 = vrot.lane.b32.xlu1 %v9698_v37, %s8456_s22  ;;  %4831 = vrot.lane.b32.xlu0 %v4675_v63, %s8464_s30  ;;  %v11677_v63 = vcombine.high %v11675_v18, %v11676_v53  ;;  %v4677_v53 = vcombine.high %v4637_v30, %v4669_v15 }
 0x341   : > { %v5437_v29 = vrot.slane %v11677_v63, %v8975_v6  ;;  %v6635_v63 = vld [vmem:[#allocation2 + $0x3a] sm:$0xff] }
 0x343   : > { %5946 = vrot.lane.b32.xlu1 %v9707_v26, %s8456_s22  ;;  %4835 = vrot.lane.b32.xlu0 %v4676_v1, %s8465_s9  ;;  %v5335_v1 = vcombine.high %v5269_v24, %v5285_v16  ;;  %v5488_v41 = vcombine.low %v5437_v29, %v5469_v20  ;;  %v5470_v24 = vcombine.low %v5405_v61, %v5421_v0 }
 0x344   : > { %v5489_v17 = vcombine.high %v5437_v29, %v5469_v20  ;;  %v5471_v29 = vcombine.high %v5405_v61, %v5421_v0 }
 0x345   : > { %v5349_v49 = vrot.slane %v5335_v1, %v8975_v6  ;;  %v5478_v57 = vrot.slane %v5470_v24, %v8975_v6 }
 0x346   : > { %v5485_v30 = vrot.slane %v5471_v29, %v8975_v6  ;;  %v8440_v29 = vld [vmem:[#allocation2 + $0x32] sm:$0xff] }
 0x347   : > { %5523 = vrot.lane.b32.xlu1 %v5487_v33, %s8460_s24  ;;  %5507 = vrot.lane.b32.xlu0 %v5354_v19, %s8463_s29  ;;  %v5356_v16 = vcombine.low %v5317_v9, %v5349_v49  ;;  %v11678_v33 = vld [vmem:[#allocation46_spill] sm:$0xff] }
 0x348   : > { %v11680_v19 = vcombine.low %v11678_v33, %v11679_v25  ;;  %v11681_v24 = vcombine.high %v11678_v33, %v11679_v25  ;;  %v8439_v33 = vld [vmem:[#allocation2 + $0x2] sm:$0xff] }
 0x34a   : > { %v5446_v44 = vrot.slane %v11680_v19, %v8975_v6 }
 0x34b   : > { %5527 = vrot.lane.b32.xlu1 %v5488_v41, %s8461_s25  ;;  %5511 = vrot.lane.b32.xlu0 %v5355_v32, %s8464_s30 }
 0x34c   : > { %v5490_v41 = vcombine.low %v5446_v44, %v5478_v57  ;;  %v5491_v20 = vcombine.high %v5446_v44, %v5478_v57 }
 0x34f   : > { %5531 = vrot.lane.b32.xlu1 %v5489_v17, %s8462_s26  ;;  %5515 = vrot.lane.b32.xlu0 %v5356_v16, %s8465_s9  ;;  %v5453_v17 = vrot.slane %v11681_v24, %v8975_v6  ;;  %v1895_v24 = vcombine.high %v9528_v60, %v9541_v14 }
 0x351   : > { %v4100_v43 = vpop.permute.xlu0 %4099  ;;  %v5492_v19 = vcombine.low %v5453_v17, %v5485_v30  ;;  %v5493_v44 = vcombine.high %v5453_v17, %v5485_v30  ;;  %v11683_v17 = vld [vmem:[#allocation15_spill] sm:$0xff]  ;;  %v11684_v30 = vld [vmem:[#allocation13_spill] sm:$0xff] }
 0x353   : > { %5535 = vrot.lane.b32.xlu1 %v5490_v41, %s8463_s29  ;;  %6664 = vrot.lane.b32.xlu0 %v6631_v40, %s8457_s23 }
 0x355   : > { %v9743_v32 = vpop.permute.xlu1 %4843  ;;  %v4104_v18 = vpop.permute.xlu0 %4103 }
 0x357   : > { %4839 = vrot.lane.b32.xlu1 %v4677_v53, %s8466_s10  ;;  %6672 = vrot.lane.b32.xlu0 %v6635_v63, %s8457_s23 }
 0x359   : > { %v4108_v46 = vpop.permute.xlu0 %4107  ;;  %v9747_v1 = vpop.permute.xlu1 %4847 }
 0x35b   : > { %5539 = vrot.lane.b32.xlu1 %v5491_v20, %s8464_s30  ;;  %6680 = vrot.lane.b32.xlu0 %v8435_v10, %s8457_s23  ;;  %v11682_v10 = vcombine.low %v9262_v27, %v9268_v31 }
 0x35d   : > { %v4112_v15 = vpop.permute.xlu0 %4111  ;;  %v9756_v16 = vpop.permute.xlu1 %4851  ;;  %v4133_v25 = vsel %vm1272_vm7, %v11682_v10, %v4100_v43  ;;  %v11687_v10 = vmov 0.0  }
 0x35e   : > { %v4134_v57 = vsel %vm1274_vm8, %v4133_v25, %v4104_v18  ;;  %v1647_v18 = vcombine.high %v9225_v39, %v9357_v51  ;;  %v11685_v39 = vld [vmem:[#allocation14_spill] sm:$0xff]  ;;  %v11686_v51 = vld [vmem:[#allocation12_spill] sm:$0xff] }
 0x35f   : > { %5543 = vrot.lane.b32.xlu1 %v5492_v19, %s8465_s9  ;;  %6688 = vrot.lane.b32.xlu0 %v8436_v3, %s8457_s23  ;;  %v5357_v3 = vcombine.high %v5317_v9, %v5349_v49  ;;  %v4135_v53 = vsel %vm1276_vm9, %v4134_v57, %v4108_v46  ;;  %v1695_v9 = vcombine.high %v9509_v21, %v9487_v34  ;;  %v6633_v46 = vld [vmem:[#allocation2 + $0x22] sm:$0xff] }
 0x360   : > { %v4136_v63 = vsel %vm1278_vm10, %v4135_v53, %v4112_v15  ;;  %v1679_v15 = vcombine.high %v11684_v30, %v11683_v17  ;;  %v1293_v19 = vld [vmem:[%s11438_s4] sm:$0xff]  ;;  %v1727_v34 = vcombine.high %v9438_v42, %v9435_v23  ;;  %v1631_v21 = vcombine.high %v9217_v45, %v9317_v13  ;;  %v8441_v42 = vld [vmem:[#allocation2 + $0x52] sm:$0xff]  ;;  %v1294_v53 = vld [vmem:[%s11438_s4 + $0x8] sm:$0xff] }
 0x361   : > { %v4116_v0 = vpop.permute.xlu0 %4115  ;;  %v9760_v61 = vpop.permute.xlu1 %4855  ;;  %7743 = vmatmul.mubr.msk.f32.vlgmr.msra.gmra.mrb[16].mxu0 %vm332_vm0, %v1293_v19  ;;  %v1661_v25 = vrot.slane %v1647_v18, %v8858_v50  ;;  %v1759_v57 = vcombine.high %v9560_v38, %v9579_v22  ;;  %v1709_v23 = vrot.slane %v1695_v9, %v8975_v6  ;;  %v11688_v9 = vld [vmem:[#allocation74_spill] sm:$0xff]  ;;  %v11690_v19 = vld [vmem:[#allocation11_spill] sm:$0xff] }
 0x362   : > { %v4137_v20 = vsel %vm1280_vm11, %v4136_v63, %v4116_v0  ;;  %v1663_v0 = vcombine.high %v11686_v51, %v11685_v39  ;;  %1427 = vmatprep.mubr.f32.mxu0 %v11687_v10  ;;  %v1693_v45 = vrot.slane %v1679_v15, %v8858_v50  ;;  %v11691_v39 = vld [vmem:[#allocation9_spill] sm:$0xff] }
 0x363   : > { %5547 = vrot.lane.b32.xlu1 %v5493_v44, %s8466_s10  ;;  %6662 = vrot.lane.b32.xlu0 %v8439_v33, %s8457_s23  ;;  %v1815_v51 = vcombine.high %v11691_v39, %v11690_v19 }
 0x364   : > { %v1677_v13 = vrot.slane %v1663_v0, %v8858_v50  ;;  %v11692_v0 = vld [vmem:[#allocation10_spill] sm:$0xff] }
 0x365   : > { %v4120_v41 = vpop.permute.xlu0 %4119  ;;  %v9769_v40 = vpop.permute.xlu1 %4859  ;;  %7744 = vmatmul.mubr.msk.f32.gmra.mrb[18].mxu0 %vm332_vm0, %v1294_v53 }
 0x366   : > { %v4138_v27 = vsel %vm1282_vm12, %v4137_v20, %v4120_v41  ;;  %v1645_v41 = vrot.slane %v1631_v21, %v8858_v50  ;;  %1433 = vmatprep.mubr.f32.mxu0 %v11687_v10  ;;  %v1742_v18 = vcombine.low %v1677_v13, %v1693_v45 }
 0x367   : > { %5519 = vrot.lane.b32.xlu1 %v5357_v3, %s8466_s10  ;;  %6670 = vrot.lane.b32.xlu0 %v8440_v29, %s8457_s23  ;;  %v1741_v3 = vrot.slane %v1727_v34, %v8975_v6  ;;  %v11693_v34 = vld [vmem:[#allocation8_spill] sm:$0xff] }
 0x368   : > { %v1710_v20 = vcombine.low %v1645_v41, %v1661_v25  ;;  %v1799_v21 = vcombine.high %v11693_v34, %v11692_v0  ;;  %v1298_v34 = vld [vmem:[%s11438_s4 + $0x28] sm:$0xff] }
 0x369   : > { %v4124_v31 = vpop.permute.xlu0 %4123  ;;  %v9777_v43 = vpop.permute.xlu1 %4863  ;;  %v1761_v15 = vcombine.high %v1709_v23, %v1741_v3 }
 0x36a   : > { %v4139_v49 = vsel %vm1284_vm13, %v4138_v27, %v4124_v31  ;;  %v1760_v27 = vcombine.low %v1709_v23, %v1741_v3  ;;  %v1295_v31 = vld [vmem:[%s11438_s4 + $0x10] sm:$0xff]  ;;  %v1296_v23 = vld [vmem:[%s11438_s4 + $0x18] sm:$0xff]  ;;  %v1750_v3 = vrot.slane %v1742_v18, %v8975_v6 }
 0x36b   : > { %4205 = vmatprep.subr.mxu1 %v4139_v49  ;;  %6668 = vrot.lane.b32.xlu1 %v6633_v46, %s8457_s23  ;;  %v11689_v49 = vld [vmem:[#allocation68_spill] sm:$0xff] }
 0x36c   : > { %1931 = vrot.lane.b32.xlu0 %v1895_v24, %s8460_s24  ;;  %v1783_v46 = vcombine.high %v11689_v49, %v11688_v9  ;;  %v1831_v24 = vcombine.high %v9465_v47, %v9450_v62  ;;  %7745 = vmatmul.mubr.msk.f32.gmra.mrb[20].mxu0 %vm332_vm0, %v1295_v31  ;;  %v11694_v62 = vld [vmem:[#allocation71_spill] sm:$0xff]  ;;  %v11695_v47 = vld [vmem:[#allocation66_spill] sm:$0xff]  ;;  %v9863_v31 = vrot.slane %v1815_v51, %v8858_v50 }
 0x36d   : > { %v9800_v44 = vpop.permute.xlu0 %5936  ;;  %v9802_v33 = vpop.permute.xlu1 %4867  ;;  %1439 = vmatprep.mubr.f32.mxu0 %v11687_v10  ;;  %v9866_v9 = vrot.slane %v1799_v21, %v8858_v50  ;;  %v8442_v49 = vld [vmem:[#allocation2 + $0x1a] sm:$0xff] }
 0x36e   : > { %v9855_v53 = vrot.slane %v1783_v46, %v8858_v50 }
 0x36f   : > { %6676 = vrot.lane.b32.xlu1 %v8441_v42, %s8457_s23  ;;  %v1767_v42 = vcombine.high %v11695_v47, %v11694_v62 }
 0x370   : > { %1903 = vrot.lane.b32.xlu0 %v1759_v57, %s8460_s24  ;;  %v1863_v57 = vcombine.high %v9419_v8, %v9398_v35  ;;  %v1845_v35 = vrot.slane %v1831_v24, %v8975_v6  ;;  %7746 = vmatmul.mubr.msk.f32.gmra.mrb[22].mxu0 %vm332_vm0, %v1296_v23  ;;  %v11696_v23 = vcombine.low %v9468_v7, %v9484_v58  ;;  %v1299_v58 = vld [vmem:[%s11438_s4 + $0x30] sm:$0xff] }
 0x371   : > { %v9818_v63 = vpop.permute.xlu0 %5944  ;;  %v9820_v29 = vpop.permute.xlu1 %4071  ;;  %1445 = vmatprep.mubr.f32.mxu0 %v11687_v10  ;;  %v1781_v18 = vrot.slane %v1767_v42, %v8858_v50 }
 0x372   : > { %v1877_v46 = vrot.slane %v1863_v57, %v8975_v6 }
 0x373   : > { %6684 = vrot.lane.b32.xlu1 %v9713_v5, %s8457_s23  ;;  %v1718_v5 = vrot.slane %v1710_v20, %v8975_v6  ;;  %v1846_v24 = vcombine.low %v1781_v18, %v9855_v53 }
 0x374   : > { %1907 = vrot.lane.b32.xlu0 %v1760_v27, %s8461_s25  ;;  %v1711_v27 = vcombine.high %v1645_v41, %v1661_v25  ;;  %v1297_v25 = vld [vmem:[%s11438_s4 + $0x20] sm:$0xff]  ;;  %v1743_v41 = vcombine.high %v1677_v13, %v1693_v45  ;;  %v1896_v39 = vcombine.low %v1845_v35, %v1877_v46  ;;  %v1878_v45 = vcombine.low %v9866_v9, %v9863_v31 }
 0x375   : > { %v9834_v17 = vpop.permute.xlu0 %2326  ;;  %v4076_v30 = vpop.permute.xlu1 %4075  ;;  %7747 = vmatmul.mubr.msk.f32.gmra.mrb[24].mxu0 %vm332_vm0, %v1297_v25  ;;  %v1763_v51 = vcombine.high %v1718_v5, %v1750_v3  ;;  %v1897_v57 = vcombine.high %v1845_v35, %v1877_v46  ;;  %v1854_v62 = vrot.slane %v1846_v24, %v8975_v6  ;;  %v1847_v35 = vcombine.high %v1781_v18, %v9855_v53 }
 0x376   : > { %v1725_v0 = vrot.slane %v1711_v27, %v8975_v6  ;;  %1451 = vmatprep.mubr.f32.mxu0 %v11687_v10  ;;  %v1757_v13 = vrot.slane %v1743_v41, %v8975_v6  ;;  %v1886_v42 = vrot.slane %v1878_v45, %v8975_v6  ;;  %v11697_v27 = vld [vmem:[#allocation72_spill] sm:$0xff] }
 0x377   : > { %6692 = vrot.lane.b32.xlu1 %v9715_v4, %s8457_s23  ;;  %v1762_v4 = vcombine.low %v1718_v5, %v1750_v3  ;;  %v4126_v3 = vsel %vm1272_vm7, %v11696_v23, %v9820_v29  ;;  %v8444_v23 = vld [vmem:[#allocation2 + $0x92] sm:$0xff] }
 0x378   : > { %1911 = vrot.lane.b32.xlu0 %v1761_v15, %s8462_s26  ;;  %v1764_v47 = vcombine.low %v1725_v0, %v1757_v13  ;;  %v4127_v25 = vsel %vm1274_vm8, %v4126_v3, %v4076_v30  ;;  %v1765_v53 = vcombine.high %v1725_v0, %v1757_v13  ;;  %v1899_v0 = vcombine.high %v1854_v62, %v1886_v42  ;;  %v7855_v13 = vld [vmem:[%s11438_s4 + $0x200] sm:$0xff]  ;;  %v1302_v3 = vld [vmem:[%s11438_s4 + $0x48] sm:$0xff] }
 0x379   : > { %v9857_v20 = vpop.permute.xlu0 %2334  ;;  %v4080_v8 = vpop.permute.xlu1 %4079  ;;  %7748 = vmatmul.mubr.msk.f32.gmra.mrb[26].mxu0 %vm332_vm0, %v1298_v34  ;;  %v1861_v34 = vrot.slane %v1847_v35, %v8975_v6 }
 0x37a   : > { %1457 = vmatprep.mubr.f32.mxu0 %v11687_v10  ;;  %v4128_v29 = vsel %vm1276_vm9, %v4127_v25, %v4080_v8  ;;  %v11700_v25 = vld [vmem:[#allocation65_spill] sm:$0xff] }
 0x37b   : > { %6666 = vrot.lane.b32.xlu1 %v8442_v49, %s8457_s23 }
 0x37c   : > { %1915 = vrot.lane.b32.xlu0 %v1762_v4, %s8463_s29  ;;  %v11698_v4 = vld [vmem:[#allocation73_spill] sm:$0xff] }
 0x37d   : > { %v9876_v15 = vpop.permute.xlu0 %2342  ;;  %v4084_v19 = vpop.permute.xlu1 %4083  ;;  %v11699_v49 = vcombine.low %v11697_v27, %v11698_v4  ;;  %7749 = vmatmul.mubr.msk.f32.gmra.mrb[28].mxu0 %vm332_vm0, %v1299_v58  ;;  %v1303_v58 = vld [vmem:[%s11438_s4 + $0x50] sm:$0xff] }
 0x37e   : > { %v4129_v18 = vsel %vm1278_vm10, %v4128_v29, %v4084_v19  ;;  %1463 = vmatprep.mubr.f32.mxu0 %v11687_v10  ;;  %v11702_v29 = vld [vmem:[#allocation63_spill] sm:$0xff] }
 0x37f   : > { %1935 = vrot.lane.b32.xlu1 %v1896_v39, %s8461_s25  ;;  %v4877_v46 = vsel %vm1272_vm7, %v11699_v49, %v9743_v32  ;;  %v1898_v39 = vcombine.low %v1854_v62, %v1886_v42  ;;  %v1879_v32 = vcombine.high %v9866_v9, %v9863_v31  ;;  %v2639_v49 = vcombine.high %v9563_v11, %v9582_v52  ;;  %v11714_v11 = vld [vmem:[#allocation67_spill] sm:$0xff] }
 0x380   : > { %1919 = vrot.lane.b32.xlu0 %v1763_v51, %s8464_s30  ;;  %v4878_v7 = vsel %vm1274_vm8, %v4877_v46, %v9747_v1  ;;  %v1300_v1 = vld [vmem:[%s11438_s4 + $0x38] sm:$0xff]  ;;  %v7857_v46 = vld [vmem:[%s11438_s4 + $0x210] sm:$0xff] }
 0x381   : > { %v9889_v21 = vpop.permute.xlu0 %2350  ;;  %v4088_v5 = vpop.permute.xlu1 %4087  ;;  %v4879_v30 = vsel %vm1276_vm9, %v4878_v7, %v9756_v16  ;;  %7750 = vmatmul.mubr.msk.f32.gmra.mrb[30].mxu0 %vm332_vm0, %v1300_v1  ;;  %v11701_v7 = vld [vmem:[#allocation70_spill] sm:$0xff]  ;;  %v7858_v1 = vld [vmem:[%s11438_s4 + $0x218] sm:$0xff] }
 0x382   : > { %v4880_v8 = vsel %vm1278_vm10, %v4879_v30, %v9760_v61  ;;  %v4130_v51 = vsel %vm1280_vm11, %v4129_v18, %v4088_v5  ;;  %v1893_v5 = vrot.slane %v1879_v32, %v8975_v6  ;;  %1469 = vmatprep.mubr.f32.mxu0 %v11687_v10 }
 0x383   : > { %1939 = vrot.lane.b32.xlu1 %v1897_v57, %s8462_s26  ;;  %v4881_v16 = vsel %vm1280_vm11, %v4880_v8, %v9769_v40  ;;  %v8443_v57 = vld [vmem:[#allocation2 + $0x62] sm:$0xff] }
 0x384   : > { %1923 = vrot.lane.b32.xlu0 %v1764_v47, %s8465_s9  ;;  %v4882_v45 = vsel %vm1282_vm12, %v4881_v16, %v9777_v43  ;;  %v1301_v43 = vld [vmem:[%s11438_s4 + $0x40] sm:$0xff]  ;;  %v1900_v42 = vcombine.low %v1861_v34, %v1893_v5  ;;  %v1901_v4 = vcombine.high %v1861_v34, %v1893_v5 }
 0x385   : > { %v9909_v41 = vpop.permute.xlu0 %5918  ;;  %v4092_v24 = vpop.permute.xlu1 %4091  ;;  %v4883_v40 = vsel %vm1284_vm13, %v4882_v45, %v9802_v33  ;;  %v7856_v33 = vld [vmem:[%s11438_s4 + $0x208] sm:$0xff]  ;;  %7751 = vmatmul.mubr.msk.f32.gmra.mrb[32].mxu0 %vm332_vm0, %v1301_v43 }
 0x386   : > { %v4131_v31 = vsel %vm1282_vm12, %v4130_v51, %v4092_v24  ;;  %1475 = vmatprep.mubr.f32.mxu0 %v11687_v10  ;;  %v8445_v51 = vld [vmem:[#allocation2 + $0x4a] sm:$0xff] }
 0x387   : > { %1943 = vrot.lane.b32.xlu1 %v1898_v39, %s8463_s29  ;;  %v6134_v39 = vcombine.low %v9800_v44, %v9818_v63 }
 0x388   : > { %1927 = vrot.lane.b32.xlu0 %v1765_v53, %s8466_s10  ;;  %v6102_v53 = vcombine.low %v11702_v29, %v11701_v7 }
 0x389   : > { %v9935_v9 = vpop.permute.xlu0 %5926  ;;  %v4096_v19 = vpop.permute.xlu1 %4095  ;;  %7752 = vmatmul.mubr.msk.f32.gmra.mrb[34].mxu0 %vm332_vm0, %v1302_v3  ;;  %v6142_v16 = vrot.slane %v6134_v39, %v8858_v50  ;;  %v6135_v3 = vcombine.high %v9800_v44, %v9818_v63 }
 0x38a   : > { %v4132_v61 = vsel %vm1284_vm13, %v4131_v31, %v4096_v19  ;;  %1481 = vmatprep.mubr.f32.mxu0 %v11687_v10  ;;  %v1304_v19 = vld [vmem:[%s11438_s4 + $0x58] sm:$0xff] }
 0x38b   : > { %1947 = vrot.lane.b32.xlu1 %v1899_v0, %s8464_s30  ;;  %4206 = vmatpush1.msra.mxu1 %v4132_v61  ;;  %v6110_v0 = vrot.slane %v6102_v53, %v8858_v50  ;;  %v6149_v53 = vrot.slane %v6135_v3, %v8858_v50 }
 0x38c   : > { %6678 = vrot.lane.b32.xlu0 %v8443_v57, %s8457_s23  ;;  %4949 = vmatprep.subr.mxu1 %v4883_v40 }
 0x38d   : > { %v9953_v62 = vpop.permute.xlu0 %5934  ;;  %v9955_v47 = vpop.permute.xlu1 %5932  ;;  %7871 = vmatmul.mubr.msk.f32.vlgmr.msra.gmra.mrb[0].mxu1 %vm332_vm0, %v7855_v13  ;;  %7753 = vmatmul.mubr.msk.f32.gmra.mrb[36].mxu0 %vm332_vm0, %v1303_v58  ;;  %v7859_v13 = vld [vmem:[%s11438_s4 + $0x220] sm:$0xff]  ;;  %v1306_v58 = vld [vmem:[%s11438_s4 + $0x68] sm:$0xff] }
 0x38e   : > { %4275 = vmatprep.mubr.f32.mxu1 %v11687_v10  ;;  %v6118_v24 = vcombine.low %v11700_v25, %v9955_v47  ;;  %1487 = vmatprep.mubr.f32.mxu0 %v11687_v10 }
 0x38f   : > { %1951 = vrot.lane.b32.xlu1 %v1900_v42, %s8465_s9 }
 0x390   : > { %6686 = vrot.lane.b32.xlu0 %v8444_v23, %s8457_s23  ;;  %v6126_v8 = vrot.slane %v6118_v24, %v8858_v50  ;;  %v1305_v23 = vld [vmem:[%s11438_s4 + $0x60] sm:$0xff] }
 0x391   : > { %v9970_v35 = vpop.permute.xlu0 %5942  ;;  %v5941_v27 = vpop.permute.xlu1 %5940  ;;  %7872 = vmatmul.mubr.msk.f32.gmra.mrb[2].mxu1 %vm332_vm0, %v7856_v33  ;;  %7754 = vmatmul.mubr.msk.f32.gmra.mrb[38].mxu0 %vm332_vm0, %v1304_v19 }
 0x392   : > { %4281 = vmatprep.mubr.f32.mxu1 %v11687_v10  ;;  %v6166_v40 = vcombine.low %v6110_v0, %v6126_v8  ;;  %1493 = vmatprep.mubr.f32.mxu0 %v11687_v10 }
 0x393   : > { %1955 = vrot.lane.b32.xlu1 %v1901_v4, %s8466_s10  ;;  %v6167_v4 = vcombine.high %v6110_v0, %v6126_v8 }
 0x394   : > { %2675 = vrot.lane.b32.xlu0 %v2639_v49, %s8460_s24  ;;  %v10044_v49 = vrot.slane %v6166_v40, %v8975_v6 }
 0x395   : > { %v9991_v32 = vpop.permute.xlu0 %5495  ;;  %v5949_v30 = vpop.permute.xlu1 %5948  ;;  %7873 = vmatmul.mubr.msk.f32.gmra.mrb[4].mxu1 %vm332_vm0, %v7857_v46  ;;  %v6103_v46 = vcombine.high %v11702_v29, %v11701_v7  ;;  %7755 = vmatmul.mubr.msk.f32.gmra.mrb[40].mxu0 %vm332_vm0, %v1305_v23  ;;  %v2374_v7 = vcombine.low %v9834_v17, %v9857_v20  ;;  %v7861_v29 = vld [vmem:[%s11438_s4 + $0x230] sm:$0xff] }
 0x396   : > { %v6150_v18 = vcombine.low %v5941_v27, %v5949_v30  ;;  %4287 = vmatprep.mubr.f32.mxu1 %v11687_v10  ;;  %v6151_v5 = vcombine.high %v5941_v27, %v5949_v30  ;;  %v6119_v27 = vcombine.high %v11700_v25, %v9955_v47  ;;  %11704 = vst [vmem:[#allocation22_spill] sm:$0xff] %v10044_v49 }
 0x397   : > { %6674 = vrot.lane.b32.xlu1 %v8445_v51, %s8457_s23  ;;  %1499 = vmatprep.mubr.f32.mxu0 %v11687_v10  ;;  %v6117_v51 = vrot.slane %v6103_v46, %v8858_v50 }
 0x398   : > { %v6158_v31 = vrot.slane %v6150_v18, %v8858_v50  ;;  %v10049_v24 = vrot.slane %v6151_v5, %v8858_v50  ;;  %v10076_v30 = vrot.slane %v6119_v27, %v8858_v50  ;;  %v6181_v18 = vrot.slane %v6167_v4, %v8975_v6  ;;  %v7862_v5 = vld [vmem:[%s11438_s4 + $0x238] sm:$0xff] }
 0x399   : > { %v10009_v34 = vpop.permute.xlu0 %5499  ;;  %v10011_v45 = vpop.permute.xlu1 %2330  ;;  %7874 = vmatmul.mubr.msk.f32.gmra.mrb[6].mxu1 %vm332_vm0, %v7858_v1  ;;  %v2406_v1 = vcombine.low %v9876_v15, %v9889_v21  ;;  %7756 = vmatmul.mubr.msk.f32.gmra.mrb[42].mxu0 %vm332_vm0, %v1306_v58 }
 0x39a   : > { %v6198_v61 = vcombine.low %v6142_v16, %v6158_v31  ;;  %4293 = vmatprep.mubr.f32.mxu1 %v11687_v10  ;;  %v6199_v43 = vcombine.high %v6142_v16, %v6158_v31  ;;  %v6214_v16 = vcombine.low %v6149_v53, %v10049_v24  ;;  %1505 = vmatprep.mubr.f32.mxu0 %v11687_v10 }
 0x39b   : > { %6682 = vrot.lane.b32.xlu1 %v9698_v37, %s8457_s23  ;;  %v7860_v37 = vld [vmem:[%s11438_s4 + $0x228] sm:$0xff]  ;;  %v10109_v23 = vrot.slane %v2406_v1, %v8858_v50  ;;  %v6215_v1 = vcombine.high %v6149_v53, %v10049_v24  ;;  %v6183_v24 = vcombine.high %v6117_v51, %v10076_v30 }
 0x39c   : > { %v10027_v33 = vrot.slane %v6198_v61, %v8975_v6  ;;  %v6213_v47 = vrot.slane %v6199_v43, %v8975_v6  ;;  %v1307_v61 = vld [vmem:[%s11438_s4 + $0x70] sm:$0xff]  ;;  %v6182_v43 = vcombine.low %v6117_v51, %v10076_v30  ;;  %v5966_v30 = vcombine.low %v9909_v41, %v9935_v9 }
 0x39d   : > { %v10022_v57 = vpop.permute.xlu0 %5503  ;;  %v10024_v42 = vpop.permute.xlu1 %2338  ;;  %7875 = vmatmul.mubr.msk.f32.gmra.mrb[8].mxu1 %vm332_vm0, %v7859_v13  ;;  %v10098_v13 = vrot.slane %v2374_v7, %v8858_v50  ;;  %7757 = vmatmul.mubr.msk.f32.gmra.mrb[44].mxu0 %vm332_vm0, %v1307_v61  ;;  %v7863_v7 = vld [vmem:[%s11438_s4 + $0x240] sm:$0xff]  ;;  %v7865_v51 = vld [vmem:[%s11438_s4 + $0x250] sm:$0xff] }
 0x39e   : > { %11703 = vst [vmem:[#allocation76_spill] sm:$0xff] %v10027_v33  ;;  %4299 = vmatprep.mubr.f32.mxu1 %v11687_v10  ;;  %v2390_v39 = vcombine.low %v10011_v45, %v10024_v42  ;;  %v6232_v0 = vcombine.low %v6181_v18, %v6213_v47  ;;  %v6233_v46 = vcombine.high %v6181_v18, %v6213_v47 }
 0x39f   : > { %6690 = vrot.lane.b32.xlu1 %v9707_v26, %s8457_s23  ;;  %v6231_v26 = vcombine.high %v10044_v49, %v10027_v33  ;;  %1511 = vmatprep.mubr.f32.mxu0 %v11687_v10  ;;  %v6190_v47 = vrot.slane %v6182_v43, %v8975_v6 }
 0x3a0   : > { %v10083_v8 = vrot.slane %v2390_v39, %v8858_v50  ;;  %v6222_v39 = vrot.slane %v6214_v16, %v8975_v6 }
 0x3a1   : > { %v10054_v44 = vpop.permute.xlu0 %4815  ;;  %v10056_v63 = vpop.permute.xlu1 %2346  ;;  %7876 = vmatmul.mubr.msk.f32.gmra.mrb[10].mxu1 %vm332_vm0, %v7860_v37 }
 0x3a2   : > { %4305 = vmatprep.mubr.f32.mxu1 %v11687_v10  ;;  %v2438_v37 = vcombine.low %v10098_v13, %v10083_v8  ;;  %v6234_v61 = vcombine.low %v6190_v47, %v6222_v39 }
 0x3a3   : > { %6267 = vrot.lane.b32.xlu1 %v6231_v26, %s8460_s24  ;;  %v1308_v26 = vld [vmem:[%s11438_s4 + $0x78] sm:$0xff] }
 0x3a4   : > { %7758 = vmatmul.mubr.msk.f32.gmra.mrb[46].mxu0 %vm332_vm0, %v1308_v26  ;;  %v6229_v26 = vrot.slane %v6215_v1, %v8975_v6  ;;  %v11707_v1 = vld [vmem:[#allocation77_spill] sm:$0xff] }
 0x3a5   : > { %v10088_v31 = vpop.permute.xlu0 %4819  ;;  %v10090_v19 = vpop.permute.xlu1 %2354  ;;  %7877 = vmatmul.mubr.msk.f32.gmra.mrb[12].mxu1 %vm332_vm0, %v7861_v29  ;;  %v10136_v29 = vrot.slane %v2438_v37, %v8975_v6  ;;  %2101 = vmatprep.mubr.f32.mxu0 %v11687_v10 }
 0x3a6   : > { %v2422_v40 = vcombine.low %v10056_v63, %v10090_v19  ;;  %4311 = vmatprep.mubr.f32.mxu1 %v11687_v10 }
 0x3a7   : > { %6271 = vrot.lane.b32.xlu1 %v6232_v0, %s8461_s25  ;;  %11705 = vst [vmem:[#allocation20_spill] sm:$0xff] %v10136_v29 }
 0x3a8   : > { %v10114_v3 = vrot.slane %v2422_v40, %v8858_v50 }
 0x3a9   : > { %v10117_v27 = vpop.permute.xlu0 %4823  ;;  %v10119_v4 = vpop.permute.xlu1 %5922  ;;  %7878 = vmatmul.mubr.msk.f32.gmra.mrb[14].mxu1 %vm332_vm0, %v7862_v5  ;;  %v7864_v5 = vld [vmem:[%s11438_s4 + $0x248] sm:$0xff] }
 0x3aa   : > { %v2470_v58 = vcombine.low %v10109_v23, %v10114_v3  ;;  %4317 = vmatprep.mubr.f32.mxu1 %v11687_v10 }
 0x3ab   : > { %6275 = vrot.lane.b32.xlu1 %v6233_v46, %s8462_s26  ;;  %v6235_v46 = vcombine.high %v6190_v47, %v6222_v39  ;;  %v6197_v39 = vrot.slane %v6183_v24, %v8975_v6  ;;  %v10191_v24 = vrot.slane %v5966_v30, %v8858_v50  ;;  %v11713_v30 = vld [vmem:[#allocation75_spill] sm:$0xff] }
 0x3ac   : > { %v10139_v18 = vrot.slane %v2470_v58, %v8975_v6  ;;  %v2511_v33 = vcombine.high %v11714_v11, %v11713_v30  ;;  %v2471_v11 = vcombine.high %v10109_v23, %v10114_v3  ;;  %v2439_v23 = vcombine.high %v10098_v13, %v10083_v8 }
 0x3ad   : > { %v10143_v16 = vpop.permute.xlu0 %4827  ;;  %v10145_v0 = vpop.permute.xlu1 %5930  ;;  %7879 = vmatmul.mubr.msk.f32.gmra.mrb[16].mxu1 %vm332_vm0, %v7863_v7  ;;  %v5998_v7 = vcombine.low %v9953_v62, %v9970_v35 }
 0x3ae   : > { %11706 = vst [vmem:[#allocation38_spill] sm:$0xff] %v10139_v18  ;;  %v2503_v40 = vcombine.high %v10136_v29, %v10139_v18  ;;  %4323 = vmatprep.mubr.f32.mxu1 %v11687_v10  ;;  %v5982_v53 = vcombine.low %v10119_v4, %v10145_v0  ;;  %v6236_v18 = vcombine.low %v6197_v39, %v6229_v26  ;;  %v11712_v29 = vld [vmem:[#allocation16_spill] sm:$0xff] }
 0x3af   : > { %6279 = vrot.lane.b32.xlu1 %v6234_v61, %s8463_s29  ;;  %v11708_v61 = vld [vmem:[#allocation69_spill] sm:$0xff]  ;;  %v6006_v49 = vrot.slane %v5998_v7, %v8858_v50  ;;  %v7867_v7 = vld [vmem:[%s11438_s4 + $0x260] sm:$0xff]  ;;  %v10253_v8 = vrot.slane %v2471_v11, %v8975_v6 }
 0x3b0   : > { %2647 = vrot.lane.b32.xlu0 %v2503_v40, %s8460_s24  ;;  %v10179_v47 = vrot.slane %v5982_v53, %v8858_v50  ;;  %v2527_v40 = vcombine.high %v11708_v61, %v11707_v1  ;;  %v11711_v61 = vld [vmem:[#allocation18_spill] sm:$0xff] }
 0x3b1   : > { %v10160_v43 = vpop.permute.xlu0 %4831  ;;  %v10162_v37 = vpop.permute.xlu1 %5938  ;;  %7880 = vmatmul.mubr.msk.f32.gmra.mrb[18].mxu1 %vm332_vm0, %v7864_v5  ;;  %v2575_v5 = vcombine.high %v9512_v12, %v9490_v48  ;;  %v11709_v48 = vld [vmem:[#allocation19_spill] sm:$0xff]  ;;  %v11710_v12 = vld [vmem:[#allocation17_spill] sm:$0xff]  ;;  %v2543_v52 = vcombine.high %v11712_v29, %v11711_v61 }
 0x3b2   : > { %4329 = vmatprep.mubr.f32.mxu1 %v11687_v10  ;;  %v2559_v1 = vcombine.high %v11710_v12, %v11709_v48  ;;  %v6030_v22 = vcombine.low %v10191_v24, %v10179_v47  ;;  %v10213_v48 = vrot.slane %v2527_v40, %v8858_v50 }
 0x3b3   : > { %6283 = vrot.lane.b32.xlu1 %v6235_v46, %s8464_s30  ;;  %v7866_v46 = vld [vmem:[%s11438_s4 + $0x258] sm:$0xff] }
 0x3b4   : > { %v10228_v40 = vrot.slane %v2559_v1, %v8858_v50  ;;  %v10239_v3 = vrot.slane %v6030_v22, %v8975_v6  ;;  %v7868_v22 = vld [vmem:[%s11438_s4 + $0x268] sm:$0xff] }
 0x3b5   : > { %v10185_v58 = vpop.permute.xlu0 %4835  ;;  %v10187_v25 = vpop.permute.xlu1 %5946  ;;  %7881 = vmatmul.mubr.msk.f32.gmra.mrb[20].mxu1 %vm332_vm0, %v7865_v51  ;;  %v2607_v51 = vcombine.high %v9502_v55, %v9499_v54  ;;  %v6237_v54 = vcombine.high %v6197_v39, %v6229_v26  ;;  %v2589_v55 = vrot.slane %v2575_v5, %v8975_v6  ;;  %v2525_v26 = vrot.slane %v2511_v33, %v8858_v50 }
 0x3b6   : > { %v6014_v53 = vcombine.low %v10162_v37, %v10187_v25  ;;  %4335 = vmatprep.mubr.f32.mxu1 %v11687_v10 }
 0x3b7   : > { %6287 = vrot.lane.b32.xlu1 %v6236_v18, %s8465_s9  ;;  %v2621_v39 = vrot.slane %v2607_v51, %v8975_v6 }
 0x3b8   : > { %v6022_v38 = vrot.slane %v6014_v53, %v8858_v50  ;;  %v10231_v53 = vrot.slane %v2543_v52, %v8858_v50 }
 0x3b9   : > { %v10215_v12 = vpop.permute.xlu0 %5507  ;;  %v10217_v29 = vpop.permute.xlu1 %5523  ;;  %7882 = vmatmul.mubr.msk.f32.gmra.mrb[22].mxu1 %vm332_vm0, %v7866_v46  ;;  %v2590_v46 = vcombine.low %v2525_v26, %v10213_v48  ;;  %v2640_v33 = vcombine.low %v2589_v55, %v2621_v39 }
 0x3ba   : > { %v6062_v18 = vcombine.low %v6006_v49, %v6022_v38  ;;  %4341 = vmatprep.mubr.f32.mxu1 %v11687_v10  ;;  %v6063_v61 = vcombine.high %v6006_v49, %v6022_v38  ;;  %v2622_v13 = vcombine.low %v10231_v53, %v10228_v40  ;;  %v6031_v38 = vcombine.high %v10191_v24, %v10179_v47 }
 0x3bb   : > { %6291 = vrot.lane.b32.xlu1 %v6237_v54, %s8466_s10  ;;  %v2453_v49 = vrot.slane %v2439_v23, %v8975_v6  ;;  %v7869_v23 = vld [vmem:[%s11438_s4 + $0x270] sm:$0xff] }
 0x3bc   : > { %v10242_v5 = vrot.slane %v6062_v18, %v8975_v6  ;;  %v2641_v18 = vcombine.high %v2589_v55, %v2621_v39  ;;  %v10278_v24 = vrot.slane %v6063_v61, %v8975_v6  ;;  %v2591_v55 = vcombine.high %v2525_v26, %v10213_v48 }
 0x3bd   : > { %v10245_v1 = vpop.permute.xlu0 %5511  ;;  %v10247_v52 = vpop.permute.xlu1 %5527  ;;  %7883 = vmatmul.mubr.msk.f32.gmra.mrb[24].mxu1 %vm332_vm0, %v7867_v7  ;;  %v2598_v7 = vrot.slane %v2590_v46, %v8975_v6  ;;  %v2504_v47 = vcombine.low %v2453_v49, %v10253_v8  ;;  %v2630_v39 = vrot.slane %v2622_v13, %v8975_v6  ;;  %v11715_v46 = vcombine.low %v9521_v28, %v9538_v56 }
 0x3be   : > { %v6095_v51 = vcombine.high %v10239_v3, %v10242_v5  ;;  %4347 = vmatprep.mubr.f32.mxu1 %v11687_v10  ;;  %v6094_v30 = vcombine.low %v10239_v3, %v10242_v5  ;;  %v6045_v48 = vrot.slane %v6031_v38, %v8975_v6  ;;  %v2375_v28 = vcombine.high %v9834_v17, %v9857_v20 }
 0x3bf   : > { %2679 = vrot.lane.b32.xlu1 %v2640_v33, %s8461_s25  ;;  %v2423_v33 = vcombine.high %v10056_v63, %v10090_v19  ;;  %v2407_v63 = vcombine.high %v9876_v15, %v9889_v21  ;;  %v2391_v19 = vcombine.high %v10011_v45, %v10024_v42  ;;  %v4870_v61 = vsel %vm1272_vm7, %v11715_v46, %v10054_v44 }
 0x3c0   : > { %6239 = vrot.lane.b32.xlu0 %v6095_v51, %s8460_s24  ;;  %v4871_v26 = vsel %vm1274_vm8, %v4870_v61, %v10088_v31  ;;  %v6015_v51 = vcombine.high %v10162_v37, %v10187_v25  ;;  %v2642_v45 = vcombine.low %v2598_v7, %v2630_v39  ;;  %v6096_v44 = vcombine.low %v6045_v48, %v10278_v24  ;;  %v7870_v25 = vld [vmem:[%s11438_s4 + $0x278] sm:$0xff]  ;;  %v7888_v61 = vld [vmem:[%s11438_s4 + $0x288] sm:$0xff] }
 0x3c1   : > { %v10268_v54 = vpop.permute.xlu0 %5515  ;;  %v10270_v11 = vpop.permute.xlu1 %5531  ;;  %7884 = vmatmul.mubr.msk.f32.gmra.mrb[26].mxu1 %vm332_vm0, %v7868_v22  ;;  %v10310_v56 = vrot.slane %v2423_v33, %v8858_v50  ;;  %v4872_v42 = vsel %vm1276_vm9, %v4871_v26, %v10117_v27  ;;  %v2623_v31 = vcombine.high %v10231_v53, %v10228_v40  ;;  %v5999_v17 = vcombine.high %v9953_v62, %v9970_v35 }
 0x3c2   : > { %4353 = vmatprep.mubr.f32.mxu1 %v11687_v10  ;;  %v4873_v20 = vsel %vm1278_vm10, %v4872_v42, %v10143_v16  ;;  %v5983_v27 = vcombine.high %v10119_v4, %v10145_v0  ;;  %v10329_v37 = vrot.slane %v2407_v63, %v8858_v50  ;;  %v10332_v22 = vrot.slane %v2391_v19, %v8858_v50 }
 0x3c3   : > { %2683 = vrot.lane.b32.xlu1 %v2641_v18, %s8462_s26  ;;  %v4874_v40 = vsel %vm1280_vm11, %v4873_v20, %v10160_v43  ;;  %v2605_v62 = vrot.slane %v2591_v55, %v8975_v6  ;;  %v5967_v35 = vcombine.high %v9909_v41, %v9935_v9  ;;  %v6029_v16 = vrot.slane %v6015_v51, %v8858_v50  ;;  %v7887_v9 = vld [vmem:[%s11438_s4 + $0x280] sm:$0xff] }
 0x3c4   : > { %2651 = vrot.lane.b32.xlu0 %v2504_v47, %s8461_s25  ;;  %v4875_v4 = vsel %vm1282_vm12, %v4874_v40, %v10185_v58  ;;  %v2643_v13 = vcombine.high %v2598_v7, %v2630_v39  ;;  %v10347_v43 = vrot.slane %v2375_v28, %v8858_v50  ;;  %v2486_v38 = vcombine.low %v10329_v37, %v10310_v56 }
 0x3c5   : > { %v10302_v15 = vpop.permute.xlu0 %6664  ;;  %v10304_v21 = vpop.permute.xlu1 %5535  ;;  %7885 = vmatmul.mubr.msk.f32.gmra.mrb[28].mxu1 %vm332_vm0, %v7869_v23  ;;  %v2505_v41 = vcombine.high %v2453_v49, %v10253_v8  ;;  %v6013_v58 = vrot.slane %v5999_v17, %v8858_v50  ;;  %v5997_v7 = vrot.slane %v5983_v27, %v8858_v50  ;;  %v2637_v33 = vrot.slane %v2623_v31, %v8975_v6  ;;  %v11717_v27 = vld [vmem:[#allocation50_spill] sm:$0xff] }
 0x3c6   : > { %4359 = vmatprep.mubr.f32.mxu1 %v11687_v10  ;;  %v2454_v47 = vcombine.low %v10347_v43, %v10332_v22  ;;  %v5981_v8 = vrot.slane %v5967_v35, %v8858_v50  ;;  %v6097_v19 = vcombine.high %v6045_v48, %v10278_v24  ;;  %v2494_v46 = vrot.slane %v2486_v38, %v8975_v6 }
 0x3c7   : > { %2687 = vrot.lane.b32.xlu1 %v2642_v45, %s8463_s29  ;;  %v6079_v49 = vcombine.high %v6013_v58, %v6029_v16  ;;  %v2644_v39 = vcombine.low %v2605_v62, %v2637_v33  ;;  %v6078_v63 = vcombine.low %v6013_v58, %v6029_v16  ;;  %v11716_v45 = vcombine.low %v11674_v59, %v11673_v36 }
 0x3c8   : > { %6243 = vrot.lane.b32.xlu0 %v6096_v44, %s8461_s25  ;;  %v6047_v26 = vcombine.high %v5981_v8, %v5997_v7  ;;  %v6046_v51 = vcombine.low %v5981_v8, %v5997_v7  ;;  %v2462_v24 = vrot.slane %v2454_v47, %v8975_v6  ;;  %v2487_v7 = vcombine.high %v10329_v37, %v10310_v56 }
 0x3c9   : > { %v10343_v0 = vpop.permute.xlu0 %6672  ;;  %v4840_v53 = vpop.permute.xlu1 %4839  ;;  %7886 = vmatmul.mubr.msk.f32.gmra.mrb[30].mxu1 %vm332_vm0, %v7870_v25  ;;  %v5557_v28 = vsel %vm1272_vm7, %v11716_v45, %v10217_v29  ;;  %v2645_v25 = vcombine.high %v2605_v62, %v2637_v33  ;;  %v10387_v31 = vrot.slane %v6079_v49, %v8975_v6  ;;  %v6086_v29 = vrot.slane %v6078_v63, %v8975_v6  ;;  %v7892_v49 = vld [vmem:[%s11438_s4 + $0x2a8] sm:$0xff]  ;;  %v7893_v63 = vld [vmem:[%s11438_s4 + $0x2b0] sm:$0xff]  ;;  %v7894_v45 = vld [vmem:[%s11438_s4 + $0x2b8] sm:$0xff] }
 0x3ca   : > { %v4876_v18 = vsel %vm1284_vm13, %v4875_v4, %v4840_v53  ;;  %5013 = vmatprep.mubr.f32.mxu1 %v11687_v10  ;;  %v5558_v48 = vsel %vm1274_vm8, %v5557_v28, %v10247_v52  ;;  %v2506_v59 = vcombine.low %v2462_v24, %v2494_v46  ;;  %v7889_v52 = vld [vmem:[%s11438_s4 + $0x290] sm:$0xff]  ;;  %v6061_v20 = vrot.slane %v6047_v26, %v8975_v6 }
 0x3cb   : > { %2691 = vrot.lane.b32.xlu1 %v2643_v13, %s8464_s30  ;;  %4950 = vmatpush1.msra.mxu1 %v4876_v18  ;;  %v5559_v36 = vsel %vm1276_vm9, %v5558_v48, %v10270_v11  ;;  %v11718_v11 = vcombine.low %v11658_v2, %v11717_v27  ;;  %v6054_v35 = vrot.slane %v6046_v51, %v8975_v6  ;;  %v11719_v27 = vld [vmem:[#allocation49_spill] sm:$0xff] }
 0x3cc   : > { %2655 = vrot.lane.b32.xlu0 %v2505_v41, %s8462_s26  ;;  %v5560_v17 = vsel %vm1278_vm10, %v5559_v36, %v10304_v21  ;;  %v6101_v13 = vcombine.high %v6061_v20, %v10387_v31  ;;  %v2507_v33 = vcombine.high %v2462_v24, %v2494_v46  ;;  %v2501_v8 = vrot.slane %v2487_v7, %v8975_v6  ;;  %v11728_v7 = vld [vmem:[#allocation51_spill] sm:$0xff] }
 0x3cd   : > { %v10365_v23 = vpop.permute.xlu0 %6680  ;;  %v5540_v55 = vpop.permute.xlu1 %5539  ;;  %7903 = vmatmul.mubr.msk.f32.vlgmr.msra.gmra.mrb[0].mxu1 %vm332_vm0, %v7887_v9  ;;  %v5550_v40 = vsel %vm1272_vm7, %v11718_v11, %v9991_v32  ;;  %v6098_v38 = vcombine.low %v6054_v35, %v6086_v29  ;;  %v6099_v37 = vcombine.high %v6054_v35, %v6086_v29  ;;  %v6100_v51 = vcombine.low %v6061_v20, %v10387_v31  ;;  %v11720_v11 = vld [vmem:[#allocation54_spill] sm:$0xff] }
 0x3ce   : > { %5019 = vmatprep.mubr.f32.mxu1 %v11687_v10  ;;  %v5561_v62 = vsel %vm1280_vm11, %v5560_v17, %v5540_v55  ;;  %v5551_v4 = vsel %vm1274_vm8, %v5550_v40, %v10009_v34  ;;  %v7890_v34 = vld [vmem:[%s11438_s4 + $0x298] sm:$0xff]  ;;  %v3255_v40 = vcombine.high %v11720_v11, %v11719_v27 }
 0x3cf   : > { %2695 = vrot.lane.b32.xlu1 %v2644_v39, %s8465_s9  ;;  %v5552_v2 = vsel %vm1276_vm9, %v5551_v4, %v10022_v57  ;;  %v11721_v4 = vld [vmem:[#allocation60_spill] sm:$0xff] }
 0x3d0   : > { %6247 = vrot.lane.b32.xlu0 %v6097_v19, %s8462_s26  ;;  %v5553_v18 = vsel %vm1278_vm10, %v5552_v2, %v10215_v12  ;;  %v11724_v2 = vld [vmem:[#allocation57_spill] sm:$0xff] }
 0x3d1   : > { %v10384_v42 = vpop.permute.xlu0 %6688  ;;  %v5544_v44 = vpop.permute.xlu1 %5543  ;;  %7904 = vmatmul.mubr.msk.f32.gmra.mrb[2].mxu1 %vm332_vm0, %v7888_v61  ;;  %v5554_v41 = vsel %vm1280_vm11, %v5553_v18, %v10245_v1  ;;  %v7891_v1 = vld [vmem:[%s11438_s4 + $0x2a0] sm:$0xff]  ;;  %v6846_v61 = vcombine.low %v10302_v15, %v10343_v0 }
 0x3d2   : > { %5025 = vmatprep.mubr.f32.mxu1 %v11687_v10  ;;  %v5562_v21 = vsel %vm1282_vm12, %v5561_v62, %v5544_v44  ;;  %v5555_v57 = vsel %vm1282_vm12, %v5554_v41, %v10268_v54  ;;  %v2455_v54 = vcombine.high %v10347_v43, %v10332_v22  ;;  %v6878_v28 = vcombine.low %v10365_v23, %v10384_v42  ;;  %v8426_v62 = vld [vmem:[#allocation2 + $0x1d] ss:$48 sps:$4 sm:$0xff]  }
 0x3d3   : > { %2699 = vrot.lane.b32.xlu1 %v2645_v25, %s8466_s10  ;;  %v10490_v44 = vrot.slane %v6846_v61, %v8858_v50  ;;  %v11725_v18 = vld [vmem:[#allocation56_spill] sm:$0xff]  ;;  %v11726_v41 = vld [vmem:[#allocation55_spill] sm:$0xff]  ;;  %v11730_v61 = vld [vmem:[#allocation61_spill] sm:$0xff] }
 0x3d4   : > { %2659 = vrot.lane.b32.xlu0 %v2506_v59, %s8463_s29  ;;  %v2469_v22 = vrot.slane %v2455_v54, %v8975_v6  ;;  %v7895_v59 = vld [vmem:[%s11438_s4 + $0x2c0] sm:$0xff]  ;;  %v6886_v29 = vrot.slane %v6878_v28, %v8858_v50 }
 0x3d5   : > { %v10412_v16 = vpop.permute.xlu0 %6662  ;;  %v5548_v53 = vpop.permute.xlu1 %5547  ;;  %7905 = vmatmul.mubr.msk.f32.gmra.mrb[4].mxu1 %vm332_vm0, %v7889_v52 }
 0x3d6   : > { %v5563_v32 = vsel %vm1284_vm13, %v5562_v21, %v5548_v53  ;;  %5031 = vmatprep.mubr.f32.mxu1 %v11687_v10  ;;  %v2508_v39 = vcombine.low %v2469_v22, %v2501_v8  ;;  %v2509_v36 = vcombine.high %v2469_v22, %v2501_v8  ;;  %v11722_v21 = vld [vmem:[#allocation59_spill] sm:$0xff]  ;;  %v10534_v22 = vrot.slane %v3255_v40, %v8975_v6 }
 0x3d7   : > { %6263 = vrot.lane.b32.xlu1 %v6101_v13, %s8466_s10  ;;  %5629 = vmatprep.subr.mxu1 %v5563_v32  ;;  %v3319_v53 = vcombine.high %v11722_v21, %v11721_v4  ;;  %v11723_v13 = vld [vmem:[#allocation58_spill] sm:$0xff] }
 0x3d8   : > { %6251 = vrot.lane.b32.xlu0 %v6098_v38, %s8463_s29  ;;  %v3119_v32 = vcombine.high %v11724_v2, %v11723_v13  ;;  %v7896_v38 = vld [vmem:[%s11438_s4 + $0x2c8] sm:$0xff]  ;;  %v7898_v2 = vld [vmem:[%s11438_s4 + $0x2d8] sm:$0xff] }
 0x3d9   : > { %v10431_v9 = vpop.permute.xlu0 %6670  ;;  %v5520_v58 = vpop.permute.xlu1 %5519  ;;  %7906 = vmatmul.mubr.msk.f32.gmra.mrb[6].mxu1 %vm332_vm0, %v7890_v34  ;;  %v8425_v8 = vld [vmem:[#allocation2 + $0x5] ss:$48 sps:$4 sm:$0xff]  }
 0x3da   : > { %v5556_v12 = vsel %vm1284_vm13, %v5555_v57, %v5520_v58  ;;  %5037 = vmatprep.mubr.f32.mxu1 %v11687_v10  ;;  %v3151_v57 = vcombine.high %v11726_v41, %v11725_v18  ;;  %v11727_v58 = vld [vmem:[#allocation52_spill] sm:$0xff]  ;;  %v3133_v28 = vrot.slane %v3119_v32, %v8975_v6  ;;  %v3069_v27 = vrot.slane %v8425_v8, %v8858_v50 }
 0x3db   : > { %5630 = vmatpush1.msra.mxu1 %v5556_v12  ;;  %v3287_v12 = vcombine.high %v11728_v7, %v11727_v58  ;;  %v8429_v32 = vld [vmem:[#allocation2 + $0xd] ss:$48 sps:$4 sm:$0xff]   ;;  %v8432_v18 = vld [vmem:[#allocation2 + $0x85] ss:$48 sps:$4 sm:$0xff]  }
 0x3dc   : > { %2663 = vrot.lane.b32.xlu0 %v2507_v33, %s8464_s30  ;;  %v8427_v33 = vld [vmem:[#allocation2 + $0x65] ss:$48 sps:$4 sm:$0xff]  }
 0x3dd   : > { %v10444_v47 = vpop.permute.xlu1 %6668  ;;  %7907 = vmatmul.mubr.msk.f32.gmra.mrb[8].mxu1 %vm332_vm0, %v7891_v1  ;;  %v8428_v1 = vld [vmem:[#allocation2 + $0x7d] ss:$48 sps:$4 sm:$0xff]  }
 0x3de   : > { %v10447_v56 = vpop.permute.xlu0 %1931  ;;  %5043 = vmatprep.mubr.f32.mxu1 %v11687_v10 }
 0x3e0   : > { %6255 = vrot.lane.b32.xlu0 %v6099_v37, %s8464_s30 }
 0x3e1   : > { %v10456_v43 = vpop.permute.xlu1 %6676  ;;  %7908 = vmatmul.mubr.msk.f32.gmra.mrb[10].mxu1 %vm332_vm0, %v7892_v49 }
 0x3e2   : > { %v10459_v55 = vpop.permute.xlu0 %1903  ;;  %5049 = vmatprep.mubr.f32.mxu1 %v11687_v10  ;;  %v6862_v19 = vcombine.low %v10444_v47, %v10456_v43 }
 0x3e4   : > { %2667 = vrot.lane.b32.xlu0 %v2508_v39, %s8465_s9  ;;  %v10483_v24 = vrot.slane %v6862_v19, %v8858_v50  ;;  %v10537_v39 = vrot.slane %v8426_v62, %v8858_v50  ;;  %v11729_v19 = vld [vmem:[#allocation62_spill] sm:$0xff] }
 0x3e5   : > { %v10468_v46 = vpop.permute.xlu1 %6684  ;;  %7909 = vmatmul.mubr.msk.f32.gmra.mrb[12].mxu1 %vm332_vm0, %v7893_v63 }
 0x3e6   : > { %v10473_v26 = vpop.permute.xlu0 %1907  ;;  %5055 = vmatprep.mubr.f32.mxu1 %v11687_v10  ;;  %v6910_v52 = vcombine.low %v10490_v44, %v10483_v24 }
 0x3e8   : > { %6259 = vrot.lane.b32.xlu0 %v6100_v51, %s8465_s9  ;;  %v10529_v37 = vrot.slane %v6910_v52, %v8975_v6  ;;  %v3183_v51 = vcombine.high %v11730_v61, %v11729_v19  ;;  %v10555_v52 = vrot.slane %v8428_v1, %v8858_v50 }
 0x3e9   : > { %v10486_v48 = vpop.permute.xlu1 %6692  ;;  %7910 = vmatmul.mubr.msk.f32.gmra.mrb[14].mxu1 %vm332_vm0, %v7894_v45 }
 0x3ea   : > { %v10492_v25 = vpop.permute.xlu0 %1911  ;;  %v6894_v31 = vcombine.low %v10468_v46, %v10486_v48  ;;  %5061 = vmatprep.mubr.f32.mxu1 %v11687_v10 }
 0x3ec   : > { %v6902_v17 = vrot.slane %v6894_v31, %v8858_v50  ;;  %2671 = vrot.lane.b32.xlu0 %v2509_v36, %s8466_s10  ;;  %v7897_v31 = vld [vmem:[%s11438_s4 + $0x2d0] sm:$0xff]  ;;  %v3165_v36 = vrot.slane %v3151_v57, %v8975_v6 }
 0x3ed   : > { %v10505_v20 = vpop.permute.xlu1 %6666  ;;  %7911 = vmatmul.mubr.msk.f32.gmra.mrb[16].mxu1 %vm332_vm0, %v7895_v59  ;;  %v3301_v59 = vrot.slane %v3287_v12, %v8975_v6  ;;  %v6895_v12 = vcombine.high %v10468_v46, %v10486_v48  ;;  %v10601_v46 = vrot.slane %v8432_v18, %v8858_v50  ;;  %v6879_v48 = vcombine.high %v10365_v23, %v10384_v42 }
 0x3ee   : > { %v6942_v35 = vcombine.low %v6886_v29, %v6902_v17  ;;  %5067 = vmatprep.mubr.f32.mxu1 %v11687_v10  ;;  %v10518_v34 = vpop.permute.xlu0 %1915  ;;  %v6943_v63 = vcombine.high %v6886_v29, %v6902_v17  ;;  %v10552_v29 = vrot.slane %v8427_v33, %v8858_v50  ;;  %v6911_v17 = vcombine.high %v10490_v44, %v10483_v24 }
 0x3ef   : > { %v3184_v13 = vcombine.low %v3133_v28, %v3165_v36  ;;  %v3320_v24 = vcombine.low %v10534_v22, %v3301_v59  ;;  %v3134_v44 = vcombine.low %v3069_v27, %v10537_v39  ;;  %v3185_v33 = vcombine.high %v3133_v28, %v3165_v36 }
 0x3f0   : > { %v10525_v54 = vrot.slane %v6942_v35, %v8975_v6  ;;  %3355 = vrot.lane.b32.xlu0 %v3319_v53, %s8460_s24  ;;  %v8430_v35 = vld [vmem:[#allocation2 + $0x25] ss:$48 sps:$4 sm:$0xff]   ;;  %v10568_v53 = vrot.slane %v6943_v63, %v8975_v6  ;;  %v6925_v41 = vrot.slane %v6911_v17, %v8975_v6  ;;  %v3166_v57 = vcombine.low %v10552_v29, %v10555_v52 }
 0x3f1   : > { %v10531_v49 = vpop.permute.xlu1 %1935  ;;  %7912 = vmatmul.mubr.msk.f32.gmra.mrb[18].mxu1 %vm332_vm0, %v7896_v38  ;;  %v8431_v38 = vld [vmem:[#allocation2 + $0x6d] ss:$48 sps:$4 sm:$0xff]   ;;  %v10582_v7 = vrot.slane %v8430_v35, %v8858_v50  ;;  %v3142_v8 = vrot.slane %v3134_v44, %v8975_v6  ;;  %v6863_v28 = vcombine.high %v10444_v47, %v10456_v43  ;;  %v6847_v36 = vcombine.high %v10302_v15, %v10343_v0 }
 0x3f2   : > { %v6975_v45 = vcombine.high %v10529_v37, %v10525_v54  ;;  %5073 = vmatprep.mubr.f32.mxu1 %v11687_v10  ;;  %v6974_v11 = vcombine.low %v10529_v37, %v10525_v54  ;;  %v10564_v40 = vpop.permute.xlu0 %1919  ;;  %v6976_v1 = vcombine.low %v6925_v41, %v10568_v53  ;;  %v7899_v63 = vld [vmem:[%s11438_s4 + $0x2e0] sm:$0xff]  ;;  %v10598_v17 = vrot.slane %v8431_v38, %v8858_v50  ;;  %v7900_v43 = vld [vmem:[%s11438_s4 + $0x2e8] sm:$0xff] }
 0x3f3   : > { %v10616_v23 = vrot.slane %v6895_v12, %v8858_v50  ;;  %v3321_v47 = vcombine.high %v10534_v22, %v3301_v59  ;;  %v3167_v0 = vcombine.high %v10552_v29, %v10555_v52  ;;  %v11731_v22 = vcombine.low %v9528_v60, %v9541_v14  ;;  %v11732_v14 = vld [vmem:[#allocation24_spill] sm:$0xff]  ;;  %v7804_v54 = vld [vmem:[%s11438_s4 + $0x168] sm:$0xff] }
 0x3f4   : > { %3327 = vrot.lane.b32.xlu0 %v3183_v51, %s8460_s24  ;;  %7011 = vrot.lane.b32.xlu1 %v6975_v45, %s8460_s24  ;;  %v3135_v45 = vcombine.high %v3069_v27, %v10537_v39  ;;  %v3174_v39 = vrot.slane %v3166_v57, %v8975_v6  ;;  %v10639_v44 = vrot.slane %v6863_v28, %v8858_v50 }
 0x3f5   : > { %v1940_v62 = vpop.permute.xlu1 %1939  ;;  %7913 = vmatmul.mubr.msk.f32.gmra.mrb[20].mxu1 %vm332_vm0, %v7897_v31  ;;  %v10595_v31 = vrot.slane %v8429_v32, %v8858_v50  ;;  %v1965_v59 = vsel %vm1272_vm7, %v11731_v22, %v10447_v56  ;;  %v10644_v29 = vrot.slane %v6847_v36, %v8858_v50  ;;  %v11733_v56 = vld [vmem:[#allocation25_spill] sm:$0xff] }
 0x3f6   : > { %5079 = vmatprep.mubr.f32.mxu1 %v11687_v10  ;;  %v1924_v51 = vpop.permute.xlu0 %1923  ;;  %v3186_v42 = vcombine.low %v3142_v8, %v3174_v39  ;;  %v10624_v15 = vrot.slane %v3135_v45, %v8975_v6  ;;  %v1966_v52 = vsel %vm1274_vm8, %v1965_v59, %v10531_v49  ;;  %v3187_v38 = vcombine.high %v3142_v8, %v3174_v39  ;;  %v7760_v59 = vld [vmem:[%s11438_s4 + $0x88] sm:$0xff] }
 0x3f7   : > { %v3270_v35 = vcombine.low %v10595_v31, %v10582_v7  ;;  %v11734_v18 = vcombine.low %v11732_v14, %v11733_v56  ;;  %v6977_v49 = vcombine.high %v6925_v41, %v10568_v53  ;;  %v7920_v56 = vld [vmem:[%s11438_s4 + $0x308] sm:$0xff] }
 0x3f8   : > { %3331 = vrot.lane.b32.xlu0 %v3184_v13, %s8461_s25  ;;  %3359 = vrot.lane.b32.xlu1 %v3320_v24, %s8461_s25  ;;  %v3302_v13 = vcombine.low %v10598_v17, %v10601_v46  ;;  %v10631_v24 = vrot.slane %v6879_v48, %v8858_v50 }
 0x3f9   : > { %v1944_v58 = vpop.permute.xlu1 %1943  ;;  %7914 = vmatmul.mubr.msk.f32.gmra.mrb[22].mxu1 %vm332_vm0, %v7898_v2  ;;  %v3278_v60 = vrot.slane %v3270_v35, %v8975_v6  ;;  %v1958_v57 = vsel %vm1272_vm7, %v11734_v18, %v10459_v55  ;;  %v10667_v55 = vrot.slane %v3167_v0, %v8975_v6  ;;  %v3303_v18 = vcombine.high %v10598_v17, %v10601_v46 }
 0x3fa   : > { %5085 = vmatprep.mubr.f32.mxu1 %v11687_v10  ;;  %v1928_v2 = vpop.permute.xlu0 %1927  ;;  %v6958_v12 = vcombine.low %v10631_v24, %v10616_v23  ;;  %v1959_v8 = vsel %vm1274_vm8, %v1958_v57, %v10473_v26  ;;  %v3310_v45 = vrot.slane %v3302_v13, %v8975_v6  ;;  %v7919_v13 = vld [vmem:[%s11438_s4 + $0x300] sm:$0xff]  ;;  %v6959_v46 = vcombine.high %v10631_v24, %v10616_v23  ;;  %v7762_v24 = vld [vmem:[%s11438_s4 + $0x98] sm:$0xff] }
 0x3fb   : > { %v1960_v53 = vsel %vm1276_vm9, %v1959_v8, %v10492_v25  ;;  %v3188_v28 = vcombine.low %v10624_v15, %v10667_v55  ;;  %v6927_v8 = vcombine.high %v10644_v29, %v10639_v44 }
 0x3fc   : > { %3335 = vrot.lane.b32.xlu0 %v3185_v33, %s8462_s26  ;;  %7015 = vrot.lane.b32.xlu1 %v6976_v1, %s8461_s25  ;;  %v1967_v33 = vsel %vm1276_vm9, %v1966_v52, %v1940_v62  ;;  %v7901_v1 = vld [vmem:[%s11438_s4 + $0x2f0] sm:$0xff]  ;;  %v6926_v62 = vcombine.low %v10644_v29, %v10639_v44  ;;  %v1961_v26 = vsel %vm1278_vm10, %v1960_v53, %v10518_v34  ;;  %v7902_v34 = vld [vmem:[%s11438_s4 + $0x2f8] sm:$0xff] }
 0x3fd   : > { %v1948_v27 = vpop.permute.xlu1 %1947  ;;  %7915 = vmatmul.mubr.msk.f32.gmra.mrb[24].mxu1 %vm332_vm0, %v7899_v63  ;;  %v1968_v63 = vsel %vm1278_vm10, %v1967_v33, %v1944_v58  ;;  %v6966_v39 = vrot.slane %v6958_v12, %v8975_v6  ;;  %v1962_v25 = vsel %vm1280_vm11, %v1961_v26, %v10564_v40  ;;  %v3323_v14 = vcombine.high %v3278_v60, %v3310_v45 }
 0x3fe   : > { %5091 = vmatprep.mubr.f32.mxu1 %v11687_v10  ;;  %v1969_v41 = vsel %vm1280_vm11, %v1968_v63, %v1948_v27  ;;  %v3322_v27 = vcombine.low %v3278_v60, %v3310_v45  ;;  %v1963_v35 = vsel %vm1282_vm12, %v1962_v25, %v1924_v51  ;;  %v3317_v63 = vrot.slane %v3303_v18, %v8975_v6  ;;  %v7924_v18 = vld [vmem:[%s11438_s4 + $0x328] sm:$0xff] }
 0x3ff   : > { %v1964_v40 = vsel %vm1284_vm13, %v1963_v35, %v1928_v2  ;;  %v6973_v29 = vrot.slane %v6959_v46, %v8975_v6  ;;  %v7763_v35 = vld [vmem:[%s11438_s4 + $0xa0] sm:$0xff] }
 0x400   : > { %3339 = vrot.lane.b32.xlu0 %v3186_v42, %s8463_s29  ;;  %3363 = vrot.lane.b32.xlu1 %v3321_v47, %s8462_s26  ;;  %v10692_v42 = vpop.permute.xlu0 %6678  ;;  %v7759_v47 = vld [vmem:[%s11438_s4 + $0x80] sm:$0xff] }
 0x401   : > { %v1952_v32 = vpop.permute.xlu1 %1951  ;;  %7916 = vmatmul.mubr.msk.f32.gmra.mrb[26].mxu1 %vm332_vm0, %v7900_v43  ;;  %v6934_v43 = vrot.slane %v6926_v62, %v8975_v6 }
 0x402   : > { %5097 = vmatprep.mubr.f32.mxu1 %v11687_v10  ;;  %v1970_v58 = vsel %vm1282_vm12, %v1969_v41, %v1952_v32  ;;  %v3271_v32 = vcombine.high %v10595_v31, %v10582_v7  ;;  %v7761_v31 = vld [vmem:[%s11438_s4 + $0x90] sm:$0xff] }
 0x403   : > { %v6978_v51 = vcombine.low %v6934_v43, %v6966_v39 }
 0x404   : > { %3343 = vrot.lane.b32.xlu0 %v3187_v38, %s8464_s30  ;;  %7019 = vrot.lane.b32.xlu1 %v6977_v49, %s8462_s26  ;;  %v6687_v52 = vpop.permute.xlu0 %6686  ;;  %v6710_v38 = vcombine.low %v10412_v16, %v10431_v9  ;;  %v10735_v12 = vrot.slane %v3271_v32, %v8975_v6  ;;  %v6979_v49 = vcombine.high %v6934_v43, %v6966_v39 }
 0x405   : > { %v1956_v48 = vpop.permute.xlu1 %1955  ;;  %7917 = vmatmul.mubr.msk.f32.gmra.mrb[28].mxu1 %vm332_vm0, %v7901_v1  ;;  %v6742_v57 = vcombine.low %v10692_v42, %v6687_v52  ;;  %v7921_v1 = vld [vmem:[%s11438_s4 + $0x310] sm:$0xff]  ;;  %v6941_v39 = vrot.slane %v6927_v8, %v8975_v6  ;;  %v7766_v8 = vld [vmem:[%s11438_s4 + $0xb8] sm:$0xff] }
 0x406   : > { %v1971_v36 = vsel %vm1284_vm13, %v1970_v58, %v1956_v48  ;;  %5103 = vmatprep.mubr.f32.mxu1 %v11687_v10  ;;  %v6718_v17 = vrot.slane %v6710_v38, %v8858_v50  ;;  %v3324_v44 = vcombine.low %v10735_v12, %v3317_v63  ;;  %v7922_v48 = vld [vmem:[%s11438_s4 + $0x318] sm:$0xff] }
 0x407   : > { %2037 = vmatprep.subr.mxu0 %v1971_v36  ;;  %v6750_v45 = vrot.slane %v6742_v57, %v8858_v50  ;;  %v6980_v43 = vcombine.low %v6941_v39, %v6973_v29 }
 0x408   : > { %3347 = vrot.lane.b32.xlu0 %v3188_v28, %s8465_s9  ;;  %3367 = vrot.lane.b32.xlu1 %v3322_v27, %s8463_s29  ;;  %v6743_v28 = vcombine.high %v10692_v42, %v6687_v52  ;;  %v6711_v42 = vcombine.high %v10412_v16, %v10431_v9 }
 0x409   : > { %2038 = vmatpush1.msra.mxu0 %v1964_v40  ;;  %v10701_v0 = vpop.permute.xlu1 %6674  ;;  %7918 = vmatmul.mubr.msk.f32.gmra.mrb[30].mxu1 %vm332_vm0, %v7902_v34 }
 0x40a   : > { %5693 = vmatprep.mubr.f32.mxu1 %v11687_v10  ;;  %7775 = vmatmul.mubr.msk.f32.vlgmr.msra.gmra.mrb[16].mxu0 %vm332_vm0, %v7759_v47  ;;  %v6726_v22 = vcombine.low %v10505_v20, %v10701_v0  ;;  %v6727_v25 = vcombine.high %v10505_v20, %v10701_v0  ;;  %v6757_v16 = vrot.slane %v6743_v28, %v8858_v50 }
 0x40b   : > { %2107 = vmatprep.mubr.f32.mxu0 %v11687_v10  ;;  %v6725_v32 = vrot.slane %v6711_v42, %v8858_v50 }
 0x40c   : > { %7023 = vrot.lane.b32.xlu1 %v6978_v51, %s8463_s29  ;;  %v6734_v7 = vrot.slane %v6726_v22, %v8858_v50  ;;  %v7923_v51 = vld [vmem:[%s11438_s4 + $0x320] sm:$0xff]  ;;  %v6741_v9 = vrot.slane %v6727_v25, %v8858_v50  ;;  %v7764_v22 = vld [vmem:[%s11438_s4 + $0xa8] sm:$0xff] }
 0x40d   : > { %v6683_v2 = vpop.permute.xlu1 %6682  ;;  %7935 = vmatmul.mubr.msk.f32.vlgmr.msra.gmra.mrb[0].mxu1 %vm332_vm0, %v7919_v13 }
 0x40e   : > { %5699 = vmatprep.mubr.f32.mxu1 %v11687_v10  ;;  %7776 = vmatmul.mubr.msk.f32.gmra.mrb[18].mxu0 %vm332_vm0, %v7760_v59  ;;  %v6774_v62 = vcombine.low %v6718_v17, %v6734_v7  ;;  %v6775_v36 = vcombine.high %v6718_v17, %v6734_v7  ;;  %v6790_v57 = vcombine.low %v6725_v32, %v6741_v9 }
 0x40f   : > { %2113 = vmatprep.mubr.f32.mxu0 %v11687_v10  ;;  %v6791_v7 = vcombine.high %v6725_v32, %v6741_v9  ;;  %v6981_v17 = vcombine.high %v6941_v39, %v6973_v29  ;;  %v7771_v32 = vld [vmem:[%s11438_s4 + $0xe0] sm:$0xff] }
 0x410   : > { %3371 = vrot.lane.b32.xlu1 %v3323_v14, %s8464_s30  ;;  %v10772_v27 = vrot.slane %v6774_v62, %v8975_v6  ;;  %v6789_v13 = vrot.slane %v6775_v36, %v8975_v6 }
 0x411   : > { %v6691_v60 = vpop.permute.xlu1 %6690  ;;  %7936 = vmatmul.mubr.msk.f32.gmra.mrb[2].mxu1 %vm332_vm0, %v7920_v56 }
 0x412   : > { %v6758_v33 = vcombine.low %v6683_v2, %v6691_v60  ;;  %5705 = vmatprep.mubr.f32.mxu1 %v11687_v10  ;;  %7777 = vmatmul.mubr.msk.f32.gmra.mrb[20].mxu0 %vm332_vm0, %v7761_v31  ;;  %v6759_v41 = vcombine.high %v6683_v2, %v6691_v60  ;;  %v3325_v2 = vcombine.high %v10735_v12, %v3317_v63 }
 0x413   : > { %2119 = vmatprep.mubr.f32.mxu0 %v11687_v10 }
 0x414   : > { %v6766_v23 = vrot.slane %v6758_v33, %v8858_v50  ;;  %7027 = vrot.lane.b32.xlu1 %v6979_v49, %s8464_s30  ;;  %v6773_v20 = vrot.slane %v6759_v41, %v8858_v50  ;;  %v7765_v50 = vld [vmem:[%s11438_s4 + $0xb0] sm:$0xff]  ;;  %v6798_v49 = vrot.slane %v6790_v57, %v8975_v6  ;;  %v7767_v41 = vld [vmem:[%s11438_s4 + $0xc0] sm:$0xff] }
 0x415   : > { %v10757_v53 = vpop.permute.xlu1 %6267  ;;  %7937 = vmatmul.mubr.msk.f32.gmra.mrb[4].mxu1 %vm332_vm0, %v7921_v1  ;;  %v7925_v33 = vld [vmem:[%s11438_s4 + $0x330] sm:$0xff]  ;;  %v6805_v1 = vrot.slane %v6791_v7, %v8975_v6 }
 0x416   : > { %v6806_v26 = vcombine.low %v6750_v45, %v6766_v23  ;;  %v6807_v58 = vcombine.high %v6750_v45, %v6766_v23  ;;  %5711 = vmatprep.mubr.f32.mxu1 %v11687_v10  ;;  %7778 = vmatmul.mubr.msk.f32.gmra.mrb[22].mxu0 %vm332_vm0, %v7762_v24  ;;  %v6822_v38 = vcombine.low %v6757_v16, %v6773_v20  ;;  %v11735_v23 = vld [vmem:[#allocation22_spill] sm:$0xff]  ;;  %v11736_v24 = vld [vmem:[#allocation76_spill] sm:$0xff] }
 0x417   : > { %2125 = vmatprep.mubr.f32.mxu0 %v11687_v10  ;;  %v6823_v14 = vcombine.high %v6757_v16, %v6773_v20 }
 0x418   : > { %v10775_v34 = vrot.slane %v6806_v26, %v8975_v6  ;;  %3375 = vrot.lane.b32.xlu1 %v3324_v44, %s8465_s9  ;;  %v6821_v40 = vrot.slane %v6807_v58, %v8975_v6  ;;  %v6830_v60 = vrot.slane %v6822_v38, %v8975_v6  ;;  %v11737_v44 = vcombine.low %v11735_v23, %v11736_v24 }
 0x419   : > { %v6272_v47 = vpop.permute.xlu1 %6271  ;;  %7938 = vmatmul.mubr.msk.f32.gmra.mrb[6].mxu1 %vm332_vm0, %v7922_v48  ;;  %v6837_v12 = vrot.slane %v6823_v14, %v8975_v6  ;;  %v7926_v6 = vld [vmem:[%s11438_s4 + $0x338] sm:$0xff]  ;;  %v2676_v48 = vpop.permute.xlu0 %2675 }
 0x41a   : > { %v6839_v0 = vcombine.high %v10772_v27, %v10775_v34  ;;  %5717 = vmatprep.mubr.f32.mxu1 %v11687_v10  ;;  %7779 = vmatmul.mubr.msk.f32.gmra.mrb[24].mxu0 %vm332_vm0, %v7763_v35  ;;  %v6838_v59 = vcombine.low %v10772_v27, %v10775_v34  ;;  %v6840_v56 = vcombine.low %v6789_v13, %v6821_v40  ;;  %v7768_v35 = vld [vmem:[%s11438_s4 + $0xc8] sm:$0xff] }
 0x41b   : > { %2131 = vmatprep.mubr.f32.mxu0 %v11687_v10  ;;  %v6841_v46 = vcombine.high %v6789_v13, %v6821_v40  ;;  %v6845_v45 = vcombine.high %v6805_v1, %v6837_v12  ;;  %v6842_v62 = vcombine.low %v6798_v49, %v6830_v60  ;;  %v6301_v29 = vsel %vm1272_vm7, %v11737_v44, %v10757_v53  ;;  %v7927_v53 = vld [vmem:[%s11438_s4 + $0x340] sm:$0xff] }
 0x41c   : > { %7031 = vrot.lane.b32.xlu1 %v6980_v43, %s8465_s9  ;;  %6983 = vrot.lane.b32.xlu0 %v6839_v0, %s8460_s24  ;;  %v6302_v26 = vsel %vm1274_vm8, %v6301_v29, %v6272_v47  ;;  %v6843_v39 = vcombine.high %v6798_v49, %v6830_v60  ;;  %v6844_v43 = vcombine.low %v6805_v1, %v6837_v12  ;;  %v7928_v0 = vld [vmem:[%s11438_s4 + $0x348] sm:$0xff]  ;;  %v11739_v60 = vld [vmem:[#allocation79_spill] sm:$0xff] }
 0x41d   : > { %v6276_v52 = vpop.permute.xlu1 %6275  ;;  %7939 = vmatmul.mubr.msk.f32.gmra.mrb[8].mxu1 %vm332_vm0, %v7923_v51  ;;  %v7769_v51 = vld [vmem:[%s11438_s4 + $0xd0] sm:$0xff]  ;;  %v3189_v13 = vcombine.high %v10624_v15, %v10667_v55  ;;  %v7930_v55 = vld [vmem:[%s11438_s4 + $0x358] sm:$0xff] }
 0x41e   : > { %5723 = vmatprep.mubr.f32.mxu1 %v11687_v10  ;;  %7780 = vmatmul.mubr.msk.f32.gmra.mrb[26].mxu0 %vm332_vm0, %v7764_v22  ;;  %v6303_v28 = vsel %vm1276_vm9, %v6302_v26, %v6276_v52  ;;  %v7929_v22 = vld [vmem:[%s11438_s4 + $0x350] sm:$0xff]  ;;  %v7770_v52 = vld [vmem:[%s11438_s4 + $0xd8] sm:$0xff] }
 0x41f   : > { %2137 = vmatprep.mubr.f32.mxu0 %v11687_v10 }
 0x420   : > { %3379 = vrot.lane.b32.xlu1 %v3325_v2, %s8466_s10  ;;  %6987 = vrot.lane.b32.xlu0 %v6840_v56, %s8461_s25  ;;  %v7931_v56 = vld [vmem:[%s11438_s4 + $0x360] sm:$0xff] }
 0x421   : > { %v6280_v31 = vpop.permute.xlu1 %6279  ;;  %7940 = vmatmul.mubr.msk.f32.gmra.mrb[10].mxu1 %vm332_vm0, %v7924_v18  ;;  %v7772_v18 = vld [vmem:[%s11438_s4 + $0xe8] sm:$0xff] }
 0x422   : > { %5729 = vmatprep.mubr.f32.mxu1 %v11687_v10  ;;  %7781 = vmatmul.mubr.msk.f32.gmra.mrb[28].mxu0 %vm332_vm0, %v7765_v50  ;;  %v6304_v25 = vsel %vm1278_vm10, %v6303_v28, %v6280_v31  ;;  %v10869_v20 = vpop.permute.xlu0 %2647  ;;  %v7932_v50 = vld [vmem:[%s11438_s4 + $0x368] sm:$0xff]  ;;  %v11738_v31 = vld [vmem:[#allocation78_spill] sm:$0xff] }
 0x423   : > { %2143 = vmatprep.mubr.f32.mxu0 %v11687_v10  ;;  %v11740_v12 = vcombine.low %v11738_v31, %v11739_v60  ;;  %v8467_v31 = vmov 0   ;;  %v7409_v60 = vld [vmem:[%s11439_s5 + $0x18] sm:$0xff] }
 0x424   : > { %7035 = vrot.lane.b32.xlu1 %v6981_v17, %s8466_s10  ;;  %6991 = vrot.lane.b32.xlu0 %v6841_v46, %s8462_s26  ;;  %v7773_v46 = vld [vmem:[%s11438_s4 + $0xf0] sm:$0xff] }
 0x425   : > { %v6284_v63 = vpop.permute.xlu1 %6283  ;;  %7941 = vmatmul.mubr.msk.f32.gmra.mrb[12].mxu1 %vm332_vm0, %v7925_v33  ;;  %v2709_v17 = vsel %vm1272_vm7, %v11740_v12, %v2676_v48  ;;  %8385 = vset.pattern.permute.xlu0 %v8467_v31 }
 0x426   : > { %5735 = vmatprep.mubr.f32.mxu1 %v11687_v10  ;;  %7782 = vmatmul.mubr.msk.f32.gmra.mrb[30].mxu0 %vm332_vm0, %v7766_v8  ;;  %v6305_v36 = vsel %vm1280_vm11, %v6304_v25, %v6284_v63  ;;  %v7933_v63 = vld [vmem:[%s11438_s4 + $0x370] sm:$0xff] }
 0x427   : > { %2149 = vmatprep.mubr.f32.mxu0 %v11687_v10  ;;  %8386 = vset.pattern.permute.xlu1 %v8467_v31 }
 0x428   : > { %7007 = vrot.lane.b32.xlu1 %v6845_v45, %s8466_s10  ;;  %6995 = vrot.lane.b32.xlu0 %v6842_v62, %s8463_s29 }
 0x429   : > { %v6288_v58 = vpop.permute.xlu1 %6287  ;;  %7942 = vmatmul.mubr.msk.f32.gmra.mrb[14].mxu1 %vm332_vm0, %v7926_v6  ;;  %v7774_v6 = vld [vmem:[%s11438_s4 + $0xf8] sm:$0xff] }
 0x42a   : > { %5741 = vmatprep.mubr.f32.mxu1 %v11687_v10  ;;  %7783 = vmatmul.mubr.msk.f32.gmra.mrb[32].mxu0 %vm332_vm0, %v7767_v41  ;;  %v6306_v42 = vsel %vm1282_vm12, %v6305_v36, %v6288_v58  ;;  %v7934_v41 = vld [vmem:[%s11438_s4 + $0x378] sm:$0xff]  ;;  %v11741_v36 = vld [vmem:[#allocation20_spill] sm:$0xff] }
 0x42b   : > { %2155 = vmatprep.mubr.f32.mxu0 %v11687_v10 }
 0x42c   : > { %6999 = vrot.lane.b32.xlu0 %v6843_v39, %s8464_s30 }
 0x42d   : > { %v6292_v47 = vpop.permute.xlu1 %6291  ;;  %7943 = vmatmul.mubr.msk.f32.gmra.mrb[16].mxu1 %vm332_vm0, %v7927_v53 }
 0x42e   : > { %v6307_v40 = vsel %vm1284_vm13, %v6306_v42, %v6292_v47  ;;  %5747 = vmatprep.mubr.f32.mxu1 %v11687_v10  ;;  %7784 = vmatmul.mubr.msk.f32.gmra.mrb[34].mxu0 %vm332_vm0, %v7768_v35  ;;  %v11742_v35 = vld [vmem:[#allocation38_spill] sm:$0xff] }
 0x42f   : > { %6373 = vmatprep.subr.mxu1 %v6307_v40  ;;  %2161 = vmatprep.mubr.f32.mxu0 %v11687_v10  ;;  %v11743_v42 = vcombine.low %v11741_v36, %v11742_v35  ;;  %v7798_v35 = vld [vmem:[%s11438_s4 + $0x138] sm:$0xff] }
 0x430   : > { %7003 = vrot.lane.b32.xlu0 %v6844_v43, %s8465_s9 }
 0x431   : > { %v2680_v16 = vpop.permute.xlu1 %2679  ;;  %7944 = vmatmul.mubr.msk.f32.gmra.mrb[18].mxu1 %vm332_vm0, %v7928_v0  ;;  %v2702_v47 = vsel %vm1272_vm7, %v11743_v42, %v10869_v20  ;;  %v7416_v42 = vld [vmem:[%s11439_s5 + $0x50] sm:$0xff] }
 0x432   : > { %v6240_v9 = vpop.permute.xlu0 %6239  ;;  %5753 = vmatprep.mubr.f32.mxu1 %v11687_v10  ;;  %7785 = vmatmul.mubr.msk.f32.gmra.mrb[36].mxu0 %vm332_vm0, %v7769_v51  ;;  %v2710_v33 = vsel %vm1274_vm8, %v2709_v17, %v2680_v16  ;;  %v7951_v16 = vld [vmem:[%s11438_s4 + $0x380] sm:$0xff]  ;;  %v7794_v17 = vld [vmem:[%s11438_s4 + $0x118] sm:$0xff] }
 0x433   : > { %2167 = vmatprep.mubr.f32.mxu0 %v11687_v10  ;;  %v6294_v28 = vsel %vm1272_vm7, %v6094_v30, %v6240_v9 }
 0x434   : > { %3351 = vrot.lane.b32.xlu0 %v3189_v13, %s8466_s10  ;;  %s8019_s10 = sshll.u32 %s11747_s28, 3 }
 0x435   : > { %v2684_v2 = vpop.permute.xlu1 %2683  ;;  %7945 = vmatmul.mubr.msk.f32.gmra.mrb[20].mxu1 %vm332_vm0, %v7929_v22  ;;  %s325_s21 = scalar_lea.vmem %s11442_s8, %s8019_s10 }
 0x436   : > { %v2652_v15 = vpop.permute.xlu0 %2651  ;;  %5759 = vmatprep.mubr.f32.mxu1 %v11687_v10  ;;  %7786 = vmatmul.mubr.msk.f32.gmra.mrb[38].mxu0 %vm332_vm0, %v7770_v52  ;;  %v2711_v1 = vsel %vm1276_vm9, %v2710_v33, %v2684_v2  ;;  %v7791_v2 = vld [vmem:[%s11438_s4 + $0x100] sm:$0xff] }
 0x437   : > { %2173 = vmatprep.mubr.f32.mxu0 %v11687_v10  ;;  %v2703_v43 = vsel %vm1274_vm8, %v2702_v47, %v2652_v15  ;;  %v7955_v33 = vld [vmem:[%s11438_s4 + $0x3a0] sm:$0xff] }
 0x438   : > { %v7959_v47 = vld [vmem:[%s11438_s4 + $0x3c0] sm:$0xff] }
 0x439   : > { %v2688_v38 = vpop.permute.xlu1 %2687  ;;  %7946 = vmatmul.mubr.msk.f32.gmra.mrb[22].mxu1 %vm332_vm0, %v7930_v55  ;;  %v7952_v55 = vld [vmem:[%s11438_s4 + $0x388] sm:$0xff] }
 0x43a   : > { %v6244_v14 = vpop.permute.xlu0 %6243  ;;  %5765 = vmatprep.mubr.f32.mxu1 %v11687_v10  ;;  %7787 = vmatmul.mubr.msk.f32.gmra.mrb[40].mxu0 %vm332_vm0, %v7771_v32  ;;  %v2712_v45 = vsel %vm1278_vm10, %v2711_v1, %v2688_v38  ;;  %v7792_v32 = vld [vmem:[%s11438_s4 + $0x108] sm:$0xff]  ;;  %v7953_v38 = vld [vmem:[%s11438_s4 + $0x390] sm:$0xff] }
 0x43b   : > { %2179 = vmatprep.mubr.f32.mxu0 %v11687_v10  ;;  %v6295_v53 = vsel %vm1274_vm8, %v6294_v28, %v6244_v14  ;;  %v7406_v14 = vld [vmem:[%s11439_s5] sm:$0xff]  ;;  %v7411_v1 = vld [vmem:[%s11439_s5 + $0x28] sm:$0xff] }
 0x43c   : > { %7424 = vperm.xlu0 %8385, %v7406_v14   ;;  %v7414_v28 = vld [vmem:[%s11439_s5 + $0x40] sm:$0xff]  ;;  %v7802_v14 = vld [vmem:[%s11438_s4 + $0x158] sm:$0xff] }
 0x43d   : > { %v2692_v57 = vpop.permute.xlu1 %2691  ;;  %7947 = vmatmul.mubr.msk.f32.gmra.mrb[24].mxu1 %vm332_vm0, %v7931_v56 }
 0x43e   : > { %v2656_v7 = vpop.permute.xlu0 %2655  ;;  %5771 = vmatprep.mubr.f32.mxu1 %v11687_v10  ;;  %7788 = vmatmul.mubr.msk.f32.gmra.mrb[42].mxu0 %vm332_vm0, %v7772_v18  ;;  %v2713_v62 = vsel %vm1280_vm11, %v2712_v45, %v2692_v57  ;;  %v7793_v57 = vld [vmem:[%s11438_s4 + $0x110] sm:$0xff]  ;;  %v7410_v45 = vld [vmem:[%s11439_s5 + $0x20] sm:$0xff] }
 0x43f   : > { %2185 = vmatprep.mubr.f32.mxu0 %v11687_v10  ;;  %v2704_v5 = vsel %vm1276_vm9, %v2703_v43, %v2656_v7  ;;  %v7407_v7 = vld [vmem:[%s11439_s5 + $0x8] sm:$0xff] }
 0x440   : > { %7429 = vperm.xlu1 %8386, %v7407_v7   ;;  %7439 = vperm.xlu0 %8385, %v7409_v60   ;;  %v11744_v7 = vcombine.low %v11722_v21, %v11721_v4  ;;  %v7964_v21 = vld [vmem:[%s11438_s4 + $0x3e8] sm:$0xff] }
 0x441   : > { %v2696_v49 = vpop.permute.xlu1 %2695  ;;  %7948 = vmatmul.mubr.msk.f32.gmra.mrb[26].mxu1 %vm332_vm0, %v7932_v50  ;;  %v7954_v50 = vld [vmem:[%s11438_s4 + $0x398] sm:$0xff] }
 0x442   : > { %v6248_v8 = vpop.permute.xlu0 %6247  ;;  %5777 = vmatprep.mubr.f32.mxu1 %v11687_v10  ;;  %7789 = vmatmul.mubr.msk.f32.gmra.mrb[44].mxu0 %vm332_vm0, %v7773_v46  ;;  %v2714_v23 = vsel %vm1282_vm12, %v2713_v62, %v2696_v49  ;;  %v7408_v46 = vld [vmem:[%s11439_s5 + $0x10] sm:$0xff]  ;;  %v7956_v62 = vld [vmem:[%s11438_s4 + $0x3a8] sm:$0xff] }
 0x443   : > { %2191 = vmatprep.mubr.f32.mxu0 %v11687_v10  ;;  %v6296_v25 = vsel %vm1276_vm9, %v6295_v53, %v6248_v8 }
 0x444   : > { %7434 = vperm.xlu1 %8386, %v7408_v46   ;;  %7449 = vperm.xlu0 %8385, %v7411_v1   ;;  %v7803_v46 = vld [vmem:[%s11438_s4 + $0x160] sm:$0xff] }
 0x445   : > { %v2700_v24 = vpop.permute.xlu1 %2699  ;;  %7949 = vmatmul.mubr.msk.f32.gmra.mrb[28].mxu1 %vm332_vm0, %v7933_v63  ;;  %v7795_v63 = vld [vmem:[%s11438_s4 + $0x120] sm:$0xff] }
 0x446   : > { %v2660_v44 = vpop.permute.xlu0 %2659  ;;  %v2715_v29 = vsel %vm1284_vm13, %v2714_v23, %v2700_v24  ;;  %5783 = vmatprep.mubr.f32.mxu1 %v11687_v10  ;;  %7790 = vmatmul.mubr.msk.f32.gmra.mrb[46].mxu0 %vm332_vm0, %v7774_v6  ;;  %v7413_v6 = vld [vmem:[%s11439_s5 + $0x38] sm:$0xff] }
 0x447   : > { %2781 = vmatprep.subr.mxu0 %v2715_v29  ;;  %2845 = vmatprep.mubr.f32.mxu0 %v11687_v10  ;;  %v2705_v9 = vsel %vm1278_vm10, %v2704_v5, %v2660_v44  ;;  %v7796_v44 = vld [vmem:[%s11438_s4 + $0x128] sm:$0xff]  ;;  %v7412_v29 = vld [vmem:[%s11439_s5 + $0x30] sm:$0xff]  ;;  %v7418_v5 = vld [vmem:[%s11439_s5 + $0x60] sm:$0xff] }
 0x448   : > { %7444 = vperm.xlu1 %8386, %v7410_v45   ;;  %7459 = vperm.xlu0 %8385, %v7413_v6  }
 0x449   : > { %7950 = vmatmul.mubr.msk.f32.gmra.mrb[30].mxu1 %vm332_vm0, %v7934_v41  ;;  %v6264_v30 = vpop.permute.xlu1 %6263  ;;  %v7957_v41 = vld [vmem:[%s11438_s4 + $0x3b0] sm:$0xff] }
 0x44a   : > { %v6252_v26 = vpop.permute.xlu0 %6251  ;;  %6437 = vmatprep.mubr.f32.mxu1 %v11687_v10 }
 0x44b   : > { %v6297_v40 = vsel %vm1278_vm10, %v6296_v25, %v6252_v26  ;;  %v7415_v26 = vld [vmem:[%s11439_s5 + $0x48] sm:$0xff]  ;;  %v7417_v25 = vld [vmem:[%s11439_s5 + $0x58] sm:$0xff] }
 0x44c   : > { %7454 = vperm.xlu1 %8386, %v7412_v29   ;;  %7469 = vperm.xlu0 %8385, %v7415_v26  }
 0x44e   : > { %v2664_v58 = vpop.permute.xlu0 %2663 }
 0x44f   : > { %v2706_v13 = vsel %vm1280_vm11, %v2705_v9, %v2664_v58  ;;  %v7800_v9 = vld [vmem:[%s11438_s4 + $0x148] sm:$0xff] }
 0x450   : > { %7464 = vperm.xlu1 %8386, %v7414_v28   ;;  %7479 = vperm.xlu0 %8385, %v7417_v25   ;;  %v7806_v28 = vld [vmem:[%s11438_s4 + $0x178] sm:$0xff] }
 0x452   : > { %v6256_v48 = vpop.permute.xlu0 %6255 }
 0x453   : > { %v6298_v0 = vsel %vm1280_vm11, %v6297_v40, %v6256_v48  ;;  %v7797_v48 = vld [vmem:[%s11438_s4 + $0x130] sm:$0xff]  ;;  %v7419_v40 = vld [vmem:[%s11439_s5 + $0x68] sm:$0xff] }
 0x454   : > { %7474 = vperm.xlu1 %8386, %v7416_v42   ;;  %7489 = vperm.xlu0 %8385, %v7419_v40   ;;  %v11745_v42 = vcombine.low %v11730_v61, %v11729_v19  ;;  %v7983_v19 = vld [vmem:[%s11438_s4 + $0x400] sm:$0xff] }
 0x456   : > { %v2668_v39 = vpop.permute.xlu0 %2667 }
 0x457   : > { %v2707_v22 = vsel %vm1282_vm12, %v2706_v13, %v2668_v39  ;;  %v7958_v39 = vld [vmem:[%s11438_s4 + $0x3b8] sm:$0xff]  ;;  %v7961_v13 = vld [vmem:[%s11438_s4 + $0x3d0] sm:$0xff] }
 0x458   : > { %7484 = vperm.xlu1 %8386, %v7418_v5  }
 0x45a   : > { %v6260_v3 = vpop.permute.xlu0 %6259 }
 0x45b   : > { %v6299_v51 = vsel %vm1282_vm12, %v6298_v0, %v6260_v3  ;;  %v7799_v3 = vld [vmem:[%s11438_s4 + $0x140] sm:$0xff] }
 0x45c   : > { %v6300_v20 = vsel %vm1284_vm13, %v6299_v51, %v6264_v30  ;;  %v7960_v30 = vld [vmem:[%s11438_s4 + $0x3c8] sm:$0xff]  ;;  %v7421_v51 = vld [vmem:[%s11439_s5 + $0x78] sm:$0xff] }
 0x45d   : > { %6374 = vmatpush1.msra.mxu1 %v6300_v20  ;;  %v7420_v20 = vld [vmem:[%s11439_s5 + $0x70] sm:$0xff]  ;;  %7499 = vperm.xlu0 %8385, %v7421_v51   ;;  %v7823_v51 = vld [vmem:[%s11438_s4 + $0x180] sm:$0xff] }
 0x45e   : > { %v2672_v52 = vpop.permute.xlu0 %2671  ;;  %7967 = vmatmul.mubr.msk.f32.vlgmr.msra.gmra.mrb[0].mxu1 %vm332_vm0, %v7951_v16  ;;  %7494 = vperm.xlu1 %8386, %v7420_v20   ;;  %v7985_v20 = vld [vmem:[%s11438_s4 + $0x410] sm:$0xff] }
 0x45f   : > { %v2708_v15 = vsel %vm1284_vm13, %v2707_v22, %v2672_v52  ;;  %6443 = vmatprep.mubr.f32.mxu1 %v11687_v10 }
 0x460   : > { %2782 = vmatpush1.msra.mxu0 %v2708_v15  ;;  %v7567_v15 = vld [vmem:[%s11441_s7] sm:$0xf] }
 0x461   : > { %7807 = vmatmul.mubr.msk.f32.vlgmr.msra.gmra.mrb[16].mxu0 %vm332_vm0, %v7791_v2  ;;  %v7801_v2 = vld [vmem:[%s11438_s4 + $0x150] sm:$0xff] }
 0x462   : > { %7968 = vmatmul.mubr.msk.f32.gmra.mrb[2].mxu1 %vm332_vm0, %v7952_v55  ;;  %2851 = vmatprep.mubr.f32.mxu0 %v11687_v10  ;;  %v11000_v56 = vpop.permute.xlu0 %3355  ;;  %v7962_v55 = vld [vmem:[%s11438_s4 + $0x3d8] sm:$0xff] }
 0x463   : > { %6449 = vmatprep.mubr.f32.mxu1 %v11687_v10  ;;  %7570 = vperm.xlu1 %8386, %v7567_v15   ;;  %v7827_v15 = vld [vmem:[%s11438_s4 + $0x1a0] sm:$0xff] }
 0x465   : > { %7808 = vmatmul.mubr.msk.f32.gmra.mrb[18].mxu0 %vm332_vm0, %v7792_v32 }
 0x466   : > { %v11002_v18 = vpop.permute.xlu1 %7011  ;;  %7969 = vmatmul.mubr.msk.f32.gmra.mrb[4].mxu1 %vm332_vm0, %v7953_v38  ;;  %2857 = vmatprep.mubr.f32.mxu0 %v11687_v10  ;;  %v11034_v49 = vpop.permute.xlu0 %3327 }
 0x467   : > { %6455 = vmatprep.mubr.f32.mxu1 %v11687_v10 }
 0x469   : > { %7809 = vmatmul.mubr.msk.f32.gmra.mrb[20].mxu0 %vm332_vm0, %v7793_v57  ;;  %v7963_v57 = vld [vmem:[%s11438_s4 + $0x3e0] sm:$0xff] }
 0x46a   : > { %v11020_v12 = vpop.permute.xlu1 %3359  ;;  %7970 = vmatmul.mubr.msk.f32.gmra.mrb[6].mxu1 %vm332_vm0, %v7954_v50  ;;  %2863 = vmatprep.mubr.f32.mxu0 %v11687_v10  ;;  %v11058_v23 = vpop.permute.xlu0 %3331  ;;  %v3389_v50 = vsel %vm1272_vm7, %v11744_v7, %v11000_v56  ;;  %v7830_v7 = vld [vmem:[%s11438_s4 + $0x1b8] sm:$0xff] }
 0x46b   : > { %6461 = vmatprep.mubr.f32.mxu1 %v11687_v10  ;;  %v3390_v31 = vsel %vm1274_vm8, %v3389_v50, %v11020_v12  ;;  %v7045_v12 = vsel %vm1272_vm7, %v6974_v11, %v11002_v18  ;;  %v7965_v18 = vld [vmem:[%s11438_s4 + $0x3f0] sm:$0xff]  ;;  %v7991_v50 = vld [vmem:[%s11438_s4 + $0x440] sm:$0xff] }
 0x46d   : > { %7810 = vmatmul.mubr.msk.f32.gmra.mrb[22].mxu0 %vm332_vm0, %v7794_v17 }
 0x46e   : > { %v11040_v8 = vpop.permute.xlu1 %7015  ;;  %7971 = vmatmul.mubr.msk.f32.gmra.mrb[8].mxu1 %vm332_vm0, %v7955_v33  ;;  %2869 = vmatprep.mubr.f32.mxu0 %v11687_v10  ;;  %v11092_v53 = vpop.permute.xlu0 %3335 }
 0x46f   : > { %6467 = vmatprep.mubr.f32.mxu1 %v11687_v10  ;;  %v7046_v1 = vsel %vm1274_vm8, %v7045_v12, %v11040_v8  ;;  %v7995_v12 = vld [vmem:[%s11438_s4 + $0x460] sm:$0xff] }
 0x471   : > { %7811 = vmatmul.mubr.msk.f32.gmra.mrb[24].mxu0 %vm332_vm0, %v7795_v63 }
 0x472   : > { %v11060_v24 = vpop.permute.xlu1 %3363  ;;  %7972 = vmatmul.mubr.msk.f32.gmra.mrb[10].mxu1 %vm332_vm0, %v7956_v62  ;;  %2875 = vmatprep.mubr.f32.mxu0 %v11687_v10  ;;  %v11114_v43 = vpop.permute.xlu0 %3339 }
 0x473   : > { %6473 = vmatprep.mubr.f32.mxu1 %v11687_v10  ;;  %v3391_v4 = vsel %vm1276_vm9, %v3390_v31, %v11060_v24  ;;  %v7831_v31 = vld [vmem:[%s11438_s4 + $0x1c0] sm:$0xff] }
 0x475   : > { %7812 = vmatmul.mubr.msk.f32.gmra.mrb[26].mxu0 %vm332_vm0, %v7796_v44 }
 0x476   : > { %v11078_v58 = vpop.permute.xlu1 %7019  ;;  %7973 = vmatmul.mubr.msk.f32.gmra.mrb[12].mxu1 %vm332_vm0, %v7957_v41  ;;  %2881 = vmatprep.mubr.f32.mxu0 %v11687_v10  ;;  %v11146_v22 = vpop.permute.xlu0 %3343  ;;  %v7805_v41 = vld [vmem:[%s11438_s4 + $0x170] sm:$0xff] }
 0x477   : > { %6479 = vmatprep.mubr.f32.mxu1 %v11687_v10  ;;  %v7047_v37 = vsel %vm1276_vm9, %v7046_v1, %v11078_v58  ;;  %v7966_v58 = vld [vmem:[%s11438_s4 + $0x3f8] sm:$0xff]  ;;  %v7996_v1 = vld [vmem:[%s11438_s4 + $0x468] sm:$0xff] }
 0x479   : > { %7813 = vmatmul.mubr.msk.f32.gmra.mrb[28].mxu0 %vm332_vm0, %v7797_v48 }
 0x47a   : > { %v3368_v36 = vpop.permute.xlu1 %3367  ;;  %7974 = vmatmul.mubr.msk.f32.gmra.mrb[14].mxu1 %vm332_vm0, %v7958_v39  ;;  %2887 = vmatprep.mubr.f32.mxu0 %v11687_v10  ;;  %v11162_v32 = vpop.permute.xlu0 %3347 }
 0x47b   : > { %6485 = vmatprep.mubr.f32.mxu1 %v11687_v10  ;;  %v3392_v56 = vsel %vm1278_vm10, %v3391_v4, %v3368_v36  ;;  %v7833_v4 = vld [vmem:[%s11438_s4 + $0x1d0] sm:$0xff] }
 0x47d   : > { %7814 = vmatmul.mubr.msk.f32.gmra.mrb[30].mxu0 %vm332_vm0, %v7798_v35 }
 0x47e   : > { %v11116_v0 = vpop.permute.xlu1 %7023  ;;  %7975 = vmatmul.mubr.msk.f32.gmra.mrb[16].mxu1 %vm332_vm0, %v7959_v47  ;;  %2893 = vmatprep.mubr.f32.mxu0 %v11687_v10  ;;  %v3382_v47 = vsel %vm1272_vm7, %v11745_v42, %v11034_v49 }
 0x47f   : > { %6491 = vmatprep.mubr.f32.mxu1 %v11687_v10  ;;  %v7048_v8 = vsel %vm1278_vm10, %v7047_v37, %v11116_v0  ;;  %v3383_v27 = vsel %vm1274_vm8, %v3382_v47, %v11058_v23  ;;  %v7838_v37 = vld [vmem:[%s11438_s4 + $0x1f8] sm:$0xff] }
 0x480   : > { %v3384_v0 = vsel %vm1276_vm9, %v3383_v27, %v11092_v53 }
 0x481   : > { %7815 = vmatmul.mubr.msk.f32.gmra.mrb[32].mxu0 %vm332_vm0, %v7799_v3  ;;  %v3385_v61 = vsel %vm1278_vm10, %v3384_v0, %v11114_v43  ;;  %v7984_v43 = vld [vmem:[%s11438_s4 + $0x408] sm:$0xff] }
 0x482   : > { %v3372_v16 = vpop.permute.xlu1 %3371  ;;  %7976 = vmatmul.mubr.msk.f32.gmra.mrb[18].mxu1 %vm332_vm0, %v7960_v30  ;;  %2899 = vmatprep.mubr.f32.mxu0 %v11687_v10  ;;  %v3386_v23 = vsel %vm1280_vm11, %v3385_v61, %v11146_v22  ;;  %v7986_v22 = vld [vmem:[%s11438_s4 + $0x418] sm:$0xff] }
 0x483   : > { %6497 = vmatprep.mubr.f32.mxu1 %v11687_v10  ;;  %v3393_v33 = vsel %vm1280_vm11, %v3392_v56, %v3372_v16  ;;  %v3387_v30 = vsel %vm1282_vm12, %v3386_v23, %v11162_v32  ;;  %v7828_v32 = vld [vmem:[%s11438_s4 + $0x1a8] sm:$0xff]  ;;  %v7834_v56 = vld [vmem:[%s11438_s4 + $0x1d8] sm:$0xff] }
 0x485   : > { %7816 = vmatmul.mubr.msk.f32.gmra.mrb[34].mxu0 %vm332_vm0, %v7800_v9  ;;  %v7824_v9 = vld [vmem:[%s11438_s4 + $0x188] sm:$0xff] }
 0x486   : > { %v7028_v52 = vpop.permute.xlu1 %7027  ;;  %7977 = vmatmul.mubr.msk.f32.gmra.mrb[20].mxu1 %vm332_vm0, %v7961_v13  ;;  %2905 = vmatprep.mubr.f32.mxu0 %v11687_v10  ;;  %v7825_v13 = vld [vmem:[%s11438_s4 + $0x190] sm:$0xff] }
 0x487   : > { %6503 = vmatprep.mubr.f32.mxu1 %v11687_v10  ;;  %v7049_v6 = vsel %vm1280_vm11, %v7048_v8, %v7028_v52  ;;  %v7826_v52 = vld [vmem:[%s11438_s4 + $0x198] sm:$0xff] }
 0x489   : > { %7817 = vmatmul.mubr.msk.f32.gmra.mrb[36].mxu0 %vm332_vm0, %v7801_v2  ;;  %v7987_v2 = vld [vmem:[%s11438_s4 + $0x420] sm:$0xff] }
 0x48a   : > { %v3376_v38 = vpop.permute.xlu1 %3375  ;;  %7978 = vmatmul.mubr.msk.f32.gmra.mrb[22].mxu1 %vm332_vm0, %v7962_v55  ;;  %2911 = vmatprep.mubr.f32.mxu0 %v11687_v10  ;;  %v7988_v55 = vld [vmem:[%s11438_s4 + $0x428] sm:$0xff] }
 0x48b   : > { %6509 = vmatprep.mubr.f32.mxu1 %v11687_v10  ;;  %v3394_v63 = vsel %vm1282_vm12, %v3393_v33, %v3376_v38  ;;  %v7989_v38 = vld [vmem:[%s11438_s4 + $0x430] sm:$0xff]  ;;  %v7835_v33 = vld [vmem:[%s11438_s4 + $0x1e0] sm:$0xff] }
 0x48d   : > { %7818 = vmatmul.mubr.msk.f32.gmra.mrb[38].mxu0 %vm332_vm0, %v7802_v14  ;;  %v7829_v14 = vld [vmem:[%s11438_s4 + $0x1b0] sm:$0xff] }
 0x48e   : > { %v6984_v60 = vpop.permute.xlu0 %6983  ;;  %v7032_v17 = vpop.permute.xlu1 %7031  ;;  %7979 = vmatmul.mubr.msk.f32.gmra.mrb[24].mxu1 %vm332_vm0, %v7963_v57  ;;  %2917 = vmatprep.mubr.f32.mxu0 %v11687_v10  ;;  %v7990_v57 = vld [vmem:[%s11438_s4 + $0x438] sm:$0xff] }
 0x48f   : > { %6515 = vmatprep.mubr.f32.mxu1 %v11687_v10  ;;  %v7050_v24 = vsel %vm1282_vm12, %v7049_v6, %v7032_v17  ;;  %v7038_v39 = vsel %vm1272_vm7, %v6838_v59, %v6984_v60  ;;  %v7992_v60 = vld [vmem:[%s11438_s4 + $0x448] sm:$0xff] }
 0x490   : > { %v7832_v17 = vld [vmem:[%s11438_s4 + $0x1c8] sm:$0xff] }
 0x491   : > { %7819 = vmatmul.mubr.msk.f32.gmra.mrb[40].mxu0 %vm332_vm0, %v7803_v46  ;;  %v7993_v46 = vld [vmem:[%s11438_s4 + $0x450] sm:$0xff] }
 0x492   : > { %v6988_v45 = vpop.permute.xlu0 %6987  ;;  %v3380_v62 = vpop.permute.xlu1 %3379  ;;  %7980 = vmatmul.mubr.msk.f32.gmra.mrb[26].mxu1 %vm332_vm0, %v7964_v21  ;;  %2923 = vmatprep.mubr.f32.mxu0 %v11687_v10  ;;  %v7994_v21 = vld [vmem:[%s11438_s4 + $0x458] sm:$0xff] }
 0x493   : > { %v3395_v11 = vsel %vm1284_vm13, %v3394_v63, %v3380_v62  ;;  %6521 = vmatprep.mubr.f32.mxu1 %v11687_v10  ;;  %v7039_v36 = vsel %vm1274_vm8, %v7038_v39, %v6988_v45  ;;  %v7836_v63 = vld [vmem:[%s11438_s4 + $0x1e8] sm:$0xff]  ;;  %v7997_v45 = vld [vmem:[%s11438_s4 + $0x470] sm:$0xff] }
 0x494   : > { %3461 = vmatprep.subr.mxu0 %v3395_v11  ;;  %v7837_v62 = vld [vmem:[%s11438_s4 + $0x1f0] sm:$0xff] }
 0x495   : > { %7820 = vmatmul.mubr.msk.f32.gmra.mrb[42].mxu0 %vm332_vm0, %v7804_v54  ;;  %v7998_v54 = vld [vmem:[%s11438_s4 + $0x478] sm:$0xff] }
 0x496   : > { %v6992_v44 = vpop.permute.xlu0 %6991  ;;  %v7036_v29 = vpop.permute.xlu1 %7035  ;;  %7981 = vmatmul.mubr.msk.f32.gmra.mrb[28].mxu1 %vm332_vm0, %v7965_v18  ;;  %2929 = vmatprep.mubr.f32.mxu0 %v11687_v10 }
 0x497   : > { %v7051_v26 = vsel %vm1284_vm13, %v7050_v24, %v7036_v29  ;;  %6527 = vmatprep.mubr.f32.mxu1 %v11687_v10  ;;  %v7040_v35 = vsel %vm1276_vm9, %v7039_v36, %v6992_v44 }
 0x498   : > { %7117 = vmatprep.subr.mxu1 %v7051_v26 }
 0x499   : > { %7821 = vmatmul.mubr.msk.f32.gmra.mrb[44].mxu0 %vm332_vm0, %v7805_v41 }
 0x49a   : > { %v6996_v48 = vpop.permute.xlu0 %6995  ;;  %7982 = vmatmul.mubr.msk.f32.gmra.mrb[30].mxu1 %vm332_vm0, %v7966_v58  ;;  %2935 = vmatprep.mubr.f32.mxu0 %v11687_v10  ;;  %v7008_v3 = vpop.permute.xlu1 %7007 }
 0x49b   : > { %7181 = vmatprep.mubr.f32.mxu1 %v11687_v10  ;;  %v7041_v40 = vsel %vm1278_vm10, %v7040_v35, %v6996_v48 }
 0x49d   : > { %7822 = vmatmul.mubr.msk.f32.gmra.mrb[46].mxu0 %vm332_vm0, %v7806_v28 }
 0x49e   : > { %v7000_v25 = vpop.permute.xlu0 %6999  ;;  %3525 = vmatprep.mubr.f32.mxu0 %v11687_v10 }
 0x49f   : > { %v7042_v34 = vsel %vm1280_vm11, %v7041_v40, %v7000_v25 }
 0x4a2   : > { %v7004_v59 = vpop.permute.xlu0 %7003 }
 0x4a3   : > { %v7043_v5 = vsel %vm1282_vm12, %v7042_v34, %v7004_v59 }
 0x4a4   : > { %v7044_v49 = vsel %vm1284_vm13, %v7043_v5, %v7008_v3 }
 0x4a5   : > { %7118 = vmatpush1.msra.mxu1 %v7044_v49 }
 0x4a6   : > { %v3352_v53 = vpop.permute.xlu0 %3351  ;;  %7999 = vmatmul.mubr.msk.f32.vlgmr.msra.gmra.mrb[0].mxu1 %vm332_vm0, %v7983_v19 }
 0x4a7   : > { %v3388_v16 = vsel %vm1284_vm13, %v3387_v30, %v3352_v53  ;;  %7187 = vmatprep.mubr.f32.mxu1 %v11687_v10 }
 0x4a8   : > { %3462 = vmatpush1.msra.mxu0 %v3388_v16 }
 0x4a9   : > { %7839 = vmatmul.mubr.msk.f32.vlgmr.msra.gmra.mrb[16].mxu0 %vm332_vm0, %v7823_v51 }
 0x4aa   : > { %8000 = vmatmul.mubr.msk.f32.gmra.mrb[2].mxu1 %vm332_vm0, %v7984_v43  ;;  %3531 = vmatprep.mubr.f32.mxu0 %v11687_v10 }
 0x4ab   : > { %7193 = vmatprep.mubr.f32.mxu1 %v11687_v10 }
 0x4ad   : > { %7840 = vmatmul.mubr.msk.f32.gmra.mrb[18].mxu0 %vm332_vm0, %v7824_v9 }
 0x4ae   : > { %8001 = vmatmul.mubr.msk.f32.gmra.mrb[4].mxu1 %vm332_vm0, %v7985_v20  ;;  %3537 = vmatprep.mubr.f32.mxu0 %v11687_v10 }
 0x4af   : > { %7199 = vmatprep.mubr.f32.mxu1 %v11687_v10 }
 0x4b1   : > { %7841 = vmatmul.mubr.msk.f32.gmra.mrb[20].mxu0 %vm332_vm0, %v7825_v13 }
 0x4b2   : > { %8002 = vmatmul.mubr.msk.f32.gmra.mrb[6].mxu1 %vm332_vm0, %v7986_v22  ;;  %3543 = vmatprep.mubr.f32.mxu0 %v11687_v10 }
 0x4b3   : > { %7205 = vmatprep.mubr.f32.mxu1 %v11687_v10 }
 0x4b5   : > { %7842 = vmatmul.mubr.msk.f32.gmra.mrb[22].mxu0 %vm332_vm0, %v7826_v52 }
 0x4b6   : > { %8003 = vmatmul.mubr.msk.f32.gmra.mrb[8].mxu1 %vm332_vm0, %v7987_v2  ;;  %3549 = vmatprep.mubr.f32.mxu0 %v11687_v10 }
 0x4b7   : > { %7211 = vmatprep.mubr.f32.mxu1 %v11687_v10 }
 0x4b9   : > { %7843 = vmatmul.mubr.msk.f32.gmra.mrb[24].mxu0 %vm332_vm0, %v7827_v15 }
 0x4ba   : > { %8004 = vmatmul.mubr.msk.f32.gmra.mrb[10].mxu1 %vm332_vm0, %v7988_v55  ;;  %3555 = vmatprep.mubr.f32.mxu0 %v11687_v10 }
 0x4bb   : > { %7217 = vmatprep.mubr.f32.mxu1 %v11687_v10  ;;  %v7425_v41 = vpop.permute.xlu0 %7424 }
 0x4bd   : > { %7844 = vmatmul.mubr.msk.f32.gmra.mrb[26].mxu0 %vm332_vm0, %v7828_v32 }
 0x4be   : > { %8005 = vmatmul.mubr.msk.f32.gmra.mrb[12].mxu1 %vm332_vm0, %v7989_v38  ;;  %3561 = vmatprep.mubr.f32.mxu0 %v11687_v10 }
 0x4bf   : > { %7223 = vmatprep.mubr.f32.mxu1 %v11687_v10  ;;  %v7430_v47 = vpop.permute.xlu1 %7429  ;;  %v7440_v2 = vpop.permute.xlu0 %7439 }
 0x4c1   : > { %7845 = vmatmul.mubr.msk.f32.gmra.mrb[28].mxu0 %vm332_vm0, %v7829_v14 }
 0x4c2   : > { %8006 = vmatmul.mubr.msk.f32.gmra.mrb[14].mxu1 %vm332_vm0, %v7990_v57  ;;  %3567 = vmatprep.mubr.f32.mxu0 %v11687_v10 }
 0x4c3   : > { %7229 = vmatprep.mubr.f32.mxu1 %v11687_v10  ;;  %v7435_v53 = vpop.permute.xlu1 %7434 }
 0x4c5   : > { %7846 = vmatmul.mubr.msk.f32.gmra.mrb[30].mxu0 %vm332_vm0, %v7830_v7 }
 0x4c6   : > { %8007 = vmatmul.mubr.msk.f32.gmra.mrb[16].mxu1 %vm332_vm0, %v7991_v50  ;;  %3573 = vmatprep.mubr.f32.mxu0 %v11687_v10 }
 0x4c7   : > { %7235 = vmatprep.mubr.f32.mxu1 %v11687_v10 }
 0x4c9   : > { %7847 = vmatmul.mubr.msk.f32.gmra.mrb[32].mxu0 %vm332_vm0, %v7831_v31 }
 0x4ca   : > { %8008 = vmatmul.mubr.msk.f32.gmra.mrb[18].mxu1 %vm332_vm0, %v7992_v60  ;;  %3579 = vmatprep.mubr.f32.mxu0 %v11687_v10 }
 0x4cb   : > { %7241 = vmatprep.mubr.f32.mxu1 %v11687_v10 }
 0x4cd   : > { %7848 = vmatmul.mubr.msk.f32.gmra.mrb[34].mxu0 %vm332_vm0, %v7832_v17 }
 0x4ce   : > { %8009 = vmatmul.mubr.msk.f32.gmra.mrb[20].mxu1 %vm332_vm0, %v7993_v46  ;;  %3585 = vmatprep.mubr.f32.mxu0 %v11687_v10 }
 0x4cf   : > { %7247 = vmatprep.mubr.f32.mxu1 %v11687_v10 }
 0x4d1   : > { %7849 = vmatmul.mubr.msk.f32.gmra.mrb[36].mxu0 %vm332_vm0, %v7833_v4 }
 0x4d2   : > { %8010 = vmatmul.mubr.msk.f32.gmra.mrb[22].mxu1 %vm332_vm0, %v7994_v21  ;;  %3591 = vmatprep.mubr.f32.mxu0 %v11687_v10 }
 0x4d3   : > { %7253 = vmatprep.mubr.f32.mxu1 %v11687_v10 }
 0x4d5   : > { %7850 = vmatmul.mubr.msk.f32.gmra.mrb[38].mxu0 %vm332_vm0, %v7834_v56  ;;  %v7445_v56 = vpop.permute.xlu1 %7444 }
 0x4d6   : > { %8011 = vmatmul.mubr.msk.f32.gmra.mrb[24].mxu1 %vm332_vm0, %v7995_v12  ;;  %3597 = vmatprep.mubr.f32.mxu0 %v11687_v10 }
 0x4d7   : > { %7259 = vmatprep.mubr.f32.mxu1 %v11687_v10 }
 0x4d9   : > { %7851 = vmatmul.mubr.msk.f32.gmra.mrb[40].mxu0 %vm332_vm0, %v7835_v33 }
 0x4da   : > { %8012 = vmatmul.mubr.msk.f32.gmra.mrb[26].mxu1 %vm332_vm0, %v7996_v1  ;;  %3603 = vmatprep.mubr.f32.mxu0 %v11687_v10 }
 0x4db   : > { %7265 = vmatprep.mubr.f32.mxu1 %v11687_v10 }
 0x4dd   : > { %7852 = vmatmul.mubr.msk.f32.gmra.mrb[42].mxu0 %vm332_vm0, %v7836_v63 }
 0x4de   : > { %8013 = vmatmul.mubr.msk.f32.gmra.mrb[28].mxu1 %vm332_vm0, %v7997_v45  ;;  %3609 = vmatprep.mubr.f32.mxu0 %v11687_v10 }
 0x4df   : > { %7271 = vmatprep.mubr.f32.mxu1 %v11687_v10 }
 0x4e1   : > { %7853 = vmatmul.mubr.msk.f32.gmra.mrb[44].mxu0 %vm332_vm0, %v7837_v62 }
 0x4e2   : > { %8014 = vmatmul.mubr.msk.f32.gmra.mrb[30].mxu1 %vm332_vm0, %v7998_v54  ;;  %3615 = vmatprep.mubr.f32.mxu0 %v11687_v10 }
 0x4e5   : > { %7854 = vmatmul.mubr.msk.f32.gmra.mrb[46].mxu0 %vm332_vm0, %v7838_v37 }
 0x4e6   : > { %7637 = vmatprep.mubr.f32.mxu0 %v11687_v10 }
 0x579   : > { %v7183_v11 = vpop.f32.mrb[0].mxu1 }
 0x57a   : > { %v7185_v18 = vpop.f32.mrb[1].mxu1 }
 0x57c   : > { %v3527_v8 = vpop.f32.mrb[16].mxu0 }
 0x57d   : > { %v8107_v6 = vadd.f32 %v7183_v11, %v3527_v8  ;;  %v3529_v24 = vpop.f32.mrb[17].mxu0  ;;  %v7189_v44 = vpop.f32.mrb[2].mxu1 }
 0x57e   : > { %v8108_v29 = vadd.f32 %v7185_v18, %v3529_v24  ;;  %v7191_v26 = vpop.f32.mrb[3].mxu1  ;;  %v7450_v11 = vpop.permute.xlu0 %7449 }
 0x57f   : > { %v7502_v48 = vadd.f32 %v8107_v6, %v7425_v41 }
 0x580   : > { %v3533_v58 = vpop.f32.mrb[18].mxu0  ;;  %v7503_v36 = vadd.f32 %v8108_v29, %v7425_v41 }
 0x581   : > { %v8109_v28 = vadd.f32 %v7189_v44, %v3533_v58  ;;  %v3535_v39 = vpop.f32.mrb[19].mxu0  ;;  %v7195_v25 = vpop.f32.mrb[4].mxu1  ;;  %v7534_v34 = vmax.f32 %v7502_v48, 0.0 }
 0x582   : > { %v8110_v35 = vadd.f32 %v7191_v26, %v3535_v39  ;;  %v7197_v42 = vpop.f32.mrb[5].mxu1  ;;  %v7535_v19 = vmax.f32 %v7503_v36, 0.0 }
 0x583   : > { %v7504_v40 = vadd.f32 %v8109_v28, %v7430_v47 }
 0x584   : > { %v7505_v10 = vadd.f32 %v8110_v35, %v7430_v47  ;;  %v3539_v27 = vpop.f32.mrb[20].mxu0  ;;  %v7455_v35 = vpop.permute.xlu1 %7454 }
 0x585   : > { %v7536_v59 = vmax.f32 %v7504_v40, 0.0  ;;  %v8111_v0 = vadd.f32 %v7195_v25, %v3539_v27  ;;  %v3541_v3 = vpop.f32.mrb[21].mxu0  ;;  %v7201_v5 = vpop.f32.mrb[6].mxu1 }
 0x586   : > { %v7537_v61 = vmax.f32 %v7505_v10, 0.0  ;;  %v8112_v49 = vadd.f32 %v7197_v42, %v3541_v3  ;;  %v7203_v23 = vpop.f32.mrb[7].mxu1  ;;  %v7460_v3 = vpop.permute.xlu0 %7459 }
 0x587   : > { %v8077_v30 = vpack.c.bf16 %v7536_v59, %v7534_v34  ;;  %v7506_v43 = vadd.f32 %v8111_v0, %v7435_v53 }
 0x588   : > { %v3545_v51 = vpop.f32.mrb[22].mxu0  ;;  %v8075_v16 = vpack.c.bf16 %v7537_v61, %v7535_v19  ;;  %v7507_v22 = vadd.f32 %v8112_v49, %v7435_v53 }
 0x589   : > { %v8113_v9 = vadd.f32 %v7201_v5, %v3545_v51  ;;  %v3547_v20 = vpop.f32.mrb[23].mxu0  ;;  %v7207_v13 = vpop.f32.mrb[8].mxu1  ;;  %v7538_v14 = vmax.f32 %v7506_v43, 0.0 }
 0x58a   : > { %v8114_v52 = vadd.f32 %v7203_v23, %v3547_v20  ;;  %v7209_v15 = vpop.f32.mrb[9].mxu1  ;;  %8076 = vmatprep.subr.bf16.mxu0 %v8075_v16  ;;  %v7539_v60 = vmax.f32 %v7507_v22, 0.0 }
 0x58b   : > { %v7508_v55 = vadd.f32 %v8113_v9, %v7440_v2  ;;  %8078 = vmatpush1.bf16.msra.mxu0 %v8077_v30 }
 0x58c   : > { %v7509_v32 = vadd.f32 %v8114_v52, %v7440_v2  ;;  %v3551_v38 = vpop.f32.mrb[24].mxu0  ;;  %v7465_v52 = vpop.permute.xlu1 %7464 }
 0x58d   : > { %v7540_v57 = vmax.f32 %v7508_v55, 0.0  ;;  %v8115_v7 = vadd.f32 %v7207_v13, %v3551_v38  ;;  %v3553_v50 = vpop.f32.mrb[25].mxu0  ;;  %v7213_v31 = vpop.f32.mrb[10].mxu1 }
 0x58e   : > { %v7541_v17 = vmax.f32 %v7509_v32, 0.0  ;;  %v8116_v46 = vadd.f32 %v7209_v15, %v3553_v50  ;;  %v7215_v4 = vpop.f32.mrb[11].mxu1  ;;  %v7470_v50 = vpop.permute.xlu0 %7469 }
 0x58f   : > { %v8081_v21 = vpack.c.bf16 %v7540_v57, %v7538_v14  ;;  %v7510_v1 = vadd.f32 %v8115_v7, %v7445_v56 }
 0x590   : > { %v3557_v12 = vpop.f32.mrb[26].mxu0  ;;  %v8079_v33 = vpack.c.bf16 %v7541_v17, %v7539_v60  ;;  %v7511_v54 = vadd.f32 %v8116_v46, %v7445_v56 }
 0x591   : > { %v8117_v63 = vadd.f32 %v7213_v31, %v3557_v12  ;;  %v3559_v45 = vpop.f32.mrb[27].mxu0  ;;  %v7219_v62 = vpop.f32.mrb[12].mxu1  ;;  %v7542_v44 = vmax.f32 %v7510_v1, 0.0 }
 0x592   : > { %v8118_v37 = vadd.f32 %v7215_v4, %v3559_v45  ;;  %v7221_v18 = vpop.f32.mrb[13].mxu1  ;;  %8080 = vmatprep.subr.bf16.mxu0 %v8079_v33  ;;  %v7543_v48 = vmax.f32 %v7511_v54, 0.0 }
 0x593   : > { %v7512_v8 = vadd.f32 %v8117_v63, %v7450_v11  ;;  %8082 = vmatpush1.bf16.msra.mxu0 %v8081_v21 }
 0x594   : > { %v7513_v6 = vadd.f32 %v8118_v37, %v7450_v11  ;;  %v3563_v24 = vpop.f32.mrb[28].mxu0  ;;  %v7475_v37 = vpop.permute.xlu1 %7474 }
 0x595   : > { %v7544_v29 = vmax.f32 %v7512_v8, 0.0  ;;  %v8119_v41 = vadd.f32 %v7219_v62, %v3563_v24  ;;  %v3565_v26 = vpop.f32.mrb[29].mxu0  ;;  %v7225_v58 = vpop.f32.mrb[14].mxu1 }
 0x596   : > { %v7545_v28 = vmax.f32 %v7513_v6, 0.0  ;;  %v8120_v39 = vadd.f32 %v7221_v18, %v3565_v26  ;;  %v7227_v25 = vpop.f32.mrb[15].mxu1  ;;  %v7480_v26 = vpop.permute.xlu0 %7479 }
 0x597   : > { %v8085_v36 = vpack.c.bf16 %v7544_v29, %v7542_v44  ;;  %v7514_v40 = vadd.f32 %v8119_v41, %v7455_v35 }
 0x598   : > { %v3569_v42 = vpop.f32.mrb[30].mxu0  ;;  %v8083_v47 = vpack.c.bf16 %v7545_v28, %v7543_v48  ;;  %v7515_v59 = vadd.f32 %v8120_v39, %v7455_v35 }
 0x599   : > { %v8121_v10 = vadd.f32 %v7225_v58, %v3569_v42  ;;  %v3571_v27 = vpop.f32.mrb[31].mxu0  ;;  %v7231_v34 = vpop.f32.mrb[16].mxu1  ;;  %v7546_v23 = vmax.f32 %v7514_v40, 0.0 }
 0x59a   : > { %v8122_v0 = vadd.f32 %v7227_v25, %v3571_v27  ;;  %v7233_v5 = vpop.f32.mrb[17].mxu1  ;;  %8084 = vmatprep.subr.bf16.mxu0 %v8083_v47  ;;  %v7547_v43 = vmax.f32 %v7515_v59, 0.0 }
 0x59b   : > { %v7516_v19 = vadd.f32 %v8121_v10, %v7460_v3  ;;  %8086 = vmatpush1.bf16.msra.mxu0 %v8085_v36 }
 0x59c   : > { %v7517_v61 = vadd.f32 %v8122_v0, %v7460_v3  ;;  %v3575_v49 = vpop.f32.mrb[32].mxu0  ;;  %v7485_v0 = vpop.permute.xlu1 %7484 }
 0x59d   : > { %v7548_v30 = vmax.f32 %v7516_v19, 0.0  ;;  %v8123_v53 = vadd.f32 %v7231_v34, %v3575_v49  ;;  %v3577_v51 = vpop.f32.mrb[33].mxu0  ;;  %v7237_v16 = vpop.f32.mrb[18].mxu1 }
 0x59e   : > { %v7549_v9 = vmax.f32 %v7517_v61, 0.0  ;;  %v8124_v20 = vadd.f32 %v7233_v5, %v3577_v51  ;;  %v7239_v13 = vpop.f32.mrb[19].mxu1  ;;  %v7490_v51 = vpop.permute.xlu0 %7489 }
 0x59f   : > { %v8089_v22 = vpack.c.bf16 %v7548_v30, %v7546_v23  ;;  %v7518_v55 = vadd.f32 %v8123_v53, %v7465_v52 }
 0x5a0   : > { %v3581_v2 = vpop.f32.mrb[34].mxu0  ;;  %v8087_v15 = vpack.c.bf16 %v7549_v9, %v7547_v43  ;;  %v7519_v57 = vadd.f32 %v8124_v20, %v7465_v52 }
 0x5a1   : > { %v8125_v32 = vadd.f32 %v7237_v16, %v3581_v2  ;;  %v3583_v38 = vpop.f32.mrb[35].mxu0  ;;  %v7243_v14 = vpop.f32.mrb[20].mxu1  ;;  %v7550_v4 = vmax.f32 %v7518_v55, 0.0 }
 0x5a2   : > { %v8126_v7 = vadd.f32 %v7239_v13, %v3583_v38  ;;  %v7245_v31 = vpop.f32.mrb[21].mxu1  ;;  %8088 = vmatprep.subr.bf16.mxu0 %v8087_v15  ;;  %v7551_v1 = vmax.f32 %v7519_v57, 0.0 }
 0x5a3   : > { %v7520_v60 = vadd.f32 %v8125_v32, %v7470_v50  ;;  %8090 = vmatpush1.bf16.msra.mxu0 %v8089_v22 }
 0x5a4   : > { %v7521_v17 = vadd.f32 %v8126_v7, %v7470_v50  ;;  %v3587_v46 = vpop.f32.mrb[36].mxu0  ;;  %v7495_v7 = vpop.permute.xlu1 %7494 }
 0x5a5   : > { %v7552_v21 = vmax.f32 %v7520_v60, 0.0  ;;  %v8127_v56 = vadd.f32 %v7243_v14, %v3587_v46  ;;  %v3589_v12 = vpop.f32.mrb[37].mxu0  ;;  %v7249_v33 = vpop.f32.mrb[22].mxu1 }
 0x5a6   : > { %v7553_v63 = vmax.f32 %v7521_v17, 0.0  ;;  %v8128_v45 = vadd.f32 %v7245_v31, %v3589_v12  ;;  %v7251_v62 = vpop.f32.mrb[23].mxu1 }
 0x5a7   : > { %v8093_v54 = vpack.c.bf16 %v7552_v21, %v7550_v4  ;;  %v7522_v8 = vadd.f32 %v8127_v56, %v7475_v37  ;;  %v7500_v56 = vpop.permute.xlu0 %7499 }
 0x5a8   : > { %v3593_v11 = vpop.f32.mrb[38].mxu0  ;;  %v8091_v18 = vpack.c.bf16 %v7553_v63, %v7551_v1  ;;  %v7523_v29 = vadd.f32 %v8128_v45, %v7475_v37 }
 0x5a9   : > { %v8129_v6 = vadd.f32 %v7249_v33, %v3593_v11  ;;  %v3595_v24 = vpop.f32.mrb[39].mxu0  ;;  %v7255_v44 = vpop.f32.mrb[24].mxu1  ;;  %v7554_v25 = vmax.f32 %v7522_v8, 0.0  ;;  %v7566_v11 = vld [vmem:[%s11440_s6] sm:$0xf] }
 0x5aa   : > { %v8130_v41 = vadd.f32 %v7251_v62, %v3595_v24  ;;  %v7257_v58 = vpop.f32.mrb[25].mxu1  ;;  %8092 = vmatprep.subr.bf16.mxu0 %v8091_v18  ;;  %v7555_v40 = vmax.f32 %v7523_v29, 0.0  ;;  %v7571_v18 = vpop.permute.xlu1 %7570 }
 0x5ab   : > { %v7524_v48 = vadd.f32 %v8129_v6, %v7480_v26  ;;  %8094 = vmatpush1.bf16.msra.mxu0 %v8093_v54 }
 0x5ac   : > { %v7525_v28 = vadd.f32 %v8130_v41, %v7480_v26  ;;  %v3599_v39 = vpop.f32.mrb[40].mxu0 }
 0x5ad   : > { %v7556_v36 = vmax.f32 %v7524_v48, 0.0  ;;  %v8131_v35 = vadd.f32 %v7255_v44, %v3599_v39  ;;  %v3601_v42 = vpop.f32.mrb[41].mxu0  ;;  %v7261_v47 = vpop.f32.mrb[26].mxu1 }
 0x5ae   : > { %v7557_v10 = vmax.f32 %v7525_v28, 0.0  ;;  %v8132_v27 = vadd.f32 %v7257_v58, %v3601_v42  ;;  %v7263_v34 = vpop.f32.mrb[27].mxu1 }
 0x5af   : > { %v8097_v59 = vpack.c.bf16 %v7556_v36, %v7554_v25  ;;  %v7526_v19 = vadd.f32 %v8131_v35, %v7485_v0 }
 0x5b0   : > { %v3605_v3 = vpop.f32.mrb[42].mxu0  ;;  %v8095_v5 = vpack.c.bf16 %v7557_v10, %v7555_v40  ;;  %v7527_v30 = vadd.f32 %v8132_v27, %v7485_v0 }
 0x5b1   : > { %v8133_v61 = vadd.f32 %v7261_v47, %v3605_v3  ;;  %v3607_v49 = vpop.f32.mrb[43].mxu0  ;;  %v7267_v23 = vpop.f32.mrb[28].mxu1  ;;  %v7558_v13 = vmax.f32 %v7526_v19, 0.0 }
 0x5b2   : > { %v8134_v53 = vadd.f32 %v7263_v34, %v3607_v49  ;;  %v7269_v16 = vpop.f32.mrb[29].mxu1  ;;  %8096 = vmatprep.subr.bf16.mxu0 %v8095_v5  ;;  %v7559_v55 = vmax.f32 %v7527_v30, 0.0 }
 0x5b3   : > { %v7528_v43 = vadd.f32 %v8133_v61, %v7490_v51  ;;  %8098 = vmatpush1.bf16.msra.mxu0 %v8097_v59 }
 0x5b4   : > { %v7529_v9 = vadd.f32 %v8134_v53, %v7490_v51  ;;  %v3611_v20 = vpop.f32.mrb[44].mxu0 }
 0x5b5   : > { %v7560_v22 = vmax.f32 %v7528_v43, 0.0  ;;  %v8135_v52 = vadd.f32 %v7267_v23, %v3611_v20  ;;  %v3613_v2 = vpop.f32.mrb[45].mxu0  ;;  %v7273_v15 = vpop.f32.mrb[30].mxu1 }
 0x5b6   : > { %v7561_v32 = vmax.f32 %v7529_v9, 0.0  ;;  %v8136_v38 = vadd.f32 %v7269_v16, %v3613_v2  ;;  %v7275_v14 = vpop.f32.mrb[31].mxu1 }
 0x5b7   : > { %v8101_v57 = vpack.c.bf16 %v7560_v22, %v7558_v13  ;;  %v7530_v60 = vadd.f32 %v8135_v52, %v7495_v7 }
 0x5b8   : > { %v3617_v50 = vpop.f32.mrb[46].mxu0  ;;  %v8099_v31 = vpack.c.bf16 %v7561_v32, %v7559_v55  ;;  %v7531_v4 = vadd.f32 %v8136_v38, %v7495_v7 }
 0x5b9   : > { %v8137_v17 = vadd.f32 %v7273_v15, %v3617_v50  ;;  %v3619_v46 = vpop.f32.mrb[47].mxu0  ;;  %v7562_v1 = vmax.f32 %v7530_v60, 0.0 }
 0x5ba   : > { %v8138_v21 = vadd.f32 %v7275_v14, %v3619_v46  ;;  %8100 = vmatprep.subr.bf16.mxu0 %v8099_v31  ;;  %v7563_v45 = vmax.f32 %v7531_v4, 0.0 }
 0x5bb   : > { %v7532_v12 = vadd.f32 %v8137_v17, %v7500_v56  ;;  %8102 = vmatpush1.bf16.msra.mxu0 %v8101_v57 }
 0x5bc   : > { %v7533_v33 = vadd.f32 %v8138_v21, %v7500_v56 }
 0x5bd   : > { %v7564_v63 = vmax.f32 %v7532_v12, 0.0 }
 0x5be   : > { %v7565_v62 = vmax.f32 %v7533_v33, 0.0 }
 0x5bf   : > { %v8105_v54 = vpack.c.bf16 %v7564_v63, %v7562_v1 }
 0x5c0   : > { %v8103_v37 = vpack.c.bf16 %v7565_v62, %v7563_v45 }
 0x5c2   : > { %8104 = vmatprep.subr.bf16.mxu0 %v8103_v37 }
 0x5c3   : > { %8106 = vmatpush1.bf16.msra.mxu0 %v8105_v54 }
 0x5c6   : > { %7638 = vmatmul.mubr.f32.vlgmr.msra.gmra.mrb[48].mxu0 %v7566_v11 }
 0x699   : > { %v7639_v8 = vpop.f32.mrb[48].mxu0 }
 0x69a   : > { %v7640_v6 = vadd.f32 %v7639_v8, %v7571_v18  ;;  %v7641_v24 = vpop.f32.mrb[49].mxu0 }
 0x69b   : > { %v7642_v44 = vadd.f32 %v7641_v24, %v7571_v18 }
 0x69d   : > { %v7646_v29 = vcombine.low %v7640_v6, %v7642_v44 }
 0x69f   : > { %7648 = vst [vmem:[%s325_s21] sm:$0xff] %v7646_v29 }
 0x6a0 PF: > { %s18_s27 = sadd.s32 1, %s8452_s27  }
 0x6a1   : > { %p15_p4 = scmp.ge.s32.totalorder %s18_s27, 4  }
 0x6a3   :  { %17 = sbr.rel (!%p15_p4) target bundleno = 1 (0x1), region = 94 }

</bundles_post_ra>
